<compile_context>
chip_gen: v7x
topology: tpu7x:2x2x1
jax: 0.10.0
libtpu: 0.0.40
codegen_flags: <defaults>
</compile_context>

<pallas_src>
import functools

import jax
import jax.numpy as jnp
from jax.experimental import pallas as pl
from jax.experimental.pallas import tpu as pltpu

EPS = 1e-5


def _twice_conv_kernel(x_ref, w1_ref, b1_ref, g1_ref, be1_ref,
                       w2_ref, b2_ref, g2_ref, be2_ref,
                       o_ref, patch_ref, *, width):
    # x_ref:     (N, C, H*W)   f32  NCHW input with spatial dims flattened into lanes
    # w*_ref:    (C, 9*C)      bf16 conv weights, columns ordered (ky, kx, cin)
    # b*,g*,be*: (C, 1)        f32  conv bias / BN gamma / BN beta (per channel)
    # o_ref:     (N, C, H*W)   f32
    # patch_ref: (N, 9*C, H*W) bf16 im2col scratch, reused by both convs
    N, C, HW = x_ref.shape
    W = width
    P = N * HW
    inv_p = 1.0 / P

    # Halo masks on the flattened lane index (computed once, reused by both convs).
    lane = jax.lax.broadcasted_iota(jnp.int32, (1, HW), 1)
    col = (lane & (W - 1)) if (W & (W - 1)) == 0 else (lane % W)
    not_top = lane >= W            # a row above exists    (dy = -1 valid)
    not_bot = lane < HW - W        # a row below exists    (dy = +1 valid)
    not_lft = col > 0              # a column left exists  (dx = -1 valid)
    not_rgt = col < W - 1          # a column right exists (dx = +1 valid)

    def shift_lanes(a, s):
        # a: (C, HW).  result[:, p] = a[:, p + s]; the |s| edge lanes are filled
        # with zeros (those positions are masked out by the halo masks anyway).
        if s == 0:
            return a
        z = jnp.zeros((a.shape[0], abs(s)), a.dtype)
        if s > 0:
            return jnp.concatenate([a[:, s:], z], axis=1)
        return jnp.concatenate([z, a[:, :s]], axis=1)

    def build_patches(acts):
        # acts: list of N (C, HW) f32 activations -> fill patch_ref (bf16).
        # Tap slab k = ky*3 + kx lives in rows [k*C, (k+1)*C): a full-lane,
        # sublane-aligned store (C is a multiple of the sublane tile).
        for n in range(N):
            a = acts[n]
            for ky in range(3):
                for kx in range(3):
                    dy, dx = ky - 1, kx - 1
                    v = shift_lanes(a, dy * W + dx)
                    valid = None
                    if dy == -1:
                        valid = not_top
                    elif dy == 1:
                        valid = not_bot
                    if dx == -1:
                        valid = not_lft if valid is None else valid & not_lft
                    elif dx == 1:
                        valid = not_rgt if valid is None else valid & not_rgt
                    if valid is not None:
                        v = jnp.where(valid, v, 0.0)
                    k = ky * 3 + kx
                    patch_ref[n, k * C:(k + 1) * C, :] = v.astype(patch_ref.dtype)

    def conv_bn_relu(acts, w_ref, b_ref, g_ref, be_ref):
        build_patches(acts)
        # One big-K (K = 9*C) bf16 MXU matmul per batch element, f32 accumulation:
        #   (C, 9C) @ (9C, HW) -> (C, HW).  Output/intermediates are lane-dense.
        ys = [jnp.dot(w_ref[...], patch_ref[n],
                      preferred_element_type=jnp.float32) + b_ref[...]
              for n in range(N)]
        # Training-mode BatchNorm over (N, H, W) per channel: two-pass, biased
        # variance (numerically safe), eps = 1e-5.  All math in f32.
        mean = sum(jnp.sum(y, axis=1, keepdims=True) for y in ys) * inv_p     # (C, 1)
        ds = [y - mean for y in ys]
        var = sum(jnp.sum(d * d, axis=1, keepdims=True) for d in ds) * inv_p  # (C, 1)
        scale = g_ref[...] * jax.lax.rsqrt(var + EPS)                         # (C, 1)
        return [jnp.maximum(d * scale + be_ref[...], 0.0) for d in ds]

    h1 = conv_bn_relu([x_ref[n] for n in range(N)],
                      w1_ref, b1_ref, g1_ref, be1_ref)
    h2 = conv_bn_relu(h1, w2_ref, b2_ref, g2_ref, be2_ref)
    for n in range(N):
        o_ref[n] = h2[n].astype(o_ref.dtype)


@jax.jit
def twice_conv(x_nchw, w1, b1, g1, be1, w2, b2, g2, be2):
    """x_nchw: (N, C, H, W) f32.  w*: (Cout, Cin, 3, 3) PyTorch layout."""
    N, C, H, W = x_nchw.shape
    HW = H * W
    P = N * HW

    # NCHW -> (N, C, H*W): a pure reshape — no wrapper transpose of activations.
    x = x_nchw.reshape(N, C, HW)

    # PyTorch (Cout, Cin, kH, kW) -> (Cout, kH, kW, Cin) -> (C, 9*C), bf16 MXU
    # operands (the dot accumulates in f32 inside the kernel).  Tiny arrays.
    w1_f = jnp.transpose(w1, (0, 2, 3, 1)).reshape(C, 9 * C).astype(jnp.bfloat16)
    w2_f = jnp.transpose(w2, (0, 2, 3, 1)).reshape(C, 9 * C).astype(jnp.bfloat16)

    flops = 2 * (2 * C * (9 * C) * P) + 2 * 10 * P * C       # conv matmuls + BN/ReLU
    bytes_accessed = 4 * (x.size + P * C) + 2 * 2 * (9 * C * C) + 4 * 6 * C
    cost = pl.CostEstimate(flops=flops, transcendentals=2 * C,
                           bytes_accessed=bytes_accessed)

    vmem = pl.BlockSpec(memory_space=pltpu.MemorySpace.VMEM)
    out = pl.pallas_call(
        functools.partial(_twice_conv_kernel, width=W),
        out_shape=jax.ShapeDtypeStruct((N, C, HW), jnp.float32),
        in_specs=[vmem] * 9,
        out_specs=vmem,
        scratch_shapes=[pltpu.VMEM((N, 9 * C, HW), jnp.bfloat16)],
        # ~1 MiB needed at this shape; 32 MiB is safe on v5e/v6e/v7x.  Revisit
        # (raise on v6e, stay well under 64 MiB on v7x) when the tiled path lands.
        compiler_params=pltpu.CompilerParams(vmem_limit_bytes=32 * 1024 * 1024),
        cost_estimate=cost,
    )(x, w1_f, b1.reshape(C, 1), g1.reshape(C, 1), be1.reshape(C, 1),
      w2_f, b2.reshape(C, 1), g2.reshape(C, 1), be2.reshape(C, 1))

    # (N, C, H*W) -> NCHW: again a pure reshape, no transpose.
    return out.reshape(N, C, H, W)


def _reference(x_nchw, w1, b1, g1, be1, w2, b2, g2, be2):
    """Pure-JAX f32 reference (conv + training-mode BN + ReLU, twice)."""
    def block(x, w, b, g, be):
        y = jax.lax.conv_general_dilated(
            x, w, window_strides=(1, 1), padding="SAME",
            dimension_numbers=("NCHW", "OIHW", "NCHW"))
        y = y + b.reshape(1, -1, 1, 1)
        mean = jnp.mean(y, axis=(0, 2, 3), keepdims=True)
        var = jnp.mean((y - mean) ** 2, axis=(0, 2, 3), keepdims=True)
        yhat = (y - mean) * jax.lax.rsqrt(var + EPS)
        return jnp.maximum(
            yhat * g.reshape(1, -1, 1, 1) + be.reshape(1, -1, 1, 1), 0.0)

    return block(block(x_nchw, w1, b1, g1, be1), w2, b2, g2, be2)


if __name__ == "__main__":
    N, C, H, W = 2, 32, 16, 16
    key = jax.random.PRNGKey(0)
    keys = jax.random.split(key, 9)

    x = jax.random.normal(keys[0], (N, C, H, W), jnp.float32)
    # Conv2d(channel, channel, 3, 3) parameters, deterministic synthetic init.
    w1 = jax.random.normal(keys[1], (C, C, 3, 3), jnp.float32) * 0.1
    b1 = jax.random.normal(keys[2], (C,), jnp.float32) * 0.1
    w2 = jax.random.normal(keys[3], (C, C, 3, 3), jnp.float32) * 0.1
    b2 = jax.random.normal(keys[4], (C,), jnp.float32) * 0.1
    # BatchNorm2d affine params (gamma, beta).
    g1 = 1.0 + 0.1 * jax.random.normal(keys[5], (C,), jnp.float32)
    be1 = 0.1 * jax.random.normal(keys[6], (C,), jnp.float32)
    g2 = 1.0 + 0.1 * jax.random.normal(keys[7], (C,), jnp.float32)
    be2 = 0.1 * jax.random.normal(keys[8], (C,), jnp.float32)

    out = jax.block_until_ready(twice_conv(x, w1, b1, g1, be1, w2, b2, g2, be2))
    ref = jax.block_until_ready(_reference(x, w1, b1, g1, be1, w2, b2, g2, be2))

    assert out.shape == (N, C, H, W)
    # bf16 MXU operands (f32 accumulation) round each conv operand to 8 mantissa
    # bits; after two BN-normalized conv layers the deviation from the pure-f32
    # reference is O(1e-3)-O(1e-2), hence the 2e-2 tolerance (with f32 MXU
    # operands this kernel matches the reference at 2e-3).
    assert jnp.allclose(out, ref, atol=2e-2, rtol=2e-2), (
        float(jnp.max(jnp.abs(out - ref))))

    print("KERNEL_OK")
</pallas_src>

<mosaic_0001>
module attributes {stable_mosaic.version = 11 : i64} {
  func.func @_twice_conv_kernel(%arg0: memref<2x32x256xf32, #tpu.memory_space<vmem>>, %arg1: memref<32x288xbf16, #tpu.memory_space<vmem>>, %arg2: memref<32x1xf32, #tpu.memory_space<vmem>>, %arg3: memref<32x1xf32, #tpu.memory_space<vmem>>, %arg4: memref<32x1xf32, #tpu.memory_space<vmem>>, %arg5: memref<32x288xbf16, #tpu.memory_space<vmem>>, %arg6: memref<32x1xf32, #tpu.memory_space<vmem>>, %arg7: memref<32x1xf32, #tpu.memory_space<vmem>>, %arg8: memref<32x1xf32, #tpu.memory_space<vmem>>, %arg9: memref<2x32x256xf32, #tpu.memory_space<vmem>>, %arg10: memref<2x288x256xbf16, #tpu.memory_space<vmem>>) attributes {dimension_semantics = [], scalar_prefetch = 0 : i64, scratch_operands = 1 : i64, tpu.core_type = #tpu.core_type<tc>} {
    %0 = tpu.iota {dimensions = array<i32: 1>} : vector<1x256xi32>
    %c15_i32 = arith.constant 15 : i32
    %1 = vector.broadcast %c15_i32 : i32 to vector<1x256xi32>
    %2 = arith.andi %0, %1 : vector<1x256xi32>
    %c16_i32 = arith.constant 16 : i32
    %3 = vector.broadcast %c16_i32 : i32 to vector<1x256xi32>
    %4 = arith.cmpi sge, %0, %3 : vector<1x256xi32>
    %c240_i32 = arith.constant 240 : i32
    %5 = vector.broadcast %c240_i32 : i32 to vector<1x256xi32>
    %6 = arith.cmpi slt, %0, %5 : vector<1x256xi32>
    %c0_i32 = arith.constant 0 : i32
    %7 = vector.broadcast %c0_i32 : i32 to vector<1x256xi32>
    %8 = arith.cmpi sgt, %2, %7 : vector<1x256xi32>
    %c15_i32_0 = arith.constant 15 : i32
    %9 = vector.broadcast %c15_i32_0 : i32 to vector<1x256xi32>
    %10 = arith.cmpi slt, %2, %9 : vector<1x256xi32>
    %c0 = arith.constant 0 : index
    %c0_1 = arith.constant 0 : index
    %c0_2 = arith.constant 0 : index
    %11 = vector.load %arg0[%c0, %c0_1, %c0_2] : memref<2x32x256xf32, #tpu.memory_space<vmem>>, vector<1x32x256xf32>
    %12 = vector.shape_cast %11 : vector<1x32x256xf32> to vector<32x256xf32>
    %c1 = arith.constant 1 : index
    %c0_3 = arith.constant 0 : index
    %c0_4 = arith.constant 0 : index
    %13 = vector.load %arg0[%c1, %c0_3, %c0_4] : memref<2x32x256xf32, #tpu.memory_space<vmem>>, vector<1x32x256xf32>
    %14 = vector.shape_cast %13 : vector<1x32x256xf32> to vector<32x256xf32>
    %cst = arith.constant 0.000000e+00 : f32
    %15 = vector.broadcast %cst : f32 to vector<32x17xf32>
    %16 = vector.extract_strided_slice %12 {offsets = [0, 0], sizes = [32, 239], strides = [1, 1]} : vector<32x256xf32> to vector<32x239xf32>
    %17 = tpu.concatenate %15, %16 in 1 : vector<32x17xf32>, vector<32x239xf32> -> vector<32x256xf32>
    %18 = arith.andi %4, %8 : vector<1x256xi1>
    %cst_5 = arith.constant 0.000000e+00 : f32
    %19 = vector.shape_cast %18 : vector<1x256xi1> to vector<1x256xi1>
    %20 = vector.broadcast %19 : vector<1x256xi1> to vector<32x256xi1>
    %21 = vector.broadcast %cst_5 : f32 to vector<32x256xf32>
    %22 = arith.select %20, %17, %21 : vector<32x256xi1>, vector<32x256xf32>
    %23 = arith.truncf %22 : vector<32x256xf32> to vector<32x256xbf16>
    %c0_6 = arith.constant 0 : index
    %c0_7 = arith.constant 0 : index
    %c0_8 = arith.constant 0 : index
    %24 = vector.load %arg10[%c0_6, %c0_7, %c0_8] : memref<2x288x256xbf16, #tpu.memory_space<vmem>>, vector<1x32x256xbf16>
    %25 = vector.shape_cast %24 : vector<1x32x256xbf16> to vector<32x256xbf16>
    %26 = vector.shape_cast %23 : vector<32x256xbf16> to vector<1x32x256xbf16>
    tpu.vector_store %arg10[%c0_6, %c0_7, %c0_8], %26 {strides = array<i32>} : memref<2x288x256xbf16, #tpu.memory_space<vmem>>, vector<1x32x256xbf16>,
    %cst_9 = arith.constant 0.000000e+00 : f32
    %27 = vector.broadcast %cst_9 : f32 to vector<32x16xf32>
    %28 = vector.extract_strided_slice %12 {offsets = [0, 0], sizes = [32, 240], strides = [1, 1]} : vector<32x256xf32> to vector<32x240xf32>
    %29 = tpu.concatenate %27, %28 in 1 : vector<32x16xf32>, vector<32x240xf32> -> vector<32x256xf32>
    %cst_10 = arith.constant 0.000000e+00 : f32
    %30 = vector.shape_cast %4 : vector<1x256xi1> to vector<1x256xi1>
    %31 = vector.broadcast %30 : vector<1x256xi1> to vector<32x256xi1>
    %32 = vector.broadcast %cst_10 : f32 to vector<32x256xf32>
    %33 = arith.select %31, %29, %32 : vector<32x256xi1>, vector<32x256xf32>
    %34 = arith.truncf %33 : vector<32x256xf32> to vector<32x256xbf16>
    %c0_11 = arith.constant 0 : index
    %c32 = arith.constant 32 : index
    %c0_12 = arith.constant 0 : index
    %35 = vector.load %arg10[%c0_11, %c32, %c0_12] : memref<2x288x256xbf16, #tpu.memory_space<vmem>>, vector<1x32x256xbf16>
    %36 = vector.shape_cast %35 : vector<1x32x256xbf16> to vector<32x256xbf16>
    %37 = vector.shape_cast %34 : vector<32x256xbf16> to vector<1x32x256xbf16>
    tpu.vector_store %arg10[%c0_11, %c32, %c0_12], %37 {strides = array<i32>} : memref<2x288x256xbf16, #tpu.memory_space<vmem>>, vector<1x32x256xbf16>,
    %cst_13 = arith.constant 0.000000e+00 : f32
    %38 = vector.broadcast %cst_13 : f32 to vector<32x15xf32>
    %39 = vector.extract_strided_slice %12 {offsets = [0, 0], sizes = [32, 241], strides = [1, 1]} : vector<32x256xf32> to vector<32x241xf32>
    %40 = tpu.concatenate %38, %39 in 1 : vector<32x15xf32>, vector<32x241xf32> -> vector<32x256xf32>
    %41 = arith.andi %4, %10 : vector<1x256xi1>
    %cst_14 = arith.constant 0.000000e+00 : f32
    %42 = vector.shape_cast %41 : vector<1x256xi1> to vector<1x256xi1>
    %43 = vector.broadcast %42 : vector<1x256xi1> to vector<32x256xi1>
    %44 = vector.broadcast %cst_14 : f32 to vector<32x256xf32>
    %45 = arith.select %43, %40, %44 : vector<32x256xi1>, vector<32x256xf32>
    %46 = arith.truncf %45 : vector<32x256xf32> to vector<32x256xbf16>
    %c0_15 = arith.constant 0 : index
    %c64 = arith.constant 64 : index
    %c0_16 = arith.constant 0 : index
    %47 = vector.load %arg10[%c0_15, %c64, %c0_16] : memref<2x288x256xbf16, #tpu.memory_space<vmem>>, vector<1x32x256xbf16>
    %48 = vector.shape_cast %47 : vector<1x32x256xbf16> to vector<32x256xbf16>
    %49 = vector.shape_cast %46 : vector<32x256xbf16> to vector<1x32x256xbf16>
    tpu.vector_store %arg10[%c0_15, %c64, %c0_16], %49 {strides = array<i32>} : memref<2x288x256xbf16, #tpu.memory_space<vmem>>, vector<1x32x256xbf16>,
    %cst_17 = arith.constant 0.000000e+00 : f32
    %50 = vector.broadcast %cst_17 : f32 to vector<32x1xf32>
    %51 = vector.extract_strided_slice %12 {offsets = [0, 0], sizes = [32, 255], strides = [1, 1]} : vector<32x256xf32> to vector<32x255xf32>
    %52 = tpu.concatenate %50, %51 in 1 : vector<32x1xf32>, vector<32x255xf32> -> vector<32x256xf32>
    %cst_18 = arith.constant 0.000000e+00 : f32
    %53 = vector.shape_cast %8 : vector<1x256xi1> to vector<1x256xi1>
    %54 = vector.broadcast %53 : vector<1x256xi1> to vector<32x256xi1>
    %55 = vector.broadcast %cst_18 : f32 to vector<32x256xf32>
    %56 = arith.select %54, %52, %55 : vector<32x256xi1>, vector<32x256xf32>
    %57 = arith.truncf %56 : vector<32x256xf32> to vector<32x256xbf16>
    %c0_19 = arith.constant 0 : index
    %c96 = arith.constant 96 : index
    %c0_20 = arith.constant 0 : index
    %58 = vector.load %arg10[%c0_19, %c96, %c0_20] : memref<2x288x256xbf16, #tpu.memory_space<vmem>>, vector<1x32x256xbf16>
    %59 = vector.shape_cast %58 : vector<1x32x256xbf16> to vector<32x256xbf16>
    %60 = vector.shape_cast %57 : vector<32x256xbf16> to vector<1x32x256xbf16>
    tpu.vector_store %arg10[%c0_19, %c96, %c0_20], %60 {strides = array<i32>} : memref<2x288x256xbf16, #tpu.memory_space<vmem>>, vector<1x32x256xbf16>,
    %61 = arith.truncf %12 : vector<32x256xf32> to vector<32x256xbf16>
    %c0_21 = arith.constant 0 : index
    %c128 = arith.constant 128 : index
    %c0_22 = arith.constant 0 : index
    %62 = vector.load %arg10[%c0_21, %c128, %c0_22] : memref<2x288x256xbf16, #tpu.memory_space<vmem>>, vector<1x32x256xbf16>
    %63 = vector.shape_cast %62 : vector<1x32x256xbf16> to vector<32x256xbf16>
    %64 = vector.shape_cast %61 : vector<32x256xbf16> to vector<1x32x256xbf16>
    tpu.vector_store %arg10[%c0_21, %c128, %c0_22], %64 {strides = array<i32>} : memref<2x288x256xbf16, #tpu.memory_space<vmem>>, vector<1x32x256xbf16>,
    %cst_23 = arith.constant 0.000000e+00 : f32
    %65 = vector.broadcast %cst_23 : f32 to vector<32x1xf32>
    %66 = vector.extract_strided_slice %12 {offsets = [0, 1], sizes = [32, 255], strides = [1, 1]} : vector<32x256xf32> to vector<32x255xf32>
    %67 = tpu.concatenate %66, %65 in 1 : vector<32x255xf32>, vector<32x1xf32> -> vector<32x256xf32>
    %cst_24 = arith.constant 0.000000e+00 : f32
    %68 = vector.shape_cast %10 : vector<1x256xi1> to vector<1x256xi1>
    %69 = vector.broadcast %68 : vector<1x256xi1> to vector<32x256xi1>
    %70 = vector.broadcast %cst_24 : f32 to vector<32x256xf32>
    %71 = arith.select %69, %67, %70 : vector<32x256xi1>, vector<32x256xf32>
    %72 = arith.truncf %71 : vector<32x256xf32> to vector<32x256xbf16>
    %c0_25 = arith.constant 0 : index
    %c160 = arith.constant 160 : index
    %c0_26 = arith.constant 0 : index
    %73 = vector.load %arg10[%c0_25, %c160, %c0_26] : memref<2x288x256xbf16, #tpu.memory_space<vmem>>, vector<1x32x256xbf16>
    %74 = vector.shape_cast %73 : vector<1x32x256xbf16> to vector<32x256xbf16>
    %75 = vector.shape_cast %72 : vector<32x256xbf16> to vector<1x32x256xbf16>
    tpu.vector_store %arg10[%c0_25, %c160, %c0_26], %75 {strides = array<i32>} : memref<2x288x256xbf16, #tpu.memory_space<vmem>>, vector<1x32x256xbf16>,
    %cst_27 = arith.constant 0.000000e+00 : f32
    %76 = vector.broadcast %cst_27 : f32 to vector<32x15xf32>
    %77 = vector.extract_strided_slice %12 {offsets = [0, 15], sizes = [32, 241], strides = [1, 1]} : vector<32x256xf32> to vector<32x241xf32>
    %78 = tpu.concatenate %77, %76 in 1 : vector<32x241xf32>, vector<32x15xf32> -> vector<32x256xf32>
    %79 = arith.andi %6, %8 : vector<1x256xi1>
    %cst_28 = arith.constant 0.000000e+00 : f32
    %80 = vector.shape_cast %79 : vector<1x256xi1> to vector<1x256xi1>
    %81 = vector.broadcast %80 : vector<1x256xi1> to vector<32x256xi1>
    %82 = vector.broadcast %cst_28 : f32 to vector<32x256xf32>
    %83 = arith.select %81, %78, %82 : vector<32x256xi1>, vector<32x256xf32>
    %84 = arith.truncf %83 : vector<32x256xf32> to vector<32x256xbf16>
    %c0_29 = arith.constant 0 : index
    %c192 = arith.constant 192 : index
    %c0_30 = arith.constant 0 : index
    %85 = vector.load %arg10[%c0_29, %c192, %c0_30] : memref<2x288x256xbf16, #tpu.memory_space<vmem>>, vector<1x32x256xbf16>
    %86 = vector.shape_cast %85 : vector<1x32x256xbf16> to vector<32x256xbf16>
    %87 = vector.shape_cast %84 : vector<32x256xbf16> to vector<1x32x256xbf16>
    tpu.vector_store %arg10[%c0_29, %c192, %c0_30], %87 {strides = array<i32>} : memref<2x288x256xbf16, #tpu.memory_space<vmem>>, vector<1x32x256xbf16>,
    %cst_31 = arith.constant 0.000000e+00 : f32
    %88 = vector.broadcast %cst_31 : f32 to vector<32x16xf32>
    %89 = vector.extract_strided_slice %12 {offsets = [0, 16], sizes = [32, 240], strides = [1, 1]} : vector<32x256xf32> to vector<32x240xf32>
    %90 = tpu.concatenate %89, %88 in 1 : vector<32x240xf32>, vector<32x16xf32> -> vector<32x256xf32>
    %cst_32 = arith.constant 0.000000e+00 : f32
    %91 = vector.shape_cast %6 : vector<1x256xi1> to vector<1x256xi1>
    %92 = vector.broadcast %91 : vector<1x256xi1> to vector<32x256xi1>
    %93 = vector.broadcast %cst_32 : f32 to vector<32x256xf32>
    %94 = arith.select %92, %90, %93 : vector<32x256xi1>, vector<32x256xf32>
    %95 = arith.truncf %94 : vector<32x256xf32> to vector<32x256xbf16>
    %c0_33 = arith.constant 0 : index
    %c224 = arith.constant 224 : index
    %c0_34 = arith.constant 0 : index
    %96 = vector.load %arg10[%c0_33, %c224, %c0_34] : memref<2x288x256xbf16, #tpu.memory_space<vmem>>, vector<1x32x256xbf16>
    %97 = vector.shape_cast %96 : vector<1x32x256xbf16> to vector<32x256xbf16>
    %98 = vector.shape_cast %95 : vector<32x256xbf16> to vector<1x32x256xbf16>
    tpu.vector_store %arg10[%c0_33, %c224, %c0_34], %98 {strides = array<i32>} : memref<2x288x256xbf16, #tpu.memory_space<vmem>>, vector<1x32x256xbf16>,
    %cst_35 = arith.constant 0.000000e+00 : f32
    %99 = vector.broadcast %cst_35 : f32 to vector<32x17xf32>
    %100 = vector.extract_strided_slice %12 {offsets = [0, 17], sizes = [32, 239], strides = [1, 1]} : vector<32x256xf32> to vector<32x239xf32>
    %101 = tpu.concatenate %100, %99 in 1 : vector<32x239xf32>, vector<32x17xf32> -> vector<32x256xf32>
    %102 = arith.andi %6, %10 : vector<1x256xi1>
    %cst_36 = arith.constant 0.000000e+00 : f32
    %103 = vector.shape_cast %102 : vector<1x256xi1> to vector<1x256xi1>
    %104 = vector.broadcast %103 : vector<1x256xi1> to vector<32x256xi1>
    %105 = vector.broadcast %cst_36 : f32 to vector<32x256xf32>
    %106 = arith.select %104, %101, %105 : vector<32x256xi1>, vector<32x256xf32>
    %107 = arith.truncf %106 : vector<32x256xf32> to vector<32x256xbf16>
    %c0_37 = arith.constant 0 : index
    %c256 = arith.constant 256 : index
    %c0_38 = arith.constant 0 : index
    %108 = vector.load %arg10[%c0_37, %c256, %c0_38] : memref<2x288x256xbf16, #tpu.memory_space<vmem>>, vector<1x32x256xbf16>
    %109 = vector.shape_cast %108 : vector<1x32x256xbf16> to vector<32x256xbf16>
    %110 = vector.shape_cast %107 : vector<32x256xbf16> to vector<1x32x256xbf16>
    tpu.vector_store %arg10[%c0_37, %c256, %c0_38], %110 {strides = array<i32>} : memref<2x288x256xbf16, #tpu.memory_space<vmem>>, vector<1x32x256xbf16>,
    %cst_39 = arith.constant 0.000000e+00 : f32
    %111 = vector.broadcast %cst_39 : f32 to vector<32x17xf32>
    %112 = vector.extract_strided_slice %14 {offsets = [0, 0], sizes = [32, 239], strides = [1, 1]} : vector<32x256xf32> to vector<32x239xf32>
    %113 = tpu.concatenate %111, %112 in 1 : vector<32x17xf32>, vector<32x239xf32> -> vector<32x256xf32>
    %114 = arith.andi %4, %8 : vector<1x256xi1>
    %cst_40 = arith.constant 0.000000e+00 : f32
    %115 = vector.shape_cast %114 : vector<1x256xi1> to vector<1x256xi1>
    %116 = vector.broadcast %115 : vector<1x256xi1> to vector<32x256xi1>
    %117 = vector.broadcast %cst_40 : f32 to vector<32x256xf32>
    %118 = arith.select %116, %113, %117 : vector<32x256xi1>, vector<32x256xf32>
    %119 = arith.truncf %118 : vector<32x256xf32> to vector<32x256xbf16>
    %c1_41 = arith.constant 1 : index
    %c0_42 = arith.constant 0 : index
    %c0_43 = arith.constant 0 : index
    %120 = vector.load %arg10[%c1_41, %c0_42, %c0_43] : memref<2x288x256xbf16, #tpu.memory_space<vmem>>, vector<1x32x256xbf16>
    %121 = vector.shape_cast %120 : vector<1x32x256xbf16> to vector<32x256xbf16>
    %122 = vector.shape_cast %119 : vector<32x256xbf16> to vector<1x32x256xbf16>
    tpu.vector_store %arg10[%c1_41, %c0_42, %c0_43], %122 {strides = array<i32>} : memref<2x288x256xbf16, #tpu.memory_space<vmem>>, vector<1x32x256xbf16>,
    %cst_44 = arith.constant 0.000000e+00 : f32
    %123 = vector.broadcast %cst_44 : f32 to vector<32x16xf32>
    %124 = vector.extract_strided_slice %14 {offsets = [0, 0], sizes = [32, 240], strides = [1, 1]} : vector<32x256xf32> to vector<32x240xf32>
    %125 = tpu.concatenate %123, %124 in 1 : vector<32x16xf32>, vector<32x240xf32> -> vector<32x256xf32>
    %cst_45 = arith.constant 0.000000e+00 : f32
    %126 = vector.shape_cast %4 : vector<1x256xi1> to vector<1x256xi1>
    %127 = vector.broadcast %126 : vector<1x256xi1> to vector<32x256xi1>
    %128 = vector.broadcast %cst_45 : f32 to vector<32x256xf32>
    %129 = arith.select %127, %125, %128 : vector<32x256xi1>, vector<32x256xf32>
    %130 = arith.truncf %129 : vector<32x256xf32> to vector<32x256xbf16>
    %c1_46 = arith.constant 1 : index
    %c32_47 = arith.constant 32 : index
    %c0_48 = arith.constant 0 : index
    %131 = vector.load %arg10[%c1_46, %c32_47, %c0_48] : memref<2x288x256xbf16, #tpu.memory_space<vmem>>, vector<1x32x256xbf16>
    %132 = vector.shape_cast %131 : vector<1x32x256xbf16> to vector<32x256xbf16>
    %133 = vector.shape_cast %130 : vector<32x256xbf16> to vector<1x32x256xbf16>
    tpu.vector_store %arg10[%c1_46, %c32_47, %c0_48], %133 {strides = array<i32>} : memref<2x288x256xbf16, #tpu.memory_space<vmem>>, vector<1x32x256xbf16>,
    %cst_49 = arith.constant 0.000000e+00 : f32
    %134 = vector.broadcast %cst_49 : f32 to vector<32x15xf32>
    %135 = vector.extract_strided_slice %14 {offsets = [0, 0], sizes = [32, 241], strides = [1, 1]} : vector<32x256xf32> to vector<32x241xf32>
    %136 = tpu.concatenate %134, %135 in 1 : vector<32x15xf32>, vector<32x241xf32> -> vector<32x256xf32>
    %137 = arith.andi %4, %10 : vector<1x256xi1>
    %cst_50 = arith.constant 0.000000e+00 : f32
    %138 = vector.shape_cast %137 : vector<1x256xi1> to vector<1x256xi1>
    %139 = vector.broadcast %138 : vector<1x256xi1> to vector<32x256xi1>
    %140 = vector.broadcast %cst_50 : f32 to vector<32x256xf32>
    %141 = arith.select %139, %136, %140 : vector<32x256xi1>, vector<32x256xf32>
    %142 = arith.truncf %141 : vector<32x256xf32> to vector<32x256xbf16>
    %c1_51 = arith.constant 1 : index
    %c64_52 = arith.constant 64 : index
    %c0_53 = arith.constant 0 : index
    %143 = vector.load %arg10[%c1_51, %c64_52, %c0_53] : memref<2x288x256xbf16, #tpu.memory_space<vmem>>, vector<1x32x256xbf16>
    %144 = vector.shape_cast %143 : vector<1x32x256xbf16> to vector<32x256xbf16>
    %145 = vector.shape_cast %142 : vector<32x256xbf16> to vector<1x32x256xbf16>
    tpu.vector_store %arg10[%c1_51, %c64_52, %c0_53], %145 {strides = array<i32>} : memref<2x288x256xbf16, #tpu.memory_space<vmem>>, vector<1x32x256xbf16>,
    %cst_54 = arith.constant 0.000000e+00 : f32
    %146 = vector.broadcast %cst_54 : f32 to vector<32x1xf32>
    %147 = vector.extract_strided_slice %14 {offsets = [0, 0], sizes = [32, 255], strides = [1, 1]} : vector<32x256xf32> to vector<32x255xf32>
    %148 = tpu.concatenate %146, %147 in 1 : vector<32x1xf32>, vector<32x255xf32> -> vector<32x256xf32>
    %cst_55 = arith.constant 0.000000e+00 : f32
    %149 = vector.shape_cast %8 : vector<1x256xi1> to vector<1x256xi1>
    %150 = vector.broadcast %149 : vector<1x256xi1> to vector<32x256xi1>
    %151 = vector.broadcast %cst_55 : f32 to vector<32x256xf32>
    %152 = arith.select %150, %148, %151 : vector<32x256xi1>, vector<32x256xf32>
    %153 = arith.truncf %152 : vector<32x256xf32> to vector<32x256xbf16>
    %c1_56 = arith.constant 1 : index
    %c96_57 = arith.constant 96 : index
    %c0_58 = arith.constant 0 : index
    %154 = vector.load %arg10[%c1_56, %c96_57, %c0_58] : memref<2x288x256xbf16, #tpu.memory_space<vmem>>, vector<1x32x256xbf16>
    %155 = vector.shape_cast %154 : vector<1x32x256xbf16> to vector<32x256xbf16>
    %156 = vector.shape_cast %153 : vector<32x256xbf16> to vector<1x32x256xbf16>
    tpu.vector_store %arg10[%c1_56, %c96_57, %c0_58], %156 {strides = array<i32>} : memref<2x288x256xbf16, #tpu.memory_space<vmem>>, vector<1x32x256xbf16>,
    %157 = arith.truncf %14 : vector<32x256xf32> to vector<32x256xbf16>
    %c1_59 = arith.constant 1 : index
    %c128_60 = arith.constant 128 : index
    %c0_61 = arith.constant 0 : index
    %158 = vector.load %arg10[%c1_59, %c128_60, %c0_61] : memref<2x288x256xbf16, #tpu.memory_space<vmem>>, vector<1x32x256xbf16>
    %159 = vector.shape_cast %158 : vector<1x32x256xbf16> to vector<32x256xbf16>
    %160 = vector.shape_cast %157 : vector<32x256xbf16> to vector<1x32x256xbf16>
    tpu.vector_store %arg10[%c1_59, %c128_60, %c0_61], %160 {strides = array<i32>} : memref<2x288x256xbf16, #tpu.memory_space<vmem>>, vector<1x32x256xbf16>,
    %cst_62 = arith.constant 0.000000e+00 : f32
    %161 = vector.broadcast %cst_62 : f32 to vector<32x1xf32>
    %162 = vector.extract_strided_slice %14 {offsets = [0, 1], sizes = [32, 255], strides = [1, 1]} : vector<32x256xf32> to vector<32x255xf32>
    %163 = tpu.concatenate %162, %161 in 1 : vector<32x255xf32>, vector<32x1xf32> -> vector<32x256xf32>
    %cst_63 = arith.constant 0.000000e+00 : f32
    %164 = vector.shape_cast %10 : vector<1x256xi1> to vector<1x256xi1>
    %165 = vector.broadcast %164 : vector<1x256xi1> to vector<32x256xi1>
    %166 = vector.broadcast %cst_63 : f32 to vector<32x256xf32>
    %167 = arith.select %165, %163, %166 : vector<32x256xi1>, vector<32x256xf32>
    %168 = arith.truncf %167 : vector<32x256xf32> to vector<32x256xbf16>
    %c1_64 = arith.constant 1 : index
    %c160_65 = arith.constant 160 : index
    %c0_66 = arith.constant 0 : index
    %169 = vector.load %arg10[%c1_64, %c160_65, %c0_66] : memref<2x288x256xbf16, #tpu.memory_space<vmem>>, vector<1x32x256xbf16>
    %170 = vector.shape_cast %169 : vector<1x32x256xbf16> to vector<32x256xbf16>
    %171 = vector.shape_cast %168 : vector<32x256xbf16> to vector<1x32x256xbf16>
    tpu.vector_store %arg10[%c1_64, %c160_65, %c0_66], %171 {strides = array<i32>} : memref<2x288x256xbf16, #tpu.memory_space<vmem>>, vector<1x32x256xbf16>,
    %cst_67 = arith.constant 0.000000e+00 : f32
    %172 = vector.broadcast %cst_67 : f32 to vector<32x15xf32>
    %173 = vector.extract_strided_slice %14 {offsets = [0, 15], sizes = [32, 241], strides = [1, 1]} : vector<32x256xf32> to vector<32x241xf32>
    %174 = tpu.concatenate %173, %172 in 1 : vector<32x241xf32>, vector<32x15xf32> -> vector<32x256xf32>
    %175 = arith.andi %6, %8 : vector<1x256xi1>
    %cst_68 = arith.constant 0.000000e+00 : f32
    %176 = vector.shape_cast %175 : vector<1x256xi1> to vector<1x256xi1>
    %177 = vector.broadcast %176 : vector<1x256xi1> to vector<32x256xi1>
    %178 = vector.broadcast %cst_68 : f32 to vector<32x256xf32>
    %179 = arith.select %177, %174, %178 : vector<32x256xi1>, vector<32x256xf32>
    %180 = arith.truncf %179 : vector<32x256xf32> to vector<32x256xbf16>
    %c1_69 = arith.constant 1 : index
    %c192_70 = arith.constant 192 : index
    %c0_71 = arith.constant 0 : index
    %181 = vector.load %arg10[%c1_69, %c192_70, %c0_71] : memref<2x288x256xbf16, #tpu.memory_space<vmem>>, vector<1x32x256xbf16>
    %182 = vector.shape_cast %181 : vector<1x32x256xbf16> to vector<32x256xbf16>
    %183 = vector.shape_cast %180 : vector<32x256xbf16> to vector<1x32x256xbf16>
    tpu.vector_store %arg10[%c1_69, %c192_70, %c0_71], %183 {strides = array<i32>} : memref<2x288x256xbf16, #tpu.memory_space<vmem>>, vector<1x32x256xbf16>,
    %cst_72 = arith.constant 0.000000e+00 : f32
    %184 = vector.broadcast %cst_72 : f32 to vector<32x16xf32>
    %185 = vector.extract_strided_slice %14 {offsets = [0, 16], sizes = [32, 240], strides = [1, 1]} : vector<32x256xf32> to vector<32x240xf32>
    %186 = tpu.concatenate %185, %184 in 1 : vector<32x240xf32>, vector<32x16xf32> -> vector<32x256xf32>
    %cst_73 = arith.constant 0.000000e+00 : f32
    %187 = vector.shape_cast %6 : vector<1x256xi1> to vector<1x256xi1>
    %188 = vector.broadcast %187 : vector<1x256xi1> to vector<32x256xi1>
    %189 = vector.broadcast %cst_73 : f32 to vector<32x256xf32>
    %190 = arith.select %188, %186, %189 : vector<32x256xi1>, vector<32x256xf32>
    %191 = arith.truncf %190 : vector<32x256xf32> to vector<32x256xbf16>
    %c1_74 = arith.constant 1 : index
    %c224_75 = arith.constant 224 : index
    %c0_76 = arith.constant 0 : index
    %192 = vector.load %arg10[%c1_74, %c224_75, %c0_76] : memref<2x288x256xbf16, #tpu.memory_space<vmem>>, vector<1x32x256xbf16>
    %193 = vector.shape_cast %192 : vector<1x32x256xbf16> to vector<32x256xbf16>
    %194 = vector.shape_cast %191 : vector<32x256xbf16> to vector<1x32x256xbf16>
    tpu.vector_store %arg10[%c1_74, %c224_75, %c0_76], %194 {strides = array<i32>} : memref<2x288x256xbf16, #tpu.memory_space<vmem>>, vector<1x32x256xbf16>,
    %cst_77 = arith.constant 0.000000e+00 : f32
    %195 = vector.broadcast %cst_77 : f32 to vector<32x17xf32>
    %196 = vector.extract_strided_slice %14 {offsets = [0, 17], sizes = [32, 239], strides = [1, 1]} : vector<32x256xf32> to vector<32x239xf32>
    %197 = tpu.concatenate %196, %195 in 1 : vector<32x239xf32>, vector<32x17xf32> -> vector<32x256xf32>
    %198 = arith.andi %6, %10 : vector<1x256xi1>
    %cst_78 = arith.constant 0.000000e+00 : f32
    %199 = vector.shape_cast %198 : vector<1x256xi1> to vector<1x256xi1>
    %200 = vector.broadcast %199 : vector<1x256xi1> to vector<32x256xi1>
    %201 = vector.broadcast %cst_78 : f32 to vector<32x256xf32>
    %202 = arith.select %200, %197, %201 : vector<32x256xi1>, vector<32x256xf32>
    %203 = arith.truncf %202 : vector<32x256xf32> to vector<32x256xbf16>
    %c1_79 = arith.constant 1 : index
    %c256_80 = arith.constant 256 : index
    %c0_81 = arith.constant 0 : index
    %204 = vector.load %arg10[%c1_79, %c256_80, %c0_81] : memref<2x288x256xbf16, #tpu.memory_space<vmem>>, vector<1x32x256xbf16>
    %205 = vector.shape_cast %204 : vector<1x32x256xbf16> to vector<32x256xbf16>
    %206 = vector.shape_cast %203 : vector<32x256xbf16> to vector<1x32x256xbf16>
    tpu.vector_store %arg10[%c1_79, %c256_80, %c0_81], %206 {strides = array<i32>} : memref<2x288x256xbf16, #tpu.memory_space<vmem>>, vector<1x32x256xbf16>,
    %c0_82 = arith.constant 0 : index
    %c0_83 = arith.constant 0 : index
    %207 = vector.load %arg1[%c0_82, %c0_83] : memref<32x288xbf16, #tpu.memory_space<vmem>>, vector<32x288xbf16>
    %c0_84 = arith.constant 0 : index
    %c0_85 = arith.constant 0 : index
    %c0_86 = arith.constant 0 : index
    %208 = vector.load %arg10[%c0_84, %c0_85, %c0_86] : memref<2x288x256xbf16, #tpu.memory_space<vmem>>, vector<1x288x256xbf16>
    %209 = vector.shape_cast %208 : vector<1x288x256xbf16> to vector<288x256xbf16>
    %cst_87 = arith.constant dense<0.000000e+00> : vector<32x256xf32>
    %210 = tpu.matmul %207, %209, %cst_87 {dimension_numbers = #tpu.dot_dimension_numbers<[1], [0], [0], [1], [0, 0, 1, 1], [], []>} : vector<32x288xbf16>, vector<288x256xbf16>, vector<32x256xf32> -> vector<32x256xf32>
    %c0_88 = arith.constant 0 : index
    %c0_89 = arith.constant 0 : index
    %211 = vector.load %arg2[%c0_88, %c0_89] : memref<32x1xf32, #tpu.memory_space<vmem>>, vector<32x1xf32>
    %212 = vector.broadcast %211 : vector<32x1xf32> to vector<32x256xf32>
    %213 = arith.addf %210, %212 : vector<32x256xf32>
    %c0_90 = arith.constant 0 : index
    %c0_91 = arith.constant 0 : index
    %214 = vector.load %arg1[%c0_90, %c0_91] : memref<32x288xbf16, #tpu.memory_space<vmem>>, vector<32x288xbf16>
    %c1_92 = arith.constant 1 : index
    %c0_93 = arith.constant 0 : index
    %c0_94 = arith.constant 0 : index
    %215 = vector.load %arg10[%c1_92, %c0_93, %c0_94] : memref<2x288x256xbf16, #tpu.memory_space<vmem>>, vector<1x288x256xbf16>
    %216 = vector.shape_cast %215 : vector<1x288x256xbf16> to vector<288x256xbf16>
    %cst_95 = arith.constant dense<0.000000e+00> : vector<32x256xf32>
    %217 = tpu.matmul %214, %216, %cst_95 {dimension_numbers = #tpu.dot_dimension_numbers<[1], [0], [0], [1], [0, 0, 1, 1], [], []>} : vector<32x288xbf16>, vector<288x256xbf16>, vector<32x256xf32> -> vector<32x256xf32>
    %c0_96 = arith.constant 0 : index
    %c0_97 = arith.constant 0 : index
    %218 = vector.load %arg2[%c0_96, %c0_97] : memref<32x1xf32, #tpu.memory_space<vmem>>, vector<32x1xf32>
    %219 = vector.broadcast %218 : vector<32x1xf32> to vector<32x256xf32>
    %220 = arith.addf %217, %219 : vector<32x256xf32>
    %cst_98 = arith.constant dense<0.000000e+00> : vector<32xf32>
    %221 = vector.multi_reduction <add>, %213, %cst_98 [1] : vector<32x256xf32> to vector<32xf32>
    %222 = vector.shape_cast %221 : vector<32xf32> to vector<32x1xf32>
    %cst_99 = arith.constant 0.000000e+00 : f32
    %223 = vector.broadcast %cst_99 : f32 to vector<32x1xf32>
    %224 = arith.addf %223, %222 : vector<32x1xf32>
    %cst_100 = arith.constant dense<0.000000e+00> : vector<32xf32>
    %225 = vector.multi_reduction <add>, %220, %cst_100 [1] : vector<32x256xf32> to vector<32xf32>
    %226 = vector.shape_cast %225 : vector<32xf32> to vector<32x1xf32>
    %227 = arith.addf %224, %226 : vector<32x1xf32>
    %cst_101 = arith.constant 0.001953125 : f32
    %228 = vector.broadcast %cst_101 : f32 to vector<32x1xf32>
    %229 = arith.mulf %227, %228 : vector<32x1xf32>
    %230 = vector.broadcast %229 : vector<32x1xf32> to vector<32x256xf32>
    %231 = arith.subf %213, %230 : vector<32x256xf32>
    %232 = vector.broadcast %229 : vector<32x1xf32> to vector<32x256xf32>
    %233 = arith.subf %220, %232 : vector<32x256xf32>
    %234 = arith.mulf %231, %231 : vector<32x256xf32>
    %cst_102 = arith.constant dense<0.000000e+00> : vector<32xf32>
    %235 = vector.multi_reduction <add>, %234, %cst_102 [1] : vector<32x256xf32> to vector<32xf32>
    %236 = vector.shape_cast %235 : vector<32xf32> to vector<32x1xf32>
    %cst_103 = arith.constant 0.000000e+00 : f32
    %237 = vector.broadcast %cst_103 : f32 to vector<32x1xf32>
    %238 = arith.addf %237, %236 : vector<32x1xf32>
    %239 = arith.mulf %233, %233 : vector<32x256xf32>
    %cst_104 = arith.constant dense<0.000000e+00> : vector<32xf32>
    %240 = vector.multi_reduction <add>, %239, %cst_104 [1] : vector<32x256xf32> to vector<32xf32>
    %241 = vector.shape_cast %240 : vector<32xf32> to vector<32x1xf32>
    %242 = arith.addf %238, %241 : vector<32x1xf32>
    %cst_105 = arith.constant 0.001953125 : f32
    %243 = vector.broadcast %cst_105 : f32 to vector<32x1xf32>
    %244 = arith.mulf %242, %243 : vector<32x1xf32>
    %c0_106 = arith.constant 0 : index
    %c0_107 = arith.constant 0 : index
    %245 = vector.load %arg3[%c0_106, %c0_107] : memref<32x1xf32, #tpu.memory_space<vmem>>, vector<32x1xf32>
    %cst_108 = arith.constant 9.99999974E-6 : f32
    %246 = vector.broadcast %cst_108 : f32 to vector<32x1xf32>
    %247 = arith.addf %244, %246 : vector<32x1xf32>
    %248 = math.rsqrt %247 : vector<32x1xf32>
    %249 = arith.mulf %245, %248 : vector<32x1xf32>
    %250 = vector.broadcast %249 : vector<32x1xf32> to vector<32x256xf32>
    %251 = arith.mulf %231, %250 : vector<32x256xf32>
    %c0_109 = arith.constant 0 : index
    %c0_110 = arith.constant 0 : index
    %252 = vector.load %arg4[%c0_109, %c0_110] : memref<32x1xf32, #tpu.memory_space<vmem>>, vector<32x1xf32>
    %253 = vector.broadcast %252 : vector<32x1xf32> to vector<32x256xf32>
    %254 = arith.addf %251, %253 : vector<32x256xf32>
    %cst_111 = arith.constant 0.000000e+00 : f32
    %255 = vector.broadcast %cst_111 : f32 to vector<32x256xf32>
    %256 = arith.maximumf %254, %255 : vector<32x256xf32>
    %257 = vector.broadcast %249 : vector<32x1xf32> to vector<32x256xf32>
    %258 = arith.mulf %233, %257 : vector<32x256xf32>
    %c0_112 = arith.constant 0 : index
    %c0_113 = arith.constant 0 : index
    %259 = vector.load %arg4[%c0_112, %c0_113] : memref<32x1xf32, #tpu.memory_space<vmem>>, vector<32x1xf32>
    %260 = vector.broadcast %259 : vector<32x1xf32> to vector<32x256xf32>
    %261 = arith.addf %258, %260 : vector<32x256xf32>
    %cst_114 = arith.constant 0.000000e+00 : f32
    %262 = vector.broadcast %cst_114 : f32 to vector<32x256xf32>
    %263 = arith.maximumf %261, %262 : vector<32x256xf32>
    %cst_115 = arith.constant 0.000000e+00 : f32
    %264 = vector.broadcast %cst_115 : f32 to vector<32x17xf32>
    %265 = vector.extract_strided_slice %256 {offsets = [0, 0], sizes = [32, 239], strides = [1, 1]} : vector<32x256xf32> to vector<32x239xf32>
    %266 = tpu.concatenate %264, %265 in 1 : vector<32x17xf32>, vector<32x239xf32> -> vector<32x256xf32>
    %267 = arith.andi %4, %8 : vector<1x256xi1>
    %cst_116 = arith.constant 0.000000e+00 : f32
    %268 = vector.shape_cast %267 : vector<1x256xi1> to vector<1x256xi1>
    %269 = vector.broadcast %268 : vector<1x256xi1> to vector<32x256xi1>
    %270 = vector.broadcast %cst_116 : f32 to vector<32x256xf32>
    %271 = arith.select %269, %266, %270 : vector<32x256xi1>, vector<32x256xf32>
    %272 = arith.truncf %271 : vector<32x256xf32> to vector<32x256xbf16>
    %c0_117 = arith.constant 0 : index
    %c0_118 = arith.constant 0 : index
    %c0_119 = arith.constant 0 : index
    %273 = vector.load %arg10[%c0_117, %c0_118, %c0_119] : memref<2x288x256xbf16, #tpu.memory_space<vmem>>, vector<1x32x256xbf16>
    %274 = vector.shape_cast %273 : vector<1x32x256xbf16> to vector<32x256xbf16>
    %275 = vector.shape_cast %272 : vector<32x256xbf16> to vector<1x32x256xbf16>
    tpu.vector_store %arg10[%c0_117, %c0_118, %c0_119], %275 {strides = array<i32>} : memref<2x288x256xbf16, #tpu.memory_space<vmem>>, vector<1x32x256xbf16>,
    %cst_120 = arith.constant 0.000000e+00 : f32
    %276 = vector.broadcast %cst_120 : f32 to vector<32x16xf32>
    %277 = vector.extract_strided_slice %256 {offsets = [0, 0], sizes = [32, 240], strides = [1, 1]} : vector<32x256xf32> to vector<32x240xf32>
    %278 = tpu.concatenate %276, %277 in 1 : vector<32x16xf32>, vector<32x240xf32> -> vector<32x256xf32>
    %cst_121 = arith.constant 0.000000e+00 : f32
    %279 = vector.shape_cast %4 : vector<1x256xi1> to vector<1x256xi1>
    %280 = vector.broadcast %279 : vector<1x256xi1> to vector<32x256xi1>
    %281 = vector.broadcast %cst_121 : f32 to vector<32x256xf32>
    %282 = arith.select %280, %278, %281 : vector<32x256xi1>, vector<32x256xf32>
    %283 = arith.truncf %282 : vector<32x256xf32> to vector<32x256xbf16>
    %c0_122 = arith.constant 0 : index
    %c32_123 = arith.constant 32 : index
    %c0_124 = arith.constant 0 : index
    %284 = vector.load %arg10[%c0_122, %c32_123, %c0_124] : memref<2x288x256xbf16, #tpu.memory_space<vmem>>, vector<1x32x256xbf16>
    %285 = vector.shape_cast %284 : vector<1x32x256xbf16> to vector<32x256xbf16>
    %286 = vector.shape_cast %283 : vector<32x256xbf16> to vector<1x32x256xbf16>
    tpu.vector_store %arg10[%c0_122, %c32_123, %c0_124], %286 {strides = array<i32>} : memref<2x288x256xbf16, #tpu.memory_space<vmem>>, vector<1x32x256xbf16>,
    %cst_125 = arith.constant 0.000000e+00 : f32
    %287 = vector.broadcast %cst_125 : f32 to vector<32x15xf32>
    %288 = vector.extract_strided_slice %256 {offsets = [0, 0], sizes = [32, 241], strides = [1, 1]} : vector<32x256xf32> to vector<32x241xf32>
    %289 = tpu.concatenate %287, %288 in 1 : vector<32x15xf32>, vector<32x241xf32> -> vector<32x256xf32>
    %290 = arith.andi %4, %10 : vector<1x256xi1>
    %cst_126 = arith.constant 0.000000e+00 : f32
    %291 = vector.shape_cast %290 : vector<1x256xi1> to vector<1x256xi1>
    %292 = vector.broadcast %291 : vector<1x256xi1> to vector<32x256xi1>
    %293 = vector.broadcast %cst_126 : f32 to vector<32x256xf32>
    %294 = arith.select %292, %289, %293 : vector<32x256xi1>, vector<32x256xf32>
    %295 = arith.truncf %294 : vector<32x256xf32> to vector<32x256xbf16>
    %c0_127 = arith.constant 0 : index
    %c64_128 = arith.constant 64 : index
    %c0_129 = arith.constant 0 : index
    %296 = vector.load %arg10[%c0_127, %c64_128, %c0_129] : memref<2x288x256xbf16, #tpu.memory_space<vmem>>, vector<1x32x256xbf16>
    %297 = vector.shape_cast %296 : vector<1x32x256xbf16> to vector<32x256xbf16>
    %298 = vector.shape_cast %295 : vector<32x256xbf16> to vector<1x32x256xbf16>
    tpu.vector_store %arg10[%c0_127, %c64_128, %c0_129], %298 {strides = array<i32>} : memref<2x288x256xbf16, #tpu.memory_space<vmem>>, vector<1x32x256xbf16>,
    %cst_130 = arith.constant 0.000000e+00 : f32
    %299 = vector.broadcast %cst_130 : f32 to vector<32x1xf32>
    %300 = vector.extract_strided_slice %256 {offsets = [0, 0], sizes = [32, 255], strides = [1, 1]} : vector<32x256xf32> to vector<32x255xf32>
    %301 = tpu.concatenate %299, %300 in 1 : vector<32x1xf32>, vector<32x255xf32> -> vector<32x256xf32>
    %cst_131 = arith.constant 0.000000e+00 : f32
    %302 = vector.shape_cast %8 : vector<1x256xi1> to vector<1x256xi1>
    %303 = vector.broadcast %302 : vector<1x256xi1> to vector<32x256xi1>
    %304 = vector.broadcast %cst_131 : f32 to vector<32x256xf32>
    %305 = arith.select %303, %301, %304 : vector<32x256xi1>, vector<32x256xf32>
    %306 = arith.truncf %305 : vector<32x256xf32> to vector<32x256xbf16>
    %c0_132 = arith.constant 0 : index
    %c96_133 = arith.constant 96 : index
    %c0_134 = arith.constant 0 : index
    %307 = vector.load %arg10[%c0_132, %c96_133, %c0_134] : memref<2x288x256xbf16, #tpu.memory_space<vmem>>, vector<1x32x256xbf16>
    %308 = vector.shape_cast %307 : vector<1x32x256xbf16> to vector<32x256xbf16>
    %309 = vector.shape_cast %306 : vector<32x256xbf16> to vector<1x32x256xbf16>
    tpu.vector_store %arg10[%c0_132, %c96_133, %c0_134], %309 {strides = array<i32>} : memref<2x288x256xbf16, #tpu.memory_space<vmem>>, vector<1x32x256xbf16>,
    %310 = arith.truncf %256 : vector<32x256xf32> to vector<32x256xbf16>
    %c0_135 = arith.constant 0 : index
    %c128_136 = arith.constant 128 : index
    %c0_137 = arith.constant 0 : index
    %311 = vector.load %arg10[%c0_135, %c128_136, %c0_137] : memref<2x288x256xbf16, #tpu.memory_space<vmem>>, vector<1x32x256xbf16>
    %312 = vector.shape_cast %311 : vector<1x32x256xbf16> to vector<32x256xbf16>
    %313 = vector.shape_cast %310 : vector<32x256xbf16> to vector<1x32x256xbf16>
    tpu.vector_store %arg10[%c0_135, %c128_136, %c0_137], %313 {strides = array<i32>} : memref<2x288x256xbf16, #tpu.memory_space<vmem>>, vector<1x32x256xbf16>,
    %cst_138 = arith.constant 0.000000e+00 : f32
    %314 = vector.broadcast %cst_138 : f32 to vector<32x1xf32>
    %315 = vector.extract_strided_slice %256 {offsets = [0, 1], sizes = [32, 255], strides = [1, 1]} : vector<32x256xf32> to vector<32x255xf32>
    %316 = tpu.concatenate %315, %314 in 1 : vector<32x255xf32>, vector<32x1xf32> -> vector<32x256xf32>
    %cst_139 = arith.constant 0.000000e+00 : f32
    %317 = vector.shape_cast %10 : vector<1x256xi1> to vector<1x256xi1>
    %318 = vector.broadcast %317 : vector<1x256xi1> to vector<32x256xi1>
    %319 = vector.broadcast %cst_139 : f32 to vector<32x256xf32>
    %320 = arith.select %318, %316, %319 : vector<32x256xi1>, vector<32x256xf32>
    %321 = arith.truncf %320 : vector<32x256xf32> to vector<32x256xbf16>
    %c0_140 = arith.constant 0 : index
    %c160_141 = arith.constant 160 : index
    %c0_142 = arith.constant 0 : index
    %322 = vector.load %arg10[%c0_140, %c160_141, %c0_142] : memref<2x288x256xbf16, #tpu.memory_space<vmem>>, vector<1x32x256xbf16>
    %323 = vector.shape_cast %322 : vector<1x32x256xbf16> to vector<32x256xbf16>
    %324 = vector.shape_cast %321 : vector<32x256xbf16> to vector<1x32x256xbf16>
    tpu.vector_store %arg10[%c0_140, %c160_141, %c0_142], %324 {strides = array<i32>} : memref<2x288x256xbf16, #tpu.memory_space<vmem>>, vector<1x32x256xbf16>,
    %cst_143 = arith.constant 0.000000e+00 : f32
    %325 = vector.broadcast %cst_143 : f32 to vector<32x15xf32>
    %326 = vector.extract_strided_slice %256 {offsets = [0, 15], sizes = [32, 241], strides = [1, 1]} : vector<32x256xf32> to vector<32x241xf32>
    %327 = tpu.concatenate %326, %325 in 1 : vector<32x241xf32>, vector<32x15xf32> -> vector<32x256xf32>
    %328 = arith.andi %6, %8 : vector<1x256xi1>
    %cst_144 = arith.constant 0.000000e+00 : f32
    %329 = vector.shape_cast %328 : vector<1x256xi1> to vector<1x256xi1>
    %330 = vector.broadcast %329 : vector<1x256xi1> to vector<32x256xi1>
    %331 = vector.broadcast %cst_144 : f32 to vector<32x256xf32>
    %332 = arith.select %330, %327, %331 : vector<32x256xi1>, vector<32x256xf32>
    %333 = arith.truncf %332 : vector<32x256xf32> to vector<32x256xbf16>
    %c0_145 = arith.constant 0 : index
    %c192_146 = arith.constant 192 : index
    %c0_147 = arith.constant 0 : index
    %334 = vector.load %arg10[%c0_145, %c192_146, %c0_147] : memref<2x288x256xbf16, #tpu.memory_space<vmem>>, vector<1x32x256xbf16>
    %335 = vector.shape_cast %334 : vector<1x32x256xbf16> to vector<32x256xbf16>
    %336 = vector.shape_cast %333 : vector<32x256xbf16> to vector<1x32x256xbf16>
    tpu.vector_store %arg10[%c0_145, %c192_146, %c0_147], %336 {strides = array<i32>} : memref<2x288x256xbf16, #tpu.memory_space<vmem>>, vector<1x32x256xbf16>,
    %cst_148 = arith.constant 0.000000e+00 : f32
    %337 = vector.broadcast %cst_148 : f32 to vector<32x16xf32>
    %338 = vector.extract_strided_slice %256 {offsets = [0, 16], sizes = [32, 240], strides = [1, 1]} : vector<32x256xf32> to vector<32x240xf32>
    %339 = tpu.concatenate %338, %337 in 1 : vector<32x240xf32>, vector<32x16xf32> -> vector<32x256xf32>
    %cst_149 = arith.constant 0.000000e+00 : f32
    %340 = vector.shape_cast %6 : vector<1x256xi1> to vector<1x256xi1>
    %341 = vector.broadcast %340 : vector<1x256xi1> to vector<32x256xi1>
    %342 = vector.broadcast %cst_149 : f32 to vector<32x256xf32>
    %343 = arith.select %341, %339, %342 : vector<32x256xi1>, vector<32x256xf32>
    %344 = arith.truncf %343 : vector<32x256xf32> to vector<32x256xbf16>
    %c0_150 = arith.constant 0 : index
    %c224_151 = arith.constant 224 : index
    %c0_152 = arith.constant 0 : index
    %345 = vector.load %arg10[%c0_150, %c224_151, %c0_152] : memref<2x288x256xbf16, #tpu.memory_space<vmem>>, vector<1x32x256xbf16>
    %346 = vector.shape_cast %345 : vector<1x32x256xbf16> to vector<32x256xbf16>
    %347 = vector.shape_cast %344 : vector<32x256xbf16> to vector<1x32x256xbf16>
    tpu.vector_store %arg10[%c0_150, %c224_151, %c0_152], %347 {strides = array<i32>} : memref<2x288x256xbf16, #tpu.memory_space<vmem>>, vector<1x32x256xbf16>,
    %cst_153 = arith.constant 0.000000e+00 : f32
    %348 = vector.broadcast %cst_153 : f32 to vector<32x17xf32>
    %349 = vector.extract_strided_slice %256 {offsets = [0, 17], sizes = [32, 239], strides = [1, 1]} : vector<32x256xf32> to vector<32x239xf32>
    %350 = tpu.concatenate %349, %348 in 1 : vector<32x239xf32>, vector<32x17xf32> -> vector<32x256xf32>
    %351 = arith.andi %6, %10 : vector<1x256xi1>
    %cst_154 = arith.constant 0.000000e+00 : f32
    %352 = vector.shape_cast %351 : vector<1x256xi1> to vector<1x256xi1>
    %353 = vector.broadcast %352 : vector<1x256xi1> to vector<32x256xi1>
    %354 = vector.broadcast %cst_154 : f32 to vector<32x256xf32>
    %355 = arith.select %353, %350, %354 : vector<32x256xi1>, vector<32x256xf32>
    %356 = arith.truncf %355 : vector<32x256xf32> to vector<32x256xbf16>
    %c0_155 = arith.constant 0 : index
    %c256_156 = arith.constant 256 : index
    %c0_157 = arith.constant 0 : index
    %357 = vector.load %arg10[%c0_155, %c256_156, %c0_157] : memref<2x288x256xbf16, #tpu.memory_space<vmem>>, vector<1x32x256xbf16>
    %358 = vector.shape_cast %357 : vector<1x32x256xbf16> to vector<32x256xbf16>
    %359 = vector.shape_cast %356 : vector<32x256xbf16> to vector<1x32x256xbf16>
    tpu.vector_store %arg10[%c0_155, %c256_156, %c0_157], %359 {strides = array<i32>} : memref<2x288x256xbf16, #tpu.memory_space<vmem>>, vector<1x32x256xbf16>,
    %cst_158 = arith.constant 0.000000e+00 : f32
    %360 = vector.broadcast %cst_158 : f32 to vector<32x17xf32>
    %361 = vector.extract_strided_slice %263 {offsets = [0, 0], sizes = [32, 239], strides = [1, 1]} : vector<32x256xf32> to vector<32x239xf32>
    %362 = tpu.concatenate %360, %361 in 1 : vector<32x17xf32>, vector<32x239xf32> -> vector<32x256xf32>
    %363 = arith.andi %4, %8 : vector<1x256xi1>
    %cst_159 = arith.constant 0.000000e+00 : f32
    %364 = vector.shape_cast %363 : vector<1x256xi1> to vector<1x256xi1>
    %365 = vector.broadcast %364 : vector<1x256xi1> to vector<32x256xi1>
    %366 = vector.broadcast %cst_159 : f32 to vector<32x256xf32>
    %367 = arith.select %365, %362, %366 : vector<32x256xi1>, vector<32x256xf32>
    %368 = arith.truncf %367 : vector<32x256xf32> to vector<32x256xbf16>
    %c1_160 = arith.constant 1 : index
    %c0_161 = arith.constant 0 : index
    %c0_162 = arith.constant 0 : index
    %369 = vector.load %arg10[%c1_160, %c0_161, %c0_162] : memref<2x288x256xbf16, #tpu.memory_space<vmem>>, vector<1x32x256xbf16>
    %370 = vector.shape_cast %369 : vector<1x32x256xbf16> to vector<32x256xbf16>
    %371 = vector.shape_cast %368 : vector<32x256xbf16> to vector<1x32x256xbf16>
    tpu.vector_store %arg10[%c1_160, %c0_161, %c0_162], %371 {strides = array<i32>} : memref<2x288x256xbf16, #tpu.memory_space<vmem>>, vector<1x32x256xbf16>,
    %cst_163 = arith.constant 0.000000e+00 : f32
    %372 = vector.broadcast %cst_163 : f32 to vector<32x16xf32>
    %373 = vector.extract_strided_slice %263 {offsets = [0, 0], sizes = [32, 240], strides = [1, 1]} : vector<32x256xf32> to vector<32x240xf32>
    %374 = tpu.concatenate %372, %373 in 1 : vector<32x16xf32>, vector<32x240xf32> -> vector<32x256xf32>
    %cst_164 = arith.constant 0.000000e+00 : f32
    %375 = vector.shape_cast %4 : vector<1x256xi1> to vector<1x256xi1>
    %376 = vector.broadcast %375 : vector<1x256xi1> to vector<32x256xi1>
    %377 = vector.broadcast %cst_164 : f32 to vector<32x256xf32>
    %378 = arith.select %376, %374, %377 : vector<32x256xi1>, vector<32x256xf32>
    %379 = arith.truncf %378 : vector<32x256xf32> to vector<32x256xbf16>
    %c1_165 = arith.constant 1 : index
    %c32_166 = arith.constant 32 : index
    %c0_167 = arith.constant 0 : index
    %380 = vector.load %arg10[%c1_165, %c32_166, %c0_167] : memref<2x288x256xbf16, #tpu.memory_space<vmem>>, vector<1x32x256xbf16>
    %381 = vector.shape_cast %380 : vector<1x32x256xbf16> to vector<32x256xbf16>
    %382 = vector.shape_cast %379 : vector<32x256xbf16> to vector<1x32x256xbf16>
    tpu.vector_store %arg10[%c1_165, %c32_166, %c0_167], %382 {strides = array<i32>} : memref<2x288x256xbf16, #tpu.memory_space<vmem>>, vector<1x32x256xbf16>,
    %cst_168 = arith.constant 0.000000e+00 : f32
    %383 = vector.broadcast %cst_168 : f32 to vector<32x15xf32>
    %384 = vector.extract_strided_slice %263 {offsets = [0, 0], sizes = [32, 241], strides = [1, 1]} : vector<32x256xf32> to vector<32x241xf32>
    %385 = tpu.concatenate %383, %384 in 1 : vector<32x15xf32>, vector<32x241xf32> -> vector<32x256xf32>
    %386 = arith.andi %4, %10 : vector<1x256xi1>
    %cst_169 = arith.constant 0.000000e+00 : f32
    %387 = vector.shape_cast %386 : vector<1x256xi1> to vector<1x256xi1>
    %388 = vector.broadcast %387 : vector<1x256xi1> to vector<32x256xi1>
    %389 = vector.broadcast %cst_169 : f32 to vector<32x256xf32>
    %390 = arith.select %388, %385, %389 : vector<32x256xi1>, vector<32x256xf32>
    %391 = arith.truncf %390 : vector<32x256xf32> to vector<32x256xbf16>
    %c1_170 = arith.constant 1 : index
    %c64_171 = arith.constant 64 : index
    %c0_172 = arith.constant 0 : index
    %392 = vector.load %arg10[%c1_170, %c64_171, %c0_172] : memref<2x288x256xbf16, #tpu.memory_space<vmem>>, vector<1x32x256xbf16>
    %393 = vector.shape_cast %392 : vector<1x32x256xbf16> to vector<32x256xbf16>
    %394 = vector.shape_cast %391 : vector<32x256xbf16> to vector<1x32x256xbf16>
    tpu.vector_store %arg10[%c1_170, %c64_171, %c0_172], %394 {strides = array<i32>} : memref<2x288x256xbf16, #tpu.memory_space<vmem>>, vector<1x32x256xbf16>,
    %cst_173 = arith.constant 0.000000e+00 : f32
    %395 = vector.broadcast %cst_173 : f32 to vector<32x1xf32>
    %396 = vector.extract_strided_slice %263 {offsets = [0, 0], sizes = [32, 255], strides = [1, 1]} : vector<32x256xf32> to vector<32x255xf32>
    %397 = tpu.concatenate %395, %396 in 1 : vector<32x1xf32>, vector<32x255xf32> -> vector<32x256xf32>
    %cst_174 = arith.constant 0.000000e+00 : f32
    %398 = vector.shape_cast %8 : vector<1x256xi1> to vector<1x256xi1>
    %399 = vector.broadcast %398 : vector<1x256xi1> to vector<32x256xi1>
    %400 = vector.broadcast %cst_174 : f32 to vector<32x256xf32>
    %401 = arith.select %399, %397, %400 : vector<32x256xi1>, vector<32x256xf32>
    %402 = arith.truncf %401 : vector<32x256xf32> to vector<32x256xbf16>
    %c1_175 = arith.constant 1 : index
    %c96_176 = arith.constant 96 : index
    %c0_177 = arith.constant 0 : index
    %403 = vector.load %arg10[%c1_175, %c96_176, %c0_177] : memref<2x288x256xbf16, #tpu.memory_space<vmem>>, vector<1x32x256xbf16>
    %404 = vector.shape_cast %403 : vector<1x32x256xbf16> to vector<32x256xbf16>
    %405 = vector.shape_cast %402 : vector<32x256xbf16> to vector<1x32x256xbf16>
    tpu.vector_store %arg10[%c1_175, %c96_176, %c0_177], %405 {strides = array<i32>} : memref<2x288x256xbf16, #tpu.memory_space<vmem>>, vector<1x32x256xbf16>,
    %406 = arith.truncf %263 : vector<32x256xf32> to vector<32x256xbf16>
    %c1_178 = arith.constant 1 : index
    %c128_179 = arith.constant 128 : index
    %c0_180 = arith.constant 0 : index
    %407 = vector.load %arg10[%c1_178, %c128_179, %c0_180] : memref<2x288x256xbf16, #tpu.memory_space<vmem>>, vector<1x32x256xbf16>
    %408 = vector.shape_cast %407 : vector<1x32x256xbf16> to vector<32x256xbf16>
    %409 = vector.shape_cast %406 : vector<32x256xbf16> to vector<1x32x256xbf16>
    tpu.vector_store %arg10[%c1_178, %c128_179, %c0_180], %409 {strides = array<i32>} : memref<2x288x256xbf16, #tpu.memory_space<vmem>>, vector<1x32x256xbf16>,
    %cst_181 = arith.constant 0.000000e+00 : f32
    %410 = vector.broadcast %cst_181 : f32 to vector<32x1xf32>
    %411 = vector.extract_strided_slice %263 {offsets = [0, 1], sizes = [32, 255], strides = [1, 1]} : vector<32x256xf32> to vector<32x255xf32>
    %412 = tpu.concatenate %411, %410 in 1 : vector<32x255xf32>, vector<32x1xf32> -> vector<32x256xf32>
    %cst_182 = arith.constant 0.000000e+00 : f32
    %413 = vector.shape_cast %10 : vector<1x256xi1> to vector<1x256xi1>
    %414 = vector.broadcast %413 : vector<1x256xi1> to vector<32x256xi1>
    %415 = vector.broadcast %cst_182 : f32 to vector<32x256xf32>
    %416 = arith.select %414, %412, %415 : vector<32x256xi1>, vector<32x256xf32>
    %417 = arith.truncf %416 : vector<32x256xf32> to vector<32x256xbf16>
    %c1_183 = arith.constant 1 : index
    %c160_184 = arith.constant 160 : index
    %c0_185 = arith.constant 0 : index
    %418 = vector.load %arg10[%c1_183, %c160_184, %c0_185] : memref<2x288x256xbf16, #tpu.memory_space<vmem>>, vector<1x32x256xbf16>
    %419 = vector.shape_cast %418 : vector<1x32x256xbf16> to vector<32x256xbf16>
    %420 = vector.shape_cast %417 : vector<32x256xbf16> to vector<1x32x256xbf16>
    tpu.vector_store %arg10[%c1_183, %c160_184, %c0_185], %420 {strides = array<i32>} : memref<2x288x256xbf16, #tpu.memory_space<vmem>>, vector<1x32x256xbf16>,
    %cst_186 = arith.constant 0.000000e+00 : f32
    %421 = vector.broadcast %cst_186 : f32 to vector<32x15xf32>
    %422 = vector.extract_strided_slice %263 {offsets = [0, 15], sizes = [32, 241], strides = [1, 1]} : vector<32x256xf32> to vector<32x241xf32>
    %423 = tpu.concatenate %422, %421 in 1 : vector<32x241xf32>, vector<32x15xf32> -> vector<32x256xf32>
    %424 = arith.andi %6, %8 : vector<1x256xi1>
    %cst_187 = arith.constant 0.000000e+00 : f32
    %425 = vector.shape_cast %424 : vector<1x256xi1> to vector<1x256xi1>
    %426 = vector.broadcast %425 : vector<1x256xi1> to vector<32x256xi1>
    %427 = vector.broadcast %cst_187 : f32 to vector<32x256xf32>
    %428 = arith.select %426, %423, %427 : vector<32x256xi1>, vector<32x256xf32>
    %429 = arith.truncf %428 : vector<32x256xf32> to vector<32x256xbf16>
    %c1_188 = arith.constant 1 : index
    %c192_189 = arith.constant 192 : index
    %c0_190 = arith.constant 0 : index
    %430 = vector.load %arg10[%c1_188, %c192_189, %c0_190] : memref<2x288x256xbf16, #tpu.memory_space<vmem>>, vector<1x32x256xbf16>
    %431 = vector.shape_cast %430 : vector<1x32x256xbf16> to vector<32x256xbf16>
    %432 = vector.shape_cast %429 : vector<32x256xbf16> to vector<1x32x256xbf16>
    tpu.vector_store %arg10[%c1_188, %c192_189, %c0_190], %432 {strides = array<i32>} : memref<2x288x256xbf16, #tpu.memory_space<vmem>>, vector<1x32x256xbf16>,
    %cst_191 = arith.constant 0.000000e+00 : f32
    %433 = vector.broadcast %cst_191 : f32 to vector<32x16xf32>
    %434 = vector.extract_strided_slice %263 {offsets = [0, 16], sizes = [32, 240], strides = [1, 1]} : vector<32x256xf32> to vector<32x240xf32>
    %435 = tpu.concatenate %434, %433 in 1 : vector<32x240xf32>, vector<32x16xf32> -> vector<32x256xf32>
    %cst_192 = arith.constant 0.000000e+00 : f32
    %436 = vector.shape_cast %6 : vector<1x256xi1> to vector<1x256xi1>
    %437 = vector.broadcast %436 : vector<1x256xi1> to vector<32x256xi1>
    %438 = vector.broadcast %cst_192 : f32 to vector<32x256xf32>
    %439 = arith.select %437, %435, %438 : vector<32x256xi1>, vector<32x256xf32>
    %440 = arith.truncf %439 : vector<32x256xf32> to vector<32x256xbf16>
    %c1_193 = arith.constant 1 : index
    %c224_194 = arith.constant 224 : index
    %c0_195 = arith.constant 0 : index
    %441 = vector.load %arg10[%c1_193, %c224_194, %c0_195] : memref<2x288x256xbf16, #tpu.memory_space<vmem>>, vector<1x32x256xbf16>
    %442 = vector.shape_cast %441 : vector<1x32x256xbf16> to vector<32x256xbf16>
    %443 = vector.shape_cast %440 : vector<32x256xbf16> to vector<1x32x256xbf16>
    tpu.vector_store %arg10[%c1_193, %c224_194, %c0_195], %443 {strides = array<i32>} : memref<2x288x256xbf16, #tpu.memory_space<vmem>>, vector<1x32x256xbf16>,
    %cst_196 = arith.constant 0.000000e+00 : f32
    %444 = vector.broadcast %cst_196 : f32 to vector<32x17xf32>
    %445 = vector.extract_strided_slice %263 {offsets = [0, 17], sizes = [32, 239], strides = [1, 1]} : vector<32x256xf32> to vector<32x239xf32>
    %446 = tpu.concatenate %445, %444 in 1 : vector<32x239xf32>, vector<32x17xf32> -> vector<32x256xf32>
    %447 = arith.andi %6, %10 : vector<1x256xi1>
    %cst_197 = arith.constant 0.000000e+00 : f32
    %448 = vector.shape_cast %447 : vector<1x256xi1> to vector<1x256xi1>
    %449 = vector.broadcast %448 : vector<1x256xi1> to vector<32x256xi1>
    %450 = vector.broadcast %cst_197 : f32 to vector<32x256xf32>
    %451 = arith.select %449, %446, %450 : vector<32x256xi1>, vector<32x256xf32>
    %452 = arith.truncf %451 : vector<32x256xf32> to vector<32x256xbf16>
    %c1_198 = arith.constant 1 : index
    %c256_199 = arith.constant 256 : index
    %c0_200 = arith.constant 0 : index
    %453 = vector.load %arg10[%c1_198, %c256_199, %c0_200] : memref<2x288x256xbf16, #tpu.memory_space<vmem>>, vector<1x32x256xbf16>
    %454 = vector.shape_cast %453 : vector<1x32x256xbf16> to vector<32x256xbf16>
    %455 = vector.shape_cast %452 : vector<32x256xbf16> to vector<1x32x256xbf16>
    tpu.vector_store %arg10[%c1_198, %c256_199, %c0_200], %455 {strides = array<i32>} : memref<2x288x256xbf16, #tpu.memory_space<vmem>>, vector<1x32x256xbf16>,
    %c0_201 = arith.constant 0 : index
    %c0_202 = arith.constant 0 : index
    %456 = vector.load %arg5[%c0_201, %c0_202] : memref<32x288xbf16, #tpu.memory_space<vmem>>, vector<32x288xbf16>
    %c0_203 = arith.constant 0 : index
    %c0_204 = arith.constant 0 : index
    %c0_205 = arith.constant 0 : index
    %457 = vector.load %arg10[%c0_203, %c0_204, %c0_205] : memref<2x288x256xbf16, #tpu.memory_space<vmem>>, vector<1x288x256xbf16>
    %458 = vector.shape_cast %457 : vector<1x288x256xbf16> to vector<288x256xbf16>
    %cst_206 = arith.constant dense<0.000000e+00> : vector<32x256xf32>
    %459 = tpu.matmul %456, %458, %cst_206 {dimension_numbers = #tpu.dot_dimension_numbers<[1], [0], [0], [1], [0, 0, 1, 1], [], []>} : vector<32x288xbf16>, vector<288x256xbf16>, vector<32x256xf32> -> vector<32x256xf32>
    %c0_207 = arith.constant 0 : index
    %c0_208 = arith.constant 0 : index
    %460 = vector.load %arg6[%c0_207, %c0_208] : memref<32x1xf32, #tpu.memory_space<vmem>>, vector<32x1xf32>
    %461 = vector.broadcast %460 : vector<32x1xf32> to vector<32x256xf32>
    %462 = arith.addf %459, %461 : vector<32x256xf32>
    %c0_209 = arith.constant 0 : index
    %c0_210 = arith.constant 0 : index
    %463 = vector.load %arg5[%c0_209, %c0_210] : memref<32x288xbf16, #tpu.memory_space<vmem>>, vector<32x288xbf16>
    %c1_211 = arith.constant 1 : index
    %c0_212 = arith.constant 0 : index
    %c0_213 = arith.constant 0 : index
    %464 = vector.load %arg10[%c1_211, %c0_212, %c0_213] : memref<2x288x256xbf16, #tpu.memory_space<vmem>>, vector<1x288x256xbf16>
    %465 = vector.shape_cast %464 : vector<1x288x256xbf16> to vector<288x256xbf16>
    %cst_214 = arith.constant dense<0.000000e+00> : vector<32x256xf32>
    %466 = tpu.matmul %463, %465, %cst_214 {dimension_numbers = #tpu.dot_dimension_numbers<[1], [0], [0], [1], [0, 0, 1, 1], [], []>} : vector<32x288xbf16>, vector<288x256xbf16>, vector<32x256xf32> -> vector<32x256xf32>
    %c0_215 = arith.constant 0 : index
    %c0_216 = arith.constant 0 : index
    %467 = vector.load %arg6[%c0_215, %c0_216] : memref<32x1xf32, #tpu.memory_space<vmem>>, vector<32x1xf32>
    %468 = vector.broadcast %467 : vector<32x1xf32> to vector<32x256xf32>
    %469 = arith.addf %466, %468 : vector<32x256xf32>
    %cst_217 = arith.constant dense<0.000000e+00> : vector<32xf32>
    %470 = vector.multi_reduction <add>, %462, %cst_217 [1] : vector<32x256xf32> to vector<32xf32>
    %471 = vector.shape_cast %470 : vector<32xf32> to vector<32x1xf32>
    %cst_218 = arith.constant 0.000000e+00 : f32
    %472 = vector.broadcast %cst_218 : f32 to vector<32x1xf32>
    %473 = arith.addf %472, %471 : vector<32x1xf32>
    %cst_219 = arith.constant dense<0.000000e+00> : vector<32xf32>
    %474 = vector.multi_reduction <add>, %469, %cst_219 [1] : vector<32x256xf32> to vector<32xf32>
    %475 = vector.shape_cast %474 : vector<32xf32> to vector<32x1xf32>
    %476 = arith.addf %473, %475 : vector<32x1xf32>
    %cst_220 = arith.constant 0.001953125 : f32
    %477 = vector.broadcast %cst_220 : f32 to vector<32x1xf32>
    %478 = arith.mulf %476, %477 : vector<32x1xf32>
    %479 = vector.broadcast %478 : vector<32x1xf32> to vector<32x256xf32>
    %480 = arith.subf %462, %479 : vector<32x256xf32>
    %481 = vector.broadcast %478 : vector<32x1xf32> to vector<32x256xf32>
    %482 = arith.subf %469, %481 : vector<32x256xf32>
    %483 = arith.mulf %480, %480 : vector<32x256xf32>
    %cst_221 = arith.constant dense<0.000000e+00> : vector<32xf32>
    %484 = vector.multi_reduction <add>, %483, %cst_221 [1] : vector<32x256xf32> to vector<32xf32>
    %485 = vector.shape_cast %484 : vector<32xf32> to vector<32x1xf32>
    %cst_222 = arith.constant 0.000000e+00 : f32
    %486 = vector.broadcast %cst_222 : f32 to vector<32x1xf32>
    %487 = arith.addf %486, %485 : vector<32x1xf32>
    %488 = arith.mulf %482, %482 : vector<32x256xf32>
    %cst_223 = arith.constant dense<0.000000e+00> : vector<32xf32>
    %489 = vector.multi_reduction <add>, %488, %cst_223 [1] : vector<32x256xf32> to vector<32xf32>
    %490 = vector.shape_cast %489 : vector<32xf32> to vector<32x1xf32>
    %491 = arith.addf %487, %490 : vector<32x1xf32>
    %cst_224 = arith.constant 0.001953125 : f32
    %492 = vector.broadcast %cst_224 : f32 to vector<32x1xf32>
    %493 = arith.mulf %491, %492 : vector<32x1xf32>
    %c0_225 = arith.constant 0 : index
    %c0_226 = arith.constant 0 : index
    %494 = vector.load %arg7[%c0_225, %c0_226] : memref<32x1xf32, #tpu.memory_space<vmem>>, vector<32x1xf32>
    %cst_227 = arith.constant 9.99999974E-6 : f32
    %495 = vector.broadcast %cst_227 : f32 to vector<32x1xf32>
    %496 = arith.addf %493, %495 : vector<32x1xf32>
    %497 = math.rsqrt %496 : vector<32x1xf32>
    %498 = arith.mulf %494, %497 : vector<32x1xf32>
    %499 = vector.broadcast %498 : vector<32x1xf32> to vector<32x256xf32>
    %500 = arith.mulf %480, %499 : vector<32x256xf32>
    %c0_228 = arith.constant 0 : index
    %c0_229 = arith.constant 0 : index
    %501 = vector.load %arg8[%c0_228, %c0_229] : memref<32x1xf32, #tpu.memory_space<vmem>>, vector<32x1xf32>
    %502 = vector.broadcast %501 : vector<32x1xf32> to vector<32x256xf32>
    %503 = arith.addf %500, %502 : vector<32x256xf32>
    %cst_230 = arith.constant 0.000000e+00 : f32
    %504 = vector.broadcast %cst_230 : f32 to vector<32x256xf32>
    %505 = arith.maximumf %503, %504 : vector<32x256xf32>
    %506 = vector.broadcast %498 : vector<32x1xf32> to vector<32x256xf32>
    %507 = arith.mulf %482, %506 : vector<32x256xf32>
    %c0_231 = arith.constant 0 : index
    %c0_232 = arith.constant 0 : index
    %508 = vector.load %arg8[%c0_231, %c0_232] : memref<32x1xf32, #tpu.memory_space<vmem>>, vector<32x1xf32>
    %509 = vector.broadcast %508 : vector<32x1xf32> to vector<32x256xf32>
    %510 = arith.addf %507, %509 : vector<32x256xf32>
    %cst_233 = arith.constant 0.000000e+00 : f32
    %511 = vector.broadcast %cst_233 : f32 to vector<32x256xf32>
    %512 = arith.maximumf %510, %511 : vector<32x256xf32>
    %c0_234 = arith.constant 0 : index
    %c0_235 = arith.constant 0 : index
    %c0_236 = arith.constant 0 : index
    %513 = vector.load %arg9[%c0_234, %c0_235, %c0_236] : memref<2x32x256xf32, #tpu.memory_space<vmem>>, vector<1x32x256xf32>
    %514 = vector.shape_cast %513 : vector<1x32x256xf32> to vector<32x256xf32>
    %515 = vector.shape_cast %505 : vector<32x256xf32> to vector<1x32x256xf32>
    tpu.vector_store %arg9[%c0_234, %c0_235, %c0_236], %515 {strides = array<i32>} : memref<2x32x256xf32, #tpu.memory_space<vmem>>, vector<1x32x256xf32>,
    %c1_237 = arith.constant 1 : index
    %c0_238 = arith.constant 0 : index
    %c0_239 = arith.constant 0 : index
    %516 = vector.load %arg9[%c1_237, %c0_238, %c0_239] : memref<2x32x256xf32, #tpu.memory_space<vmem>>, vector<1x32x256xf32>
    %517 = vector.shape_cast %516 : vector<1x32x256xf32> to vector<32x256xf32>
    %518 = vector.shape_cast %512 : vector<32x256xf32> to vector<1x32x256xf32>
    tpu.vector_store %arg9[%c1_237, %c0_238, %c0_239], %518 {strides = array<i32>} : memref<2x32x256xf32, #tpu.memory_space<vmem>>, vector<1x32x256xf32>,
    return
  }
}

</mosaic_0001>

<bundles_post_ra>
// kernel: twice_conv.1
= control target key start
LH: loop header
LB: loop body
LE: loop exit
PB: predicated region body
PF: predicated region fallthrough
CT: control target
= control target key end

     0   :  { %s3981_s25 = smov 17   ;;  %s3983_s21 = smov 15   ;;  %v33_v34 = vlaneseq  ;;  %vm87_vm3 = vcmask 138240   ;;  %v5616_v56 = vmov 0   ;;  %vm142_vm9 = vcmask 130048   ;;  %s5601_s0 = inlined_call_operand.vmem [shape: f32[2,32,256], index: 0, kind: input, shape index: {}]   ;;  %s5602_s1 = inlined_call_operand.vmem [shape: bf16[32,288], index: 1, kind: input, shape index: {}]   ;;  %s5603_s2 = inlined_call_operand.vmem [shape: f32[32,1], index: 2, kind: input, shape index: {}]   ;;  %s5604_s4 = inlined_call_operand.vmem [shape: f32[32,1], index: 4, kind: input, shape index: {}]   ;;  %s5605_s3 = inlined_call_operand.vmem [shape: f32[32,1], index: 3, kind: input, shape index: {}]   ;;  %s5606_s5 = inlined_call_operand.vmem [shape: bf16[32,288], index: 5, kind: input, shape index: {}]   ;;  %s5607_s6 = inlined_call_operand.vmem [shape: f32[32,1], index: 6, kind: input, shape index: {}]   ;;  %s5608_s8 = inlined_call_operand.vmem [shape: f32[32,1], index: 8, kind: input, shape index: {}]   ;;  %s5609_s7 = inlined_call_operand.vmem [shape: f32[32,1], index: 7, kind: input, shape index: {}]   ;;  %s5610_s9 = inlined_call_operand.vmem [shape: f32[2,32,256], index: 9, kind: output, shape index: {}]  }
   0x1   :  { %v4043_v0 = vld [vmem:[%s5601_s0 + $0x40] sm:$0xff]  ;;  %v4048_v1 = vld [vmem:[%s5601_s0 + $0x48] sm:$0xff]  ;;  %v4065_v5 = vld [vmem:[%s5601_s0 + $0x50] sm:$0xff]  ;;  %s3984_s22 = smov 1   ;;  %s3985_s23 = smov 127   ;;  %3627 = vset.pattern.permute.xlu0 %v5616_v56  ;;  %3628 = vset.pattern.permute.xlu1 %v5616_v56  ;;  %vm5614_vm12 = vcmask 121856  }
   0x2   :  { %v4053_v2 = vld [vmem:[%s5601_s0] sm:$0xff]  ;;  %v3317_v3 = vpack.i.bf16 %v4048_v1, %v4043_v0  ;;  %v4060_v4 = vld [vmem:[%s5601_s0 + $0x8] sm:$0xff]  ;;  %v4070_v6 = vld [vmem:[%s5601_s0 + $0x58] sm:$0xff]  ;;  %v4138_v22 = vpack.i.bf16 %v4065_v5, %v4043_v0  ;;  %v712_v38 = vpack.c.bf16 %v4065_v5, %v4043_v0  ;;  %v4210_v39 = vand.u32 127, %v33_v34  ;;  %s3986_s24 = smov 113   ;;  %s3987_s26 = smov 112  }
   0x3   :  { %v3307_v7 = vpack.i.bf16 %v4060_v4, %v4053_v2  ;;  %v4077_v8 = vld [vmem:[%s5601_s0 + $0x10] sm:$0xff]  ;;  %v4082_v9 = vld [vmem:[%s5601_s0 + $0x18] sm:$0xff]  ;;  %v3322_v10 = vpack.i.bf16 %v4070_v6, %v4065_v5  ;;  %v4103_v14 = vld [vmem:[%s5601_s0 + $0x20] sm:$0xff]  ;;  %v4159_v28 = vpack.i.bf16 %v4070_v6, %v4048_v1  ;;  %v713_v36 = vpack.c.bf16 %v4070_v6, %v4048_v1  ;;  %s3988_s29 = smov 111  }
   0x4   :  { %3318 = vrot.lane.b32.xlu1 %v3317_v3, %s3981_s25  ;;  %v3312_v11 = vpack.i.bf16 %v4082_v9, %v4077_v8  ;;  %v4093_v12 = vld [vmem:[%s5601_s0 + $0x30] sm:$0xff]  ;;  %v4098_v13 = vld [vmem:[%s5601_s0 + $0x38] sm:$0xff]  ;;  %v4108_v15 = vld [vmem:[%s5601_s0 + $0x28] sm:$0xff]  ;;  %v4142_v23 = vpack.i.bf16 %v4077_v8, %v4053_v2  ;;  %v4163_v29 = vpack.i.bf16 %v4082_v9, %v4060_v4  ;;  %v288_v32 = vpack.c.bf16 %v4082_v9, %v4060_v4 }
   0x5   :  { %3308 = vrot.lane.b32.xlu0 %v3307_v7, %s3981_s25  ;;  %v4113_v16 = vld [vmem:[%s5601_s0 + $0x70] sm:$0xff]  ;;  %v3332_v17 = vpack.i.bf16 %v4098_v13, %v4093_v12  ;;  %v4121_v18 = vld [vmem:[%s5601_s0 + $0x78] sm:$0xff]  ;;  %v4126_v19 = vld [vmem:[%s5601_s0 + $0x60] sm:$0xff]  ;;  %v3327_v21 = vpack.i.bf16 %v4108_v15, %v4103_v14  ;;  %v4150_v26 = vpack.i.bf16 %v4098_v13, %v4108_v15  ;;  %v4154_v27 = vpack.i.bf16 %v4093_v12, %v4103_v14 }
   0x6   :  { %v4131_v20 = vld [vmem:[%s5601_s0 + $0x68] sm:$0xff]  ;;  %v3342_v24 = vpack.i.bf16 %v4121_v18, %v4113_v16  ;;  %v4172_v31 = vpack.i.bf16 %v4113_v16, %v4126_v19  ;;  %s3982_s0 = smov 16   ;;  %v287_v33 = vpack.c.bf16 %v4077_v8, %v4053_v2  ;;  %v290_v35 = vpack.c.bf16 %v4098_v13, %v4108_v15  ;;  %v3951_v46 = vld [vmem:[%s5602_s1 + $0x4] ss:$12 sps:$4 sm:$0xff]  }
   0x7   :  { %v3337_v25 = vpack.i.bf16 %v4131_v20, %v4126_v19  ;;  %v4168_v30 = vpack.i.bf16 %v4121_v18, %v4131_v20  ;;  %v289_v37 = vpack.c.bf16 %v4093_v12, %v4103_v14  ;;  %v715_v40 = vpack.c.bf16 %v4121_v18, %v4131_v20  ;;  %1049 = vmatprep.mubr.bf16.mxu0 %v3951_v46 }
   0x8   :  { %3323 = vrot.lane.b32.xlu1 %v3322_v10, %s3981_s25  ;;  %v714_v41 = vpack.c.bf16 %v4113_v16, %v4126_v19  ;;  %v4219_v42 = vadd.s32 128, %v4210_v39  ;;  %1191 = vmatprep.mubr.bf16.mxu1 %v3951_v46  ;;  %v36_v47 = vand.u32 15, %v4210_v39  ;;  %vm38_vm4 = vcmp.ge.s32.totalorder %v4210_v39, 16 }
   0x9   :  { %3313 = vrot.lane.b32.xlu0 %v3312_v11, %s3981_s25  ;;  %vm4387_vm10 = vmpackc.low %vm38_vm4, %vm38_vm4 }
   0xa   :  { %v37_v43 = vand.u32 15, %v4219_v42  ;;  %vm41_vm1 = vcmp.lt.s32.totalorder %v4219_v42, 240  ;;  %vm4300_vm5 = vcmp.gt.s32.totalorder %v36_v47, 0  ;;  %vm4407_vm11 = vcmp.lt.s32.totalorder %v36_v47, 15  ;;  %v3952_v42 = vld [vmem:[%s5602_s1 + $0x1c] ss:$12 sps:$4 sm:$0xff]  }
   0xb   :  { %vm4313_vm6 = vmand %vm38_vm4, %vm4300_vm5 }
   0xc   :  { %3333 = vrot.lane.b32.xlu1 %v3332_v17, %s3981_s25  ;;  %vm4232_vm0 = vcmp.gt.s32.totalorder %v37_v43, 0  ;;  %vm4336_vm8 = vmpackc.low %vm4313_vm6, %vm4313_vm6  ;;  %vm4417_vm13 = vcmp.lt.s32.totalorder %v37_v43, 15 }
   0xd   :  { %3328 = vrot.lane.b32.xlu0 %v3327_v21, %s3981_s25  ;;  %vm4241_vm2 = vmand %vm41_vm1, %vm4232_vm0 }
   0xe   :  { %vm4324_vm7 = vmpackc.low %vm4232_vm0, %vm4232_vm0 }
   0xf   :  { %vm212_vm14 = vmand %vm38_vm4, %vm4407_vm11  ;;  %vm5613_vm4 = vcmask 7168  }
  0x10   :  { %3343 = vrot.lane.b32.xlu1 %v3342_v24, %s3981_s25  ;;  %vm4434_vm15 = vmpackc.low %vm4417_vm13, %vm4417_vm13 }
  0x11   :  { %3338 = vrot.lane.b32.xlu0 %v3337_v25, %s3981_s25  ;;  %vm4438_vm0 = vmpackc.low %vm212_vm14, %vm212_vm14 }
  0x12   :  { %vm4477_vm6 = vmpackc.low %vm4300_vm5, %vm4300_vm5  ;;  %vm5611_vm5 = vcmask 1039360  }
  0x13   :  { %vm4536_vm14 = vmpackc.low %vm4407_vm11, %vm4407_vm11  ;;  %vm5612_vm11 = vcmask 924672  }
  0x14   :  { %3353 = vrot.lane.b32.xlu1 %v3312_v11, %s3982_s0 }
  0x15   :  { %3348 = vrot.lane.b32.xlu0 %v3307_v7, %s3982_s0 }
  0x18   :  { %3363 = vrot.lane.b32.xlu1 %v3322_v10, %s3982_s0 }
  0x19   :  { %3358 = vrot.lane.b32.xlu0 %v3317_v3, %s3982_s0 }
  0x1c   :  { %3373 = vrot.lane.b32.xlu1 %v3332_v17, %s3982_s0 }
  0x1d   :  { %3368 = vrot.lane.b32.xlu0 %v3327_v21, %s3982_s0 }
  0x20   :  { %3383 = vrot.lane.b32.xlu1 %v3342_v24, %s3982_s0 }
  0x21   :  { %3378 = vrot.lane.b32.xlu0 %v3337_v25, %s3982_s0 }
  0x24   :  { %3393 = vrot.lane.b32.xlu1 %v3312_v11, %s3983_s21 }
  0x25   :  { %3388 = vrot.lane.b32.xlu0 %v3307_v7, %s3983_s21 }
  0x28   :  { %3403 = vrot.lane.b32.xlu1 %v3322_v10, %s3983_s21 }
  0x29   :  { %3398 = vrot.lane.b32.xlu0 %v3317_v3, %s3983_s21 }
  0x2c   :  { %3413 = vrot.lane.b32.xlu1 %v3332_v17, %s3983_s21 }
  0x2d   :  { %3408 = vrot.lane.b32.xlu0 %v3327_v21, %s3983_s21 }
  0x30   :  { %3423 = vrot.lane.b32.xlu1 %v3342_v24, %s3983_s21 }
  0x31   :  { %3418 = vrot.lane.b32.xlu0 %v3337_v25, %s3983_s21 }
  0x34   :  { %3433 = vrot.lane.b32.xlu1 %v3312_v11, %s3984_s22 }
  0x35   :  { %3428 = vrot.lane.b32.xlu0 %v3307_v7, %s3984_s22 }
  0x38   :  { %3443 = vrot.lane.b32.xlu1 %v3322_v10, %s3984_s22 }
  0x39   :  { %3438 = vrot.lane.b32.xlu0 %v3317_v3, %s3984_s22 }
  0x3c   :  { %3453 = vrot.lane.b32.xlu1 %v3332_v17, %s3984_s22 }
  0x3d   :  { %3448 = vrot.lane.b32.xlu0 %v3327_v21, %s3984_s22 }
  0x40   :  { %3463 = vrot.lane.b32.xlu1 %v3342_v24, %s3984_s22 }
  0x41   :  { %3458 = vrot.lane.b32.xlu0 %v3337_v25, %s3984_s22 }
  0x44   :  { %3473 = vrot.lane.b32.xlu1 %v4159_v28, %s3985_s23 }
  0x45   :  { %3468 = vrot.lane.b32.xlu0 %v4163_v29, %s3985_s23 }
  0x48   :  { %3483 = vrot.lane.b32.xlu1 %v4138_v22, %s3985_s23 }
  0x49   :  { %3478 = vrot.lane.b32.xlu0 %v4142_v23, %s3985_s23 }
  0x4c   :  { %3493 = vrot.lane.b32.xlu1 %v4168_v30, %s3985_s23 }
  0x4d   :  { %3488 = vrot.lane.b32.xlu0 %v4150_v26, %s3985_s23 }
  0x50   :  { %3503 = vrot.lane.b32.xlu1 %v4172_v31, %s3985_s23 }
  0x51   :  { %3498 = vrot.lane.b32.xlu0 %v4154_v27, %s3985_s23 }
  0x54   :  { %3513 = vrot.lane.b32.xlu1 %v4159_v28, %s3986_s24 }
  0x55   :  { %3508 = vrot.lane.b32.xlu0 %v4163_v29, %s3986_s24 }
  0x58   :  { %3523 = vrot.lane.b32.xlu1 %v4138_v22, %s3986_s24 }
  0x59   :  { %3518 = vrot.lane.b32.xlu0 %v4142_v23, %s3986_s24 }
  0x5c   :  { %3533 = vrot.lane.b32.xlu1 %v4168_v30, %s3986_s24 }
  0x5d   :  { %3528 = vrot.lane.b32.xlu0 %v4150_v26, %s3986_s24 }
  0x60   :  { %3543 = vrot.lane.b32.xlu1 %v4172_v31, %s3986_s24 }
  0x61   :  { %3538 = vrot.lane.b32.xlu0 %v4154_v27, %s3986_s24 }
  0x64   :  { %3553 = vrot.lane.b32.xlu1 %v4159_v28, %s3987_s26 }
  0x65   :  { %3548 = vrot.lane.b32.xlu0 %v4163_v29, %s3987_s26 }
  0x68   :  { %3563 = vrot.lane.b32.xlu1 %v4138_v22, %s3987_s26 }
  0x69   :  { %3558 = vrot.lane.b32.xlu0 %v4142_v23, %s3987_s26 }
  0x6c   :  { %3573 = vrot.lane.b32.xlu1 %v4168_v30, %s3987_s26 }
  0x6d   :  { %3568 = vrot.lane.b32.xlu0 %v4150_v26, %s3987_s26 }
  0x70   :  { %3583 = vrot.lane.b32.xlu1 %v4172_v31, %s3987_s26 }
  0x71   :  { %3578 = vrot.lane.b32.xlu0 %v4154_v27, %s3987_s26 }
  0x74   :  { %3593 = vrot.lane.b32.xlu1 %v4159_v28, %s3988_s29 }
  0x75   :  { %3588 = vrot.lane.b32.xlu0 %v4163_v29, %s3988_s29 }
  0x76   :  { %v3319_v48 = vpop.permute.xlu1 %3318 }
  0x77   :  { %v3309_v49 = vpop.permute.xlu0 %3308  ;;  %v3321_v50 = vunpack.i.h.bf16 %v3319_v48  ;;  %v3320_v51 = vunpack.i.l.bf16 %v3319_v48 }
  0x78   :  { %3603 = vrot.lane.b32.xlu1 %v4138_v22, %s3988_s29  ;;  %v3311_v52 = vunpack.i.h.bf16 %v3309_v49  ;;  %v3310_v53 = vunpack.i.l.bf16 %v3309_v49 }
  0x79   :  { %3598 = vrot.lane.b32.xlu0 %v4142_v23, %s3988_s29  ;;  %v535_v62 = vsel %vm87_vm3, %v3320_v51, %v3321_v50  ;;  %v547_v3 = vsel %vm87_vm3, 0.0, %v3320_v51 }
  0x7a   :  { %v3324_v55 = vpop.permute.xlu1 %3323  ;;  %v88_v11 = vsel %vm87_vm3, %v3310_v53, %v3311_v52  ;;  %v100_v17 = vsel %vm87_vm3, 0.0, %v3310_v53 }
  0x7b   :  { %v3326_v57 = vunpack.i.h.bf16 %v3324_v55  ;;  %v3325_v58 = vunpack.i.l.bf16 %v3324_v55  ;;  %v3314_v59 = vpop.permute.xlu0 %3313 }
  0x7c   :  { %v3316_v60 = vunpack.i.h.bf16 %v3314_v59  ;;  %v3315_v61 = vunpack.i.l.bf16 %v3314_v59  ;;  %3613 = vrot.lane.b32.xlu1 %v4168_v30, %s3988_s29 }
  0x7d   :  { %3608 = vrot.lane.b32.xlu0 %v4150_v26, %s3988_s29  ;;  %v536_v7 = vsel %vm87_vm3, %v3325_v58, %v3326_v57  ;;  %v548_v21 = vsel %vm87_vm3, 0.0, %v3325_v58 }
  0x7e   :  { %v3334_v22 = vpop.permute.xlu1 %3333  ;;  %v2983_v23 = vpack.c.bf16 %v536_v7, %v535_v62  ;;  %v89_v24 = vsel %vm87_vm3, %v3315_v61, %v3316_v60  ;;  %v101_v25 = vsel %vm87_vm3, 0.0, %v3315_v61  ;;  %v2986_v26 = vpack.c.bf16 %v548_v21, %v547_v3  ;;  %v956_v3 = vld [vmem:[%s5603_s2] sm:$0xff]  ;;  %v957_v7 = vld [vmem:[%s5603_s2 + $0x8] sm:$0xff] }
  0x7f   :  { %v3336_v28 = vunpack.i.h.bf16 %v3334_v22  ;;  %v3335_v29 = vunpack.i.l.bf16 %v3334_v22  ;;  %v3329_v30 = vpop.permute.xlu0 %3328  ;;  %v2899_v34 = vpack.c.bf16 %v89_v24, %v88_v11  ;;  %v2902_v46 = vpack.c.bf16 %v101_v25, %v100_v17 }
  0x80   :  { %v3331_v48 = vunpack.i.h.bf16 %v3329_v30  ;;  %v3330_v49 = vunpack.i.l.bf16 %v3329_v30  ;;  %2984 = vmatprep.subr.msk.bf16.mxu1 %vm4324_vm7, %v2983_v23  ;;  %3623 = vrot.lane.b32.xlu1 %v4172_v31, %s3988_s29 }
  0x81   :  { %v91_v50 = vsel %vm87_vm3, %v3335_v29, %v3336_v28  ;;  %v103_v51 = vsel %vm87_vm3, 0.0, %v3335_v29  ;;  %3618 = vrot.lane.b32.xlu0 %v4154_v27, %s3988_s29  ;;  %2900 = vmatprep.subr.msk.bf16.mxu0 %vm4324_vm7, %v2899_v34  ;;  %v959_v28 = vld [vmem:[%s5603_s2 + $0x18] sm:$0xff]  ;;  %v958_v34 = vld [vmem:[%s5603_s2 + $0x10] sm:$0xff] }
  0x82   :  { %v90_v52 = vsel %vm87_vm3, %v3330_v49, %v3331_v48  ;;  %v102_v53 = vsel %vm87_vm3, 0.0, %v3330_v49  ;;  %2903 = vmatpush1.bf16.msk.msra.mxu0 %vm4336_vm8, %v2902_v46  ;;  %2987 = vmatpush1.bf16.msk.msra.mxu1 %vm4336_vm8, %v2986_v26  ;;  %v3344_v31 = vpop.permute.xlu1 %3343 }
  0x83   :  { %v2908_v55 = vpack.c.bf16 %v103_v51, %v102_v53  ;;  %v3346_v57 = vunpack.i.h.bf16 %v3344_v31  ;;  %v3345_v58 = vunpack.i.l.bf16 %v3344_v31  ;;  %v3339_v59 = vpop.permute.xlu0 %3338  ;;  %v2905_v60 = vpack.c.bf16 %v91_v50, %v90_v52 }
  0x84   :  { %v3341_v27 = vunpack.i.h.bf16 %v3339_v59  ;;  %v3340_v61 = vunpack.i.l.bf16 %v3339_v59  ;;  %967 = vperm.xlu1 %3628, %v957_v7  }
  0x85   :  { %v538_v62 = vsel %vm87_vm3, %v3345_v58, %v3346_v57  ;;  %v550_v63 = vsel %vm87_vm3, 0.0, %v3345_v58  ;;  %2906 = vmatprep.subr.msk.bf16.mxu0 %vm4324_vm7, %v2905_v60  ;;  %962 = vperm.xlu0 %3627, %v956_v3  }
  0x86   :  { %v537_v11 = vsel %vm87_vm3, %v3340_v61, %v3341_v27  ;;  %v549_v17 = vsel %vm87_vm3, 0.0, %v3340_v61  ;;  %2909 = vmatpush1.bf16.msk.msra.mxu0 %vm4336_vm8, %v2908_v55  ;;  %v3354_v21 = vpop.permute.xlu1 %3353 }
  0x87   :  { %v2992_v22 = vpack.c.bf16 %v550_v63, %v549_v17  ;;  %v3356_v23 = vunpack.i.h.bf16 %v3354_v21  ;;  %v3355_v24 = vunpack.i.l.bf16 %v3354_v21  ;;  %v3349_v25 = vpop.permute.xlu0 %3348  ;;  %v2989_v26 = vpack.c.bf16 %v538_v62, %v537_v11 }
  0x88   :  { %v3351_v29 = vunpack.i.h.bf16 %v3349_v25  ;;  %v3350_v30 = vunpack.i.l.bf16 %v3349_v25  ;;  %972 = vperm.xlu1 %3628, %v958_v34  }
  0x89   :  { %v156_v46 = vsel %vm142_vm9, 0.0, %v3355_v24  ;;  %2990 = vmatprep.subr.msk.bf16.mxu1 %vm4324_vm7, %v2989_v26  ;;  %v144_v48 = vsel %vm142_vm9, %v3355_v24, %v3356_v23  ;;  %977 = vperm.xlu0 %3627, %v959_v28  }
  0x8a   :  { %v155_v49 = vsel %vm142_vm9, 0.0, %v3350_v30  ;;  %2993 = vmatpush1.bf16.msk.msra.mxu1 %vm4336_vm8, %v2992_v22  ;;  %v3364_v50 = vpop.permute.xlu1 %3363  ;;  %v143_v51 = vsel %vm142_vm9, %v3350_v30, %v3351_v29 }
  0x8b   :  { %v2911_v52 = vpack.c.bf16 %v156_v46, %v155_v49  ;;  %v3366_v53 = vunpack.i.h.bf16 %v3364_v50  ;;  %v3365_v31 = vunpack.i.l.bf16 %v3364_v50  ;;  %v3359_v55 = vpop.permute.xlu0 %3358  ;;  %v172_v57 = vpack.c.bf16 %v144_v48, %v143_v51 }
  0x8c   :  { %v3361_v59 = vunpack.i.h.bf16 %v3359_v55  ;;  %v3360_v60 = vunpack.i.l.bf16 %v3359_v55 }
  0x8d   :  { %v597_v27 = vsel %vm142_vm9, 0.0, %v3365_v31  ;;  %1021 = vmatprep.subr.bf16.mxu0 %v172_v57  ;;  %v585_v61 = vsel %vm142_vm9, %v3365_v31, %v3366_v53 }
  0x8e   :  { %v596_v62 = vsel %vm142_vm9, 0.0, %v3360_v60  ;;  %2912 = vmatpush1.bf16.msk.msra.mxu0 %vm4387_vm10, %v2911_v52  ;;  %v3374_v63 = vpop.permute.xlu1 %3373  ;;  %v584_v3 = vsel %vm142_vm9, %v3360_v60, %v3361_v59 }
  0x8f   :  { %v2995_v7 = vpack.c.bf16 %v597_v27, %v596_v62  ;;  %v3376_v11 = vunpack.i.h.bf16 %v3374_v63  ;;  %v3375_v17 = vunpack.i.l.bf16 %v3374_v63  ;;  %v3369_v21 = vpop.permute.xlu0 %3368  ;;  %v609_v22 = vpack.c.bf16 %v585_v61, %v584_v3 }
  0x90   :  { %v3371_v23 = vunpack.i.h.bf16 %v3369_v21  ;;  %v3370_v24 = vunpack.i.l.bf16 %v3369_v21  ;;  %v5658_v27 = vmov 0 }
  0x91   :  { %v158_v25 = vsel %vm142_vm9, 0.0, %v3375_v17  ;;  %1163 = vmatprep.subr.bf16.mxu1 %v609_v22  ;;  %v146_v26 = vsel %vm142_vm9, %v3375_v17, %v3376_v11 }
  0x92   :  { %v157_v28 = vsel %vm142_vm9, 0.0, %v3370_v24  ;;  %2996 = vmatpush1.bf16.msk.msra.mxu1 %vm4387_vm10, %v2995_v7  ;;  %v3384_v29 = vpop.permute.xlu1 %3383  ;;  %v145_v30 = vsel %vm142_vm9, %v3370_v24, %v3371_v23 }
  0x93   :  { %v2914_v34 = vpack.c.bf16 %v158_v25, %v157_v28  ;;  %v3386_v46 = vunpack.i.h.bf16 %v3384_v29  ;;  %v3385_v48 = vunpack.i.l.bf16 %v3384_v29  ;;  %v3379_v49 = vpop.permute.xlu0 %3378  ;;  %v174_v50 = vpack.c.bf16 %v146_v26, %v145_v30 }
  0x94   :  { %v3381_v51 = vunpack.i.h.bf16 %v3379_v49  ;;  %v3380_v52 = vunpack.i.l.bf16 %v3379_v49 }
  0x95   :  { %v599_v53 = vsel %vm142_vm9, 0.0, %v3385_v48  ;;  %1023 = vmatprep.subr.bf16.mxu0 %v174_v50  ;;  %v587_v31 = vsel %vm142_vm9, %v3385_v48, %v3386_v46 }
  0x96   :  { %v598_v57 = vsel %vm142_vm9, 0.0, %v3380_v52  ;;  %2915 = vmatpush1.bf16.msk.msra.mxu0 %vm4387_vm10, %v2914_v34  ;;  %v3394_v59 = vpop.permute.xlu1 %3393  ;;  %v586_v60 = vsel %vm142_vm9, %v3380_v52, %v3381_v51 }
  0x97   :  { %v2998_v61 = vpack.c.bf16 %v599_v53, %v598_v57  ;;  %v3396_v47 = vunpack.i.h.bf16 %v3394_v59  ;;  %v3395_v62 = vunpack.i.l.bf16 %v3394_v59  ;;  %v3389_v63 = vpop.permute.xlu0 %3388  ;;  %v611_v3 = vpack.c.bf16 %v587_v31, %v586_v60 }
  0x98   :  { %v3391_v7 = vunpack.i.h.bf16 %v3389_v63  ;;  %v3390_v11 = vunpack.i.l.bf16 %v3389_v63 }
  0x99   :  { %v197_v17 = vsel %vm5614_vm12, %v3395_v62, %v3396_v47  ;;  %v209_v21 = vsel %vm5614_vm12, 0.0, %v3395_v62  ;;  %1165 = vmatprep.subr.bf16.mxu1 %v611_v3 }
  0x9a   :  { %v196_v43 = vsel %vm5614_vm12, %v3390_v11, %v3391_v7  ;;  %v208_v22 = vsel %vm5614_vm12, 0.0, %v3390_v11  ;;  %2999 = vmatpush1.bf16.msk.msra.mxu1 %vm4387_vm10, %v2998_v61  ;;  %v3404_v23 = vpop.permute.xlu1 %3403 }
  0x9b   :  { %v2920_v39 = vpack.c.bf16 %v209_v21, %v208_v22  ;;  %v3406_v25 = vunpack.i.h.bf16 %v3404_v23  ;;  %v3405_v26 = vunpack.i.l.bf16 %v3404_v23  ;;  %v3399_v28 = vpop.permute.xlu0 %3398  ;;  %v2917_v29 = vpack.c.bf16 %v197_v17, %v196_v43 }
  0x9c   :  { %v3401_v34 = vunpack.i.h.bf16 %v3399_v28  ;;  %v3400_v46 = vunpack.i.l.bf16 %v3399_v28 }
  0x9d   :  { %v633_v48 = vsel %vm5614_vm12, %v3405_v26, %v3406_v25  ;;  %v645_v49 = vsel %vm5614_vm12, 0.0, %v3405_v26  ;;  %2918 = vmatprep.subr.msk.bf16.mxu0 %vm4434_vm15, %v2917_v29 }
  0x9e   :  { %v632_v50 = vsel %vm5614_vm12, %v3400_v46, %v3401_v34  ;;  %v644_v51 = vsel %vm5614_vm12, 0.0, %v3400_v46  ;;  %2921 = vmatpush1.bf16.msk.msra.mxu0 %vm4438_vm0, %v2920_v39  ;;  %v3414_v52 = vpop.permute.xlu1 %3413 }
  0x9f   :  { %v3004_v53 = vpack.c.bf16 %v645_v49, %v644_v51  ;;  %v3416_v31 = vunpack.i.h.bf16 %v3414_v52  ;;  %v3415_v57 = vunpack.i.l.bf16 %v3414_v52  ;;  %v3409_v59 = vpop.permute.xlu0 %3408  ;;  %v3001_v60 = vpack.c.bf16 %v633_v48, %v632_v50 }
  0xa0   :  { %v3411_v61 = vunpack.i.h.bf16 %v3409_v59  ;;  %v3410_v47 = vunpack.i.l.bf16 %v3409_v59 }
  0xa1   :  { %v199_v62 = vsel %vm5614_vm12, %v3415_v57, %v3416_v31  ;;  %v211_v63 = vsel %vm5614_vm12, 0.0, %v3415_v57  ;;  %3002 = vmatprep.subr.msk.bf16.mxu1 %vm4434_vm15, %v3001_v60 }
  0xa2   :  { %v198_v3 = vsel %vm5614_vm12, %v3410_v47, %v3411_v61  ;;  %v210_v7 = vsel %vm5614_vm12, 0.0, %v3410_v47  ;;  %3005 = vmatpush1.bf16.msk.msra.mxu1 %vm4438_vm0, %v3004_v53  ;;  %v3424_v11 = vpop.permute.xlu1 %3423 }
  0xa3   :  { %v2926_v17 = vpack.c.bf16 %v211_v63, %v210_v7  ;;  %v3426_v21 = vunpack.i.h.bf16 %v3424_v11  ;;  %v3425_v43 = vunpack.i.l.bf16 %v3424_v11  ;;  %v3419_v22 = vpop.permute.xlu0 %3418  ;;  %v2923_v23 = vpack.c.bf16 %v199_v62, %v198_v3  ;;  %v3957_v62 = vld [vmem:[%s5606_s5] ss:$12 sps:$4 sm:$0xff]  }
  0xa4   :  { %v3421_v39 = vunpack.i.h.bf16 %v3419_v22  ;;  %v3420_v25 = vunpack.i.l.bf16 %v3419_v22 }
  0xa5   :  { %v635_v26 = vsel %vm5614_vm12, %v3425_v43, %v3426_v21  ;;  %v647_v28 = vsel %vm5614_vm12, 0.0, %v3425_v43  ;;  %2924 = vmatprep.subr.msk.bf16.mxu0 %vm4434_vm15, %v2923_v23 }
  0xa6   :  { %v634_v29 = vsel %vm5614_vm12, %v3420_v25, %v3421_v39  ;;  %v646_v34 = vsel %vm5614_vm12, 0.0, %v3420_v25  ;;  %2927 = vmatpush1.bf16.msk.msra.mxu0 %vm4438_vm0, %v2926_v17  ;;  %v3434_v46 = vpop.permute.xlu1 %3433  ;;  %vm490_vm12 = vmand %vm41_vm1, %vm4417_vm13 }
  0xa7   :  { %v3010_v48 = vpack.c.bf16 %v647_v28, %v646_v34  ;;  %v3436_v49 = vunpack.i.h.bf16 %v3434_v46  ;;  %v3435_v50 = vunpack.i.l.bf16 %v3434_v46  ;;  %v3429_v51 = vpop.permute.xlu0 %3428  ;;  %v3007_v52 = vpack.c.bf16 %v635_v26, %v634_v29 }
  0xa8   :  { %v3431_v53 = vunpack.i.h.bf16 %v3429_v51  ;;  %v3430_v31 = vunpack.i.l.bf16 %v3429_v51 }
  0xa9   :  { %v252_v57 = vsel %vm5613_vm4, %v3435_v50, %v3436_v49  ;;  %v264_v59 = vsel %vm5613_vm4, 0.0, %v3435_v50  ;;  %3008 = vmatprep.subr.msk.bf16.mxu1 %vm4434_vm15, %v3007_v52 }
  0xaa   :  { %v251_v60 = vsel %vm5613_vm4, %v3430_v31, %v3431_v53  ;;  %v263_v61 = vsel %vm5613_vm4, 0.0, %v3430_v31  ;;  %3011 = vmatpush1.bf16.msk.msra.mxu1 %vm4438_vm0, %v3010_v48  ;;  %v3444_v47 = vpop.permute.xlu1 %3443 }
  0xab   :  { %v2932_v63 = vpack.c.bf16 %v264_v59, %v263_v61  ;;  %v3446_v3 = vunpack.i.h.bf16 %v3444_v47  ;;  %v3445_v7 = vunpack.i.l.bf16 %v3444_v47  ;;  %v3439_v11 = vpop.permute.xlu0 %3438  ;;  %v2929_v17 = vpack.c.bf16 %v252_v57, %v251_v60 }
  0xac   :  { %v3441_v21 = vunpack.i.h.bf16 %v3439_v11  ;;  %v3440_v43 = vunpack.i.l.bf16 %v3439_v11 }
  0xad   :  { %v681_v22 = vsel %vm5613_vm4, %v3445_v7, %v3446_v3  ;;  %v693_v23 = vsel %vm5613_vm4, 0.0, %v3445_v7  ;;  %2930 = vmatprep.subr.msk.bf16.mxu0 %vm4324_vm7, %v2929_v17 }
  0xae   :  { %v680_v54 = vsel %vm5613_vm4, %v3440_v43, %v3441_v21  ;;  %v692_v39 = vsel %vm5613_vm4, 0.0, %v3440_v43  ;;  %2933 = vmatpush1.bf16.msk.msra.mxu0 %vm4477_vm6, %v2932_v63  ;;  %v3454_v25 = vpop.permute.xlu1 %3453 }
  0xaf   :  { %v3016_v26 = vpack.c.bf16 %v693_v23, %v692_v39  ;;  %v3456_v28 = vunpack.i.h.bf16 %v3454_v25  ;;  %v3455_v29 = vunpack.i.l.bf16 %v3454_v25  ;;  %v3449_v34 = vpop.permute.xlu0 %3448  ;;  %v3013_v46 = vpack.c.bf16 %v681_v22, %v680_v54 }
  0xb0   :  { %v3451_v48 = vunpack.i.h.bf16 %v3449_v34  ;;  %v3450_v49 = vunpack.i.l.bf16 %v3449_v34 }
  0xb1   :  { %v254_v50 = vsel %vm5613_vm4, %v3455_v29, %v3456_v28  ;;  %v266_v51 = vsel %vm5613_vm4, 0.0, %v3455_v29  ;;  %3014 = vmatprep.subr.msk.bf16.mxu1 %vm4324_vm7, %v3013_v46 }
  0xb2   :  { %v253_v52 = vsel %vm5613_vm4, %v3450_v49, %v3451_v48  ;;  %v265_v53 = vsel %vm5613_vm4, 0.0, %v3450_v49  ;;  %3017 = vmatpush1.bf16.msk.msra.mxu1 %vm4477_vm6, %v3016_v26  ;;  %v3464_v31 = vpop.permute.xlu1 %3463 }
  0xb3   :  { %v2938_v57 = vpack.c.bf16 %v266_v51, %v265_v53  ;;  %v3466_v59 = vunpack.i.h.bf16 %v3464_v31  ;;  %v3465_v60 = vunpack.i.l.bf16 %v3464_v31  ;;  %v3459_v61 = vpop.permute.xlu0 %3458  ;;  %v2935_v47 = vpack.c.bf16 %v254_v50, %v253_v52 }
  0xb4   :  { %v3461_v63 = vunpack.i.h.bf16 %v3459_v61  ;;  %v3460_v3 = vunpack.i.l.bf16 %v3459_v61 }
  0xb5   :  { %v683_v7 = vsel %vm5613_vm4, %v3465_v60, %v3466_v59  ;;  %v695_v11 = vsel %vm5613_vm4, 0.0, %v3465_v60  ;;  %2936 = vmatprep.subr.msk.bf16.mxu0 %vm4324_vm7, %v2935_v47 }
  0xb6   :  { %v682_v17 = vsel %vm5613_vm4, %v3460_v3, %v3461_v63  ;;  %v694_v21 = vsel %vm5613_vm4, 0.0, %v3460_v3  ;;  %2939 = vmatpush1.bf16.msk.msra.mxu0 %vm4477_vm6, %v2938_v57  ;;  %v3474_v43 = vpop.permute.xlu1 %3473  ;;  %vm472_vm4 = vcmask 908288  }
  0xb7   :  { %v3022_v22 = vpack.c.bf16 %v695_v11, %v694_v21  ;;  %v3469_v23 = vpop.permute.xlu0 %3468  ;;  %1033 = vmatprep.subr.bf16.mxu0 %v288_v32  ;;  %v3019_v54 = vpack.c.bf16 %v683_v7, %v682_v17  ;;  %v3476_v26 = vunpack.i.h.bf16 %v3474_v43  ;;  %v3475_v28 = vunpack.i.l.bf16 %v3474_v43 }
  0xb8   :  { %v3471_v39 = vunpack.i.h.bf16 %v3469_v23  ;;  %v3470_v25 = vunpack.i.l.bf16 %v3469_v23 }
  0xb9   :  { %3020 = vmatprep.subr.msk.bf16.mxu1 %vm4324_vm7, %v3019_v54  ;;  %v749_v2 = vsel %vm5611_vm5, %v3476_v26, 0.0  ;;  %v748_v8 = vsel %vm5611_vm5, %v3475_v28, 0.0 }
  0xba   :  { %v325_v29 = vsel %vm5611_vm5, %v3471_v39, 0.0  ;;  %v324_v34 = vsel %vm5611_vm5, %v3470_v25, 0.0  ;;  %1034 = vmatpush1.bf16.msra.mxu0 %v287_v33  ;;  %3023 = vmatpush1.bf16.msk.msra.mxu1 %vm4477_vm6, %v3022_v22  ;;  %v3484_v4 = vpop.permute.xlu1 %3483  ;;  %v3025_v14 = vpack.c.bf16 %v749_v2, %v748_v8 }
  0xbb   :  { %v3479_v9 = vpop.permute.xlu0 %3478  ;;  %1035 = vmatprep.subr.bf16.mxu0 %v290_v35  ;;  %1175 = vmatprep.subr.bf16.mxu1 %v713_v36  ;;  %v2941_v48 = vpack.c.bf16 %v325_v29, %v324_v34  ;;  %v3486_v49 = vunpack.i.h.bf16 %v3484_v4  ;;  %v3485_v50 = vunpack.i.l.bf16 %v3484_v4 }
  0xbc   :  { %v3481_v32 = vunpack.i.h.bf16 %v3479_v9  ;;  %v3480_v46 = vunpack.i.l.bf16 %v3479_v9 }
  0xbd   :  { %v736_v36 = vsel %vm5611_vm5, %v3485_v50, %v3475_v28 }
  0xbe   :  { %v312_v33 = vsel %vm5611_vm5, %v3480_v46, %v3470_v25  ;;  %v313_v51 = vsel %vm5611_vm5, %v3481_v32, %v3471_v39  ;;  %1036 = vmatpush1.bf16.msra.mxu0 %v289_v37  ;;  %1176 = vmatpush1.bf16.msra.mxu1 %v712_v38  ;;  %v3494_v1 = vpop.permute.xlu1 %3493  ;;  %v737_v37 = vsel %vm5611_vm5, %v3486_v49, %v3476_v26  ;;  %v5652_v25 = vmov 0 }
  0xbf   :  { %v3496_v13 = vunpack.i.h.bf16 %v3494_v1  ;;  %v3495_v15 = vunpack.i.l.bf16 %v3494_v1  ;;  %v3489_v35 = vpop.permute.xlu0 %3488  ;;  %2942 = vmatprep.subr.msk.bf16.mxu0 %vm4434_vm15, %v2941_v48  ;;  %1177 = vmatprep.subr.bf16.mxu1 %v715_v40  ;;  %v2944_v0 = vpack.c.bf16 %v313_v51, %v312_v33  ;;  %v3028_v61 = vpack.c.bf16 %v737_v37, %v736_v36 }
  0xc0   :  { %v3491_v5 = vunpack.i.h.bf16 %v3489_v35  ;;  %v3490_v12 = vunpack.i.l.bf16 %v3489_v35 }
  0xc1   :  { %v751_v38 = vsel %vm5611_vm5, %v3496_v13, 0.0  ;;  %v750_v55 = vsel %vm5611_vm5, %v3495_v15, 0.0 }
  0xc2   :  { %v327_v52 = vsel %vm5611_vm5, %v3491_v5, 0.0  ;;  %v326_v53 = vsel %vm5611_vm5, %v3490_v12, 0.0  ;;  %2945 = vmatpush1.bf16.msk.msra.mxu0 %vm4536_vm14, %v2944_v0  ;;  %1178 = vmatpush1.bf16.msra.mxu1 %v714_v41  ;;  %v3504_v18 = vpop.permute.xlu1 %3503  ;;  %v3031_v47 = vpack.c.bf16 %v751_v38, %v750_v55 }
  0xc3   :  { %v2947_v20 = vpack.c.bf16 %v327_v52, %v326_v53  ;;  %v3506_v40 = vunpack.i.h.bf16 %v3504_v18  ;;  %v3505_v31 = vunpack.i.l.bf16 %v3504_v18  ;;  %v3499_v57 = vpop.permute.xlu0 %3498  ;;  %3026 = vmatprep.subr.msk.bf16.mxu1 %vm4434_vm15, %v3025_v14 }
  0xc4   :  { %v3501_v59 = vunpack.i.h.bf16 %v3499_v57  ;;  %v3500_v60 = vunpack.i.l.bf16 %v3499_v57 }
  0xc5   :  { %v738_v63 = vsel %vm5611_vm5, %v3505_v31, %v3495_v15  ;;  %v739_v3 = vsel %vm5611_vm5, %v3506_v40, %v3496_v13  ;;  %2948 = vmatprep.subr.msk.bf16.mxu0 %vm4434_vm15, %v2947_v20 }
  0xc6   :  { %v314_v16 = vsel %vm5611_vm5, %v3500_v60, %v3490_v12  ;;  %v315_v19 = vsel %vm5611_vm5, %v3501_v59, %v3491_v5  ;;  %3029 = vmatpush1.bf16.msk.msra.mxu1 %vm4536_vm14, %v3028_v61  ;;  %v3514_v41 = vpop.permute.xlu1 %3513  ;;  %v3034_v7 = vpack.c.bf16 %v739_v3, %v738_v63  ;;  %vm4575_vm5 = vmpackc.low %vm4241_vm2, %vm4241_vm2  ;;  %vm5615_vm2 = vcmask 916480  }
  0xc7   :  { %v3516_v11 = vunpack.i.h.bf16 %v3514_v41  ;;  %v3515_v17 = vunpack.i.l.bf16 %v3514_v41  ;;  %v3509_v21 = vpop.permute.xlu0 %3508  ;;  %3032 = vmatprep.subr.msk.bf16.mxu1 %vm4434_vm15, %v3031_v47  ;;  %v2950_v43 = vpack.c.bf16 %v315_v19, %v314_v16  ;;  %v5653_v25 = vsel %vm4575_vm5, 4294967295, %v5652_v25 }
  0xc8   :  { %v3511_v22 = vunpack.i.h.bf16 %v3509_v21  ;;  %v3510_v23 = vunpack.i.l.bf16 %v3509_v21  ;;  %5654 = vst [vmem:[#allocation3_spill] sm:$0xff] %v5653_v25 }
  0xc9   :  { %v797_v54 = vsel %vm5612_vm11, %v3516_v11, 0.0  ;;  %v796_v39 = vsel %vm5612_vm11, %v3515_v17, 0.0  ;;  %2951 = vmatpush1.bf16.msk.msra.mxu0 %vm4536_vm14, %v2950_v43  ;;  %v5655_v43 = vmov 0 }
  0xca   :  { %v3037_v26 = vpack.c.bf16 %v797_v54, %v796_v39  ;;  %v378_v28 = vsel %vm5612_vm11, %v3511_v22, 0.0  ;;  %v377_v29 = vsel %vm5612_vm11, %v3510_v23, 0.0  ;;  %3035 = vmatpush1.bf16.msk.msra.mxu1 %vm4536_vm14, %v3034_v7  ;;  %v3524_v34 = vpop.permute.xlu1 %3523 }
  0xcb   :  { %v2953_v4 = vpack.c.bf16 %v378_v28, %v377_v29  ;;  %v3526_v9 = vunpack.i.h.bf16 %v3524_v34  ;;  %v3525_v32 = vunpack.i.l.bf16 %v3524_v34  ;;  %v3519_v46 = vpop.permute.xlu0 %3518 }
  0xcc   :  { %v3521_v48 = vunpack.i.h.bf16 %v3519_v46  ;;  %v3520_v45 = vunpack.i.l.bf16 %v3519_v46  ;;  %3038 = vmatprep.subr.msk.bf16.mxu1 %vm4575_vm5, %v3037_v26 }
  0xcd   :  { %v784_v49 = vsel %vm5612_vm11, %v3525_v32, %v3515_v17  ;;  %v785_v50 = vsel %vm5612_vm11, %v3526_v9, %v3516_v11  ;;  %2954 = vmatprep.subr.msk.bf16.mxu0 %vm4575_vm5, %v2953_v4 }
  0xce   :  { %v365_v2 = vsel %vm5612_vm11, %v3520_v45, %v3510_v23  ;;  %v366_v8 = vsel %vm5612_vm11, %v3521_v48, %v3511_v22  ;;  %v3534_v33 = vpop.permute.xlu1 %3533  ;;  %v3040_v51 = vpack.c.bf16 %v785_v50, %v784_v49 }
  0xcf   :  { %v3536_v1 = vunpack.i.h.bf16 %v3534_v33  ;;  %v3535_v13 = vunpack.i.l.bf16 %v3534_v33  ;;  %v3529_v15 = vpop.permute.xlu0 %3528  ;;  %v2956_v35 = vpack.c.bf16 %v366_v8, %v365_v2 }
  0xd0   :  { %v3531_v0 = vunpack.i.h.bf16 %v3529_v15  ;;  %v3530_v5 = vunpack.i.l.bf16 %v3529_v15  ;;  %3041 = vmatpush1.bf16.msk.msra.mxu1 %vm4477_vm6, %v3040_v51 }
  0xd1   :  { %v799_v12 = vsel %vm5612_vm11, %v3536_v1, 0.0  ;;  %v798_v14 = vsel %vm5612_vm11, %v3535_v13, 0.0  ;;  %2957 = vmatpush1.bf16.msk.msra.mxu0 %vm4477_vm6, %v2956_v35 }
  0xd2   :  { %v3043_v36 = vpack.c.bf16 %v799_v12, %v798_v14  ;;  %v380_v37 = vsel %vm5612_vm11, %v3531_v0, 0.0  ;;  %v379_v38 = vsel %vm5612_vm11, %v3530_v5, 0.0  ;;  %v3544_v55 = vpop.permute.xlu1 %3543 }
  0xd3   :  { %v2959_v52 = vpack.c.bf16 %v380_v37, %v379_v38  ;;  %v3546_v53 = vunpack.i.h.bf16 %v3544_v55  ;;  %v3545_v18 = vunpack.i.l.bf16 %v3544_v55  ;;  %v3539_v20 = vpop.permute.xlu0 %3538 }
  0xd4   :  { %v3541_v40 = vunpack.i.h.bf16 %v3539_v20  ;;  %v3540_v31 = vunpack.i.l.bf16 %v3539_v20  ;;  %3044 = vmatprep.subr.msk.bf16.mxu1 %vm4575_vm5, %v3043_v36 }
  0xd5   :  { %v786_v57 = vsel %vm5612_vm11, %v3545_v18, %v3535_v13  ;;  %v787_v59 = vsel %vm5612_vm11, %v3546_v53, %v3536_v1  ;;  %2960 = vmatprep.subr.msk.bf16.mxu0 %vm4575_vm5, %v2959_v52 }
  0xd6   :  { %v367_v60 = vsel %vm5612_vm11, %v3540_v31, %v3530_v5  ;;  %v368_v61 = vsel %vm5612_vm11, %v3541_v40, %v3531_v0  ;;  %v3554_v47 = vpop.permute.xlu1 %3553  ;;  %v3046_v63 = vpack.c.bf16 %v787_v59, %v786_v57  ;;  %vm4616_vm11 = vmpackc.low %vm41_vm1, %vm41_vm1  ;;  %vm5625_vm1 = vcmask 261120  }
  0xd7   :  { %v3556_v3 = vunpack.i.h.bf16 %v3554_v47  ;;  %v3555_v16 = vunpack.i.l.bf16 %v3554_v47  ;;  %v3549_v19 = vpop.permute.xlu0 %3548  ;;  %v2962_v41 = vpack.c.bf16 %v368_v61, %v367_v60  ;;  %v5656_v43 = vsel %vm4616_vm11, 4294967295, %v5655_v43 }
  0xd8   :  { %v3551_v7 = vunpack.i.h.bf16 %v3549_v19  ;;  %v3550_v11 = vunpack.i.l.bf16 %v3549_v19  ;;  %3047 = vmatpush1.bf16.msk.msra.mxu1 %vm4477_vm6, %v3046_v63  ;;  %5657 = vst [vmem:[#allocation4_spill] sm:$0xff] %v5656_v43 }
  0xd9   :  { %v845_v17 = vsel %vm5615_vm2, %v3556_v3, 0.0  ;;  %v844_v21 = vsel %vm5615_vm2, %v3555_v16, 0.0  ;;  %2963 = vmatpush1.bf16.msk.msra.mxu0 %vm4477_vm6, %v2962_v41 }
  0xda   :  { %v3049_v22 = vpack.c.bf16 %v845_v17, %v844_v21  ;;  %v433_v23 = vsel %vm5615_vm2, %v3551_v7, 0.0  ;;  %v432_v54 = vsel %vm5615_vm2, %v3550_v11, 0.0  ;;  %v3564_v39 = vpop.permute.xlu1 %3563 }
  0xdb   :  { %v2965_v26 = vpack.c.bf16 %v433_v23, %v432_v54  ;;  %v3566_v28 = vunpack.i.h.bf16 %v3564_v39  ;;  %v3565_v29 = vunpack.i.l.bf16 %v3564_v39  ;;  %v3559_v34 = vpop.permute.xlu0 %3558 }
  0xdc   :  { %v3561_v4 = vunpack.i.h.bf16 %v3559_v34  ;;  %v3560_v9 = vunpack.i.l.bf16 %v3559_v34  ;;  %3050 = vmatprep.subr.msk.bf16.mxu1 %vm4616_vm11, %v3049_v22 }
  0xdd   :  { %2966 = vmatprep.subr.msk.bf16.mxu0 %vm4616_vm11, %v2965_v26  ;;  %v832_v32 = vsel %vm5615_vm2, %v3565_v29, %v3555_v16  ;;  %v833_v46 = vsel %vm5615_vm2, %v3566_v28, %v3556_v3  ;;  %v3949_v3 = vld [vmem:[%s5602_s1] ss:$12 sps:$4 sm:$0xff]  }
  0xde   :  { %v3574_v48 = vpop.permute.xlu1 %3573  ;;  %v420_v45 = vsel %vm5615_vm2, %v3560_v9, %v3550_v11  ;;  %v421_v49 = vsel %vm5615_vm2, %v3561_v4, %v3551_v7  ;;  %v856_v50 = vpack.c.bf16 %v833_v46, %v832_v32 }
  0xdf   :  { %v3576_v2 = vunpack.i.h.bf16 %v3574_v48  ;;  %v3575_v8 = vunpack.i.l.bf16 %v3574_v48  ;;  %v3569_v33 = vpop.permute.xlu0 %3568  ;;  %v448_v51 = vpack.c.bf16 %v421_v49, %v420_v45 }
  0xe0   :  { %v3571_v1 = vunpack.i.h.bf16 %v3569_v33  ;;  %v3570_v13 = vunpack.i.l.bf16 %v3569_v33  ;;  %1188 = vmatpush1.bf16.msra.mxu1 %v856_v50 }
  0xe1   :  { %v847_v15 = vsel %vm5615_vm2, %v3576_v2, 0.0  ;;  %v846_v35 = vsel %vm5615_vm2, %v3575_v8, 0.0  ;;  %1046 = vmatpush1.bf16.msra.mxu0 %v448_v51 }
  0xe2   :  { %v3052_v0 = vpack.c.bf16 %v847_v15, %v846_v35  ;;  %v435_v5 = vsel %vm5615_vm2, %v3571_v1, 0.0  ;;  %v434_v12 = vsel %vm5615_vm2, %v3570_v13, 0.0  ;;  %v3584_v14 = vpop.permute.xlu1 %3583 }
  0xe3   :  { %v2968_v36 = vpack.c.bf16 %v435_v5, %v434_v12  ;;  %v3586_v37 = vunpack.i.h.bf16 %v3584_v14  ;;  %v3585_v38 = vunpack.i.l.bf16 %v3584_v14  ;;  %v3579_v55 = vpop.permute.xlu0 %3578 }
  0xe4   :  { %v3581_v52 = vunpack.i.h.bf16 %v3579_v55  ;;  %v3580_v53 = vunpack.i.l.bf16 %v3579_v55  ;;  %3053 = vmatprep.subr.msk.bf16.mxu1 %vm4616_vm11, %v3052_v0 }
  0xe5   :  { %2969 = vmatprep.subr.msk.bf16.mxu0 %vm4616_vm11, %v2968_v36  ;;  %v834_v18 = vsel %vm5615_vm2, %v3585_v38, %v3575_v8  ;;  %v835_v20 = vsel %vm5615_vm2, %v3586_v37, %v3576_v2  ;;  %v3954_v8 = vld [vmem:[%s5602_s1 + $0x18] ss:$12 sps:$4 sm:$0xff]  }
  0xe6   :  { %v3594_v40 = vpop.permute.xlu1 %3593  ;;  %v422_v31 = vsel %vm5615_vm2, %v3580_v53, %v3570_v13  ;;  %v423_v57 = vsel %vm5615_vm2, %v3581_v52, %v3571_v1  ;;  %v858_v59 = vpack.c.bf16 %v835_v20, %v834_v18  ;;  %vm4651_vm2 = vmpackc.low %vm490_vm12, %vm490_vm12  ;;  %vm5662_vm12 = vcmask 121856  }
  0xe7   :  { %v3596_v60 = vunpack.i.h.bf16 %v3594_v40  ;;  %v3595_v61 = vunpack.i.l.bf16 %v3594_v40  ;;  %v3589_v47 = vpop.permute.xlu0 %3588  ;;  %v450_v63 = vpack.c.bf16 %v423_v57, %v422_v31  ;;  %v5659_v27 = vsel %vm4651_vm2, 4294967295, %v5658_v27  ;;  %v3955_v57 = vld [vmem:[%s5602_s1 + $0x8] ss:$12 sps:$4 sm:$0xff]   ;;  %vm5663_vm13 = vmmov %vm5662_vm12 }
  0xe8   :  { %v3591_v16 = vunpack.i.h.bf16 %v3589_v47  ;;  %v3590_v19 = vunpack.i.l.bf16 %v3589_v47  ;;  %1190 = vmatpush1.bf16.msra.mxu1 %v858_v59  ;;  %5660 = vst [vmem:[#allocation5_spill] sm:$0xff] %v5659_v27  ;;  %v3956_v59 = vld [vmem:[%s5602_s1 + $0x20] ss:$12 sps:$4 sm:$0xff]  }
  0xe9   :  { %v893_v41 = vsel %vm472_vm4, %v3596_v60, 0.0  ;;  %v892_v7 = vsel %vm472_vm4, %v3595_v61, 0.0  ;;  %1048 = vmatpush1.bf16.msra.mxu0 %v450_v63 }
  0xea   :  { %v3055_v11 = vpack.c.bf16 %v893_v41, %v892_v7  ;;  %v486_v17 = vsel %vm472_vm4, %v3591_v16, 0.0  ;;  %v485_v21 = vsel %vm472_vm4, %v3590_v19, 0.0  ;;  %v3604_v22 = vpop.permute.xlu1 %3603 }
  0xeb   :  { %v2971_v23 = vpack.c.bf16 %v486_v17, %v485_v21  ;;  %v3606_v54 = vunpack.i.h.bf16 %v3604_v22  ;;  %v3605_v39 = vunpack.i.l.bf16 %v3604_v22  ;;  %v3599_v26 = vpop.permute.xlu0 %3598  ;;  %1192 = vmatmul.mubr.bf16.vlgmr.msra.gmra.mrb[0].mxu1 %v3949_v3 }
  0xec   :  { %v3601_v28 = vunpack.i.h.bf16 %v3599_v26  ;;  %v3600_v29 = vunpack.i.l.bf16 %v3599_v26  ;;  %1050 = vmatmul.mubr.bf16.vlgmr.msra.gmra.mrb[0].mxu0 %v3949_v3  ;;  %3056 = vmatprep.subr.msk.bf16.mxu1 %vm4651_vm2, %v3055_v11 }
  0xed   :  { %v880_v34 = vsel %vm472_vm4, %v3605_v39, %v3595_v61  ;;  %v881_v4 = vsel %vm472_vm4, %v3606_v54, %v3596_v60  ;;  %2972 = vmatprep.subr.msk.bf16.mxu0 %vm4651_vm2, %v2971_v23  ;;  %1059 = vmatprep.mubr.bf16.mxu0 %v3952_v42 }
  0xee   :  { %v3058_v9 = vpack.c.bf16 %v881_v4, %v880_v34  ;;  %v473_v32 = vsel %vm472_vm4, %v3600_v29, %v3590_v19  ;;  %v474_v46 = vsel %vm472_vm4, %v3601_v28, %v3591_v16  ;;  %v3614_v48 = vpop.permute.xlu1 %3613  ;;  %1201 = vmatprep.mubr.bf16.mxu1 %v3952_v42 }
  0xef   :  { %v2974_v45 = vpack.c.bf16 %v474_v46, %v473_v32  ;;  %v3616_v49 = vunpack.i.h.bf16 %v3614_v48  ;;  %v3615_v50 = vunpack.i.l.bf16 %v3614_v48  ;;  %v3609_v2 = vpop.permute.xlu0 %3608 }
  0xf0   :  { %v3611_v33 = vunpack.i.h.bf16 %v3609_v2  ;;  %v3610_v51 = vunpack.i.l.bf16 %v3609_v2  ;;  %3059 = vmatpush1.bf16.msk.msra.mxu1 %vm4536_vm14, %v3058_v9 }
  0xf1   :  { %v895_v1 = vsel %vm472_vm4, %v3616_v49, 0.0  ;;  %v894_v13 = vsel %vm472_vm4, %v3615_v50, 0.0  ;;  %2975 = vmatpush1.bf16.msk.msra.mxu0 %vm4536_vm14, %v2974_v45 }
  0xf2   :  { %v3061_v15 = vpack.c.bf16 %v895_v1, %v894_v13  ;;  %v488_v35 = vsel %vm472_vm4, %v3611_v33, 0.0  ;;  %v487_v0 = vsel %vm472_vm4, %v3610_v51, 0.0  ;;  %v3624_v5 = vpop.permute.xlu1 %3623 }
  0xf3   :  { %v2977_v12 = vpack.c.bf16 %v488_v35, %v487_v0  ;;  %v3626_v14 = vunpack.i.h.bf16 %v3624_v5  ;;  %v3625_v36 = vunpack.i.l.bf16 %v3624_v5  ;;  %v3619_v37 = vpop.permute.xlu0 %3618  ;;  %1202 = vmatmul.mubr.bf16.gmra.mrb[4].mxu1 %v3954_v8 }
  0xf4   :  { %v3621_v38 = vunpack.i.h.bf16 %v3619_v37  ;;  %v3620_v55 = vunpack.i.l.bf16 %v3619_v37  ;;  %1060 = vmatmul.mubr.bf16.gmra.mrb[4].mxu0 %v3954_v8  ;;  %3062 = vmatprep.subr.msk.bf16.mxu1 %vm4651_vm2, %v3061_v15 }
  0xf5   :  { %v882_v52 = vsel %vm472_vm4, %v3625_v36, %v3615_v50  ;;  %v883_v53 = vsel %vm472_vm4, %v3626_v14, %v3616_v49  ;;  %2978 = vmatprep.subr.msk.bf16.mxu0 %vm4651_vm2, %v2977_v12  ;;  %1102 = vmatprep.mubr.bf16.mxu0 %v5616_v56 }
  0xf6   :  { %v3064_v18 = vpack.c.bf16 %v883_v53, %v882_v52  ;;  %v475_v20 = vsel %vm472_vm4, %v3620_v55, %v3610_v51  ;;  %v476_v40 = vsel %vm472_vm4, %v3621_v38, %v3611_v33  ;;  %1244 = vmatprep.mubr.bf16.mxu1 %v5616_v56 }
  0xf7   :  { %v2980_v31 = vpack.c.bf16 %v476_v40, %v475_v20 }
  0xf8   :  { %3065 = vmatpush1.bf16.msk.msra.mxu1 %vm4536_vm14, %v3064_v18 }
  0xf9   :  { %2981 = vmatpush1.bf16.msk.msra.mxu0 %vm4536_vm14, %v2980_v31 }
  0xfb   :  { %2878 = vmatmul.mubr.msk.bf16.vlgmr.msra.gmra.mrb[0].mxu1 %vm5625_vm1, %v3955_v57 }
  0xfc   :  { %2876 = vmatmul.mubr.msk.bf16.vlgmr.msra.gmra.mrb[0].mxu0 %vm5625_vm1, %v3955_v57  ;;  %1254 = vmatprep.mubr.bf16.mxu1 %v5616_v56 }
  0xfd   :  { %1112 = vmatprep.mubr.bf16.mxu0 %v5616_v56 }
 0x103   :  { %2879 = vmatmul.mubr.msk.bf16.gmra.mrb[4].mxu1 %vm5625_vm1, %v3956_v59  ;;  %v968_v47 = vpop.permute.xlu1 %967 }
 0x104   :  { %2877 = vmatmul.mubr.msk.bf16.gmra.mrb[4].mxu0 %vm5625_vm1, %v3956_v59  ;;  %v963_v60 = vpop.permute.xlu0 %962  ;;  %vm5665_vm1 = vmmov %vm5662_vm12 }
 0x107   :  { %v973_v4 = vpop.permute.xlu1 %972 }
 0x108   :  { %v978_v34 = vpop.permute.xlu0 %977 }
 0x1ce   :  { %v1246_v61 = vpop.f32.mrb[0].mxu1 }
 0x1cf   :  { %v1104_v63 = vpop.f32.mrb[0].mxu0  ;;  %v3242_v3 = vadd.f32 %v1246_v61, %v963_v60  ;;  %v1248_v16 = vpop.f32.mrb[1].mxu1 }
 0x1d0   :  { %v3234_v19 = vadd.f32 %v1104_v63, %v963_v60  ;;  %v1106_v41 = vpop.f32.mrb[1].mxu0  ;;  %v3243_v7 = vadd.f32 %v1248_v16, %v963_v60  ;;  %v1250_v42 = vpop.f32.mrb[2].mxu1 }
 0x1d1   :  { %v3235_v11 = vadd.f32 %v1106_v41, %v963_v60  ;;  %v1108_v17 = vpop.f32.mrb[2].mxu0  ;;  %v1252_v21 = vpop.f32.mrb[3].mxu1  ;;  %v3244_v39 = vadd.f32 %v1250_v42, %v968_v47 }
 0x1d2   :  { %v3236_v22 = vadd.f32 %v1108_v17, %v968_v47  ;;  %v1110_v23 = vpop.f32.mrb[3].mxu0  ;;  %v1281_v54 = vadd.f32 %v3243_v7, %v3242_v3  ;;  %v3245_v28 = vadd.f32 %v1252_v21, %v968_v47 }
 0x1d3   :  { %v3237_v26 = vadd.f32 %v1110_v23, %v968_v47  ;;  %v1265_v29 = vadd.f32 %v3235_v11, %v3234_v19 }
 0x1d4   :  { %1282 = vadd.xlane.f32.xlu0 %v1281_v54  ;;  %v1284_v45 = vadd.f32 %v3245_v28, %v3244_v39 }
 0x1d5   :  { %1266 = vadd.xlane.f32.xlu1 %v1265_v29  ;;  %v1268_v32 = vadd.f32 %v3237_v26, %v3236_v22 }
 0x1d6   :  { %v1256_v9 = vpop.f32.mrb[4].mxu1 }
 0x1d7   :  { %v1114_v46 = vpop.f32.mrb[4].mxu0  ;;  %v1258_v48 = vpop.f32.mrb[5].mxu1  ;;  %v3246_v15 = vadd.f32 %v1256_v9, %v973_v4 }
 0x1d8   :  { %v3238_v49 = vadd.f32 %v1114_v46, %v973_v4  ;;  %v1116_v50 = vpop.f32.mrb[5].mxu0  ;;  %v1260_v2 = vpop.f32.mrb[6].mxu1  ;;  %1269 = vadd.xlane.f32.xlu0 %v1268_v32  ;;  %v3247_v35 = vadd.f32 %v1258_v48, %v973_v4 }
 0x1d9   :  { %v3239_v8 = vadd.f32 %v1116_v50, %v973_v4  ;;  %v1118_v33 = vpop.f32.mrb[6].mxu0  ;;  %1285 = vadd.xlane.f32.xlu1 %v1284_v45  ;;  %v1262_v51 = vpop.f32.mrb[7].mxu1  ;;  %v3248_v12 = vadd.f32 %v1260_v2, %v978_v34 }
 0x1da   :  { %v3240_v1 = vadd.f32 %v1118_v33, %v978_v34  ;;  %v1120_v13 = vpop.f32.mrb[7].mxu0  ;;  %v3249_v14 = vadd.f32 %v1262_v51, %v978_v34  ;;  %v1287_v37 = vadd.f32 %v3247_v35, %v3246_v15 }
 0x1db   :  { %v3241_v0 = vadd.f32 %v1120_v13, %v978_v34  ;;  %v1271_v5 = vadd.f32 %v3239_v8, %v3238_v49 }
 0x1dc   :  { %v1290_v38 = vadd.f32 %v3249_v14, %v3248_v12 }
 0x1dd   :  { %1272 = vadd.xlane.f32.xlu0 %v1271_v5  ;;  %v1274_v36 = vadd.f32 %v3241_v0, %v3240_v1 }
 0x1df   :  { %1275 = vadd.xlane.f32.xlu1 %v1274_v36 }
 0x1e1   :  { %1288 = vadd.xlane.f32.xlu0 %v1287_v37 }
 0x1e3   :  { %1291 = vadd.xlane.f32.xlu1 %v1290_v38 }
 0x261   :  { %v1283_v55 = vpop.xlane.xlu0 %1282 }
 0x262   :  { %v1267_v52 = vpop.xlane.xlu1 %1266 }
 0x263   :  { %v1293_v53 = vadd.f32 %v1283_v55, %v1267_v52 }
 0x265   :  { %v1297_v18 = vmul.f32 0.001953125, %v1293_v53  ;;  %v1270_v20 = vpop.xlane.xlu0 %1269 }
 0x266   :  { %v1286_v40 = vpop.xlane.xlu1 %1285 }
 0x267   :  { %v1294_v31 = vadd.f32 %v1286_v40, %v1270_v20  ;;  %v4705_v57 = vsub.f32 %v3234_v19, %v1297_v18  ;;  %v4707_v59 = vsub.f32 %v3235_v11, %v1297_v18  ;;  %v4709_v60 = vsub.f32 %v3242_v3, %v1297_v18  ;;  %v1414_v20 = vld [vmem:[%s5604_s4 + $0x8] sm:$0xff] }
 0x268   :  { %v4711_v61 = vsub.f32 %v3243_v7, %v1297_v18  ;;  %v1413_v18 = vld [vmem:[%s5604_s4] sm:$0xff] }
 0x269   :  { %v1298_v47 = vmul.f32 0.001953125, %v1294_v31  ;;  %v1317_v63 = vmul.f32 %v4705_v57, %v4705_v57  ;;  %v1318_v16 = vmul.f32 %v4707_v59, %v4707_v59  ;;  %v1341_v42 = vmul.f32 %v4709_v60, %v4709_v60 }
 0x26a   :  { %v1273_v41 = vpop.xlane.xlu0 %1272  ;;  %v1342_v19 = vmul.f32 %v4711_v61, %v4711_v61 }
 0x26b   :  { %v1325_v11 = vadd.f32 %v1318_v16, %v1317_v63  ;;  %v4721_v17 = vsub.f32 %v3236_v22, %v1298_v47  ;;  %v4723_v3 = vsub.f32 %v3237_v26, %v1298_v47  ;;  %v4725_v7 = vsub.f32 %v3244_v39, %v1298_v47 }
 0x26c   :  { %v1276_v21 = vpop.xlane.xlu1 %1275  ;;  %v4727_v23 = vsub.f32 %v3245_v28, %v1298_v47  ;;  %v1349_v39 = vadd.f32 %v1342_v19, %v1341_v42 }
 0x26d   :  { %1326 = vadd.xlane.f32.xlu0 %v1325_v11  ;;  %v1319_v54 = vmul.f32 %v4721_v17, %v4721_v17  ;;  %v1320_v29 = vmul.f32 %v4723_v3, %v4723_v3  ;;  %v1343_v4 = vmul.f32 %v4725_v7, %v4725_v7 }
 0x26e   :  { %v1289_v34 = vpop.xlane.xlu0 %1288  ;;  %v1344_v22 = vmul.f32 %v4727_v23, %v4727_v23 }
 0x26f   :  { %v1295_v26 = vadd.f32 %v1289_v34, %v1273_v41  ;;  %v1328_v9 = vadd.f32 %v1320_v29, %v1319_v54 }
 0x270   :  { %v1292_v32 = vpop.xlane.xlu1 %1291  ;;  %v1352_v48 = vadd.f32 %v1344_v22, %v1343_v4 }
 0x271   :  { %v1299_v28 = vmul.f32 0.001953125, %v1295_v26  ;;  %v1296_v46 = vadd.f32 %v1292_v32, %v1276_v21  ;;  %1350 = vadd.xlane.f32.xlu0 %v1349_v39  ;;  %1329 = vadd.xlane.f32.xlu1 %v1328_v9  ;;  %v1369_v9 = vld [vmem:[%s5605_s3] sm:$0xff] }
 0x273   :  { %v1300_v45 = vmul.f32 0.001953125, %v1296_v46  ;;  %v4737_v50 = vsub.f32 %v3238_v49, %v1299_v28  ;;  %v4739_v2 = vsub.f32 %v3239_v8, %v1299_v28  ;;  %v4741_v33 = vsub.f32 %v3246_v15, %v1299_v28 }
 0x274   :  { %v4743_v51 = vsub.f32 %v3247_v35, %v1299_v28 }
 0x275   :  { %1353 = vadd.xlane.f32.xlu1 %v1352_v48  ;;  %v1321_v13 = vmul.f32 %v4737_v50, %v4737_v50  ;;  %v1322_v5 = vmul.f32 %v4739_v2, %v4739_v2  ;;  %v4749_v36 = vsub.f32 %v3240_v1, %v1300_v45  ;;  %v4751_v37 = vsub.f32 %v3241_v0, %v1300_v45 }
 0x276   :  { %v1345_v49 = vmul.f32 %v4741_v33, %v4741_v33  ;;  %v4755_v8 = vsub.f32 %v3248_v12, %v1300_v45  ;;  %v4757_v15 = vsub.f32 %v3249_v14, %v1300_v45  ;;  %v1346_v1 = vmul.f32 %v4743_v51, %v4743_v51 }
 0x277   :  { %v1331_v35 = vadd.f32 %v1322_v5, %v1321_v13  ;;  %v1323_v38 = vmul.f32 %v4749_v36, %v4749_v36  ;;  %v1324_v55 = vmul.f32 %v4751_v37, %v4751_v37  ;;  %v1370_v13 = vld [vmem:[%s5605_s3 + $0x8] sm:$0xff] }
 0x278   :  { %v1347_v52 = vmul.f32 %v4755_v8, %v4755_v8  ;;  %v1348_v12 = vmul.f32 %v4757_v15, %v4757_v15  ;;  %v1355_v14 = vadd.f32 %v1346_v1, %v1345_v49 }
 0x279   :  { %1332 = vadd.xlane.f32.xlu0 %v1331_v35  ;;  %v1334_v0 = vadd.f32 %v1324_v55, %v1323_v38  ;;  %v1371_v35 = vld [vmem:[%s5605_s3 + $0x10] sm:$0xff]  ;;  %v1372_v55 = vld [vmem:[%s5605_s3 + $0x18] sm:$0xff] }
 0x27a   :  { %v1358_v53 = vadd.f32 %v1348_v12, %v1347_v52  ;;  %v1415_v12 = vld [vmem:[%s5604_s4 + $0x10] sm:$0xff] }
 0x27b   :  { %1335 = vadd.xlane.f32.xlu1 %v1334_v0 }
 0x27d   :  { %1356 = vadd.xlane.f32.xlu0 %v1355_v14  ;;  %v1416_v14 = vld [vmem:[%s5604_s4 + $0x18] sm:$0xff] }
 0x27f   :  { %1359 = vadd.xlane.f32.xlu1 %v1358_v53 }
 0x290   :  { %1419 = vperm.xlu1 %3628, %v1413_v18  }
 0x293   :  { %1424 = vperm.xlu0 %3627, %v1414_v20  }
 0x2fa   :  { %v1327_v40 = vpop.xlane.xlu0 %1326 }
 0x2fe   :  { %v1351_v31 = vpop.xlane.xlu0 %1350  ;;  %v1330_v47 = vpop.xlane.xlu1 %1329 }
 0x2ff   :  { %v1361_v63 = vadd.f32 %v1351_v31, %v1327_v40 }
 0x301   :  { %v1365_v16 = vmul.f32 0.001953125, %v1361_v63 }
 0x302   :  { %v1354_v41 = vpop.xlane.xlu1 %1353 }
 0x303   :  { %v1373_v42 = vadd.f32 1e-05, %v1365_v16  ;;  %v1362_v19 = vadd.f32 %v1354_v41, %v1330_v47 }
 0x305   :  { %3965 = vrsqrt.f32 %v1373_v42  ;;  %v1366_v11 = vmul.f32 0.001953125, %v1362_v19 }
 0x306   :  { %v1333_v21 = vpop.xlane.xlu0 %1332 }
 0x307   :  { %v1374_v54 = vadd.f32 1e-05, %v1366_v11 }
 0x308   :  { %v1336_v29 = vpop.xlane.xlu1 %1335 }
 0x309   :  { %3967 = vrsqrt.f32 %v1374_v54 }
 0x30a   :  { %v1357_v34 = vpop.xlane.xlu0 %1356 }
 0x30b   :  { %v1363_v4 = vadd.f32 %v1357_v34, %v1333_v21 }
 0x30c   :  { %v1360_v22 = vpop.xlane.xlu1 %1359 }
 0x30d   :  { %v1367_v26 = vmul.f32 0.001953125, %v1363_v4  ;;  %v1364_v39 = vadd.f32 %v1360_v22, %v1336_v29 }
 0x30f   :  { %v3966_v32 = vpop.eup %3965  ;;  %v1375_v28 = vadd.f32 1e-05, %v1367_v26  ;;  %v1368_v46 = vmul.f32 0.001953125, %v1364_v39 }
 0x310   :  { %v1381_v48 = vmul.f32 %v3966_v32, %v1369_v9  ;;  %v1420_v18 = vpop.permute.xlu1 %1419 }
 0x311   :  { %3969 = vrsqrt.f32 %v1375_v28  ;;  %v1376_v45 = vadd.f32 1e-05, %v1368_v46 }
 0x312   :  { %1387 = vperm.xlu0 %3627, %v1381_v48   ;;  %v1425_v53 = vpop.permute.xlu0 %1424 }
 0x313   :  { %v3968_v5 = vpop.eup %3967  ;;  %3971 = vrsqrt.f32 %v1376_v45 }
 0x314   :  { %v1382_v49 = vmul.f32 %v3968_v5, %v1370_v13 }
 0x316   :  { %1392 = vperm.xlu1 %3628, %v1382_v49  }
 0x31b   :  { %v3970_v38 = vpop.eup %3969 }
 0x31c   :  { %v1383_v1 = vmul.f32 %v3970_v38, %v1371_v35 }
 0x31d   :  { %v3972_v0 = vpop.eup %3971 }
 0x31e   :  { %1397 = vperm.xlu1 %3628, %v1383_v1   ;;  %v1384_v52 = vmul.f32 %v3972_v0, %v1372_v55 }
 0x320   :  { %1402 = vperm.xlu0 %3627, %v1384_v52  }
 0x322   :  { %1429 = vperm.xlu1 %3628, %v1415_v12  }
 0x324   :  { %1434 = vperm.xlu0 %3627, %v1416_v14  }
 0x391   :  { %v1388_v20 = vpop.permute.xlu0 %1387 }
 0x392   :  { %v1405_v40 = vmul.f32 %v1388_v20, %v4705_v57  ;;  %v1406_v31 = vmul.f32 %v1388_v20, %v4707_v59  ;;  %v1453_v47 = vmul.f32 %v1388_v20, %v4709_v60  ;;  %v1454_v63 = vmul.f32 %v1388_v20, %v4711_v61 }
 0x394   :  { %v1437_v16 = vadd.f32 %v1420_v18, %v1405_v40  ;;  %v1438_v41 = vadd.f32 %v1420_v18, %v1406_v31  ;;  %v1461_v42 = vadd.f32 %v1453_v47, %v1420_v18  ;;  %v1462_v19 = vadd.f32 %v1454_v63, %v1420_v18 }
 0x395   :  { %v1393_v11 = vpop.permute.xlu1 %1392 }
 0x396   :  { %v4797_v21 = vmax.f32 %v1437_v16, 0.0  ;;  %v4799_v54 = vmax.f32 %v1438_v41, 0.0  ;;  %v1407_v29 = vmul.f32 %v1393_v11, %v4721_v17  ;;  %v1408_v34 = vmul.f32 %v1393_v11, %v4723_v3 }
 0x397   :  { %v1455_v57 = vmul.f32 %v1393_v11, %v4725_v7  ;;  %v1456_v59 = vmul.f32 %v1393_v11, %v4727_v23  ;;  %v4805_v60 = vmax.f32 %v1461_v42, 0.0  ;;  %v4807_v61 = vmax.f32 %v1462_v19, 0.0 }
 0x398   :  { %v4811_v4 = vpack.i.bf16 %v4799_v54, %v4797_v21  ;;  %v1439_v22 = vadd.f32 %v1425_v53, %v1407_v29  ;;  %v1440_v26 = vadd.f32 %v1425_v53, %v1408_v34 }
 0x399   :  { %v1463_v39 = vadd.f32 %v1455_v57, %v1425_v53  ;;  %v1464_v9 = vadd.f32 %v1456_v59, %v1425_v53  ;;  %v3634_v7 = vpack.i.bf16 %v4807_v61, %v4805_v60 }
 0x39a   :  { %3630 = vrot.lane.b32.xlu1 %v4811_v4, %s3981_s25  ;;  %v4815_v17 = vmax.f32 %v1439_v22, 0.0  ;;  %v4817_v3 = vmax.f32 %v1440_v26, 0.0 }
 0x39b   :  { %v4821_v23 = vmax.f32 %v1463_v39, 0.0  ;;  %v4823_v32 = vmax.f32 %v1464_v9, 0.0 }
 0x39c   :  { %v3669_v28 = vpack.i.bf16 %v4817_v3, %v4815_v17  ;;  %v4836_v13 = vpack.i.bf16 %v4815_v17, %v4797_v21 }
 0x39d   :  { %v1398_v48 = vpop.permute.xlu1 %1397  ;;  %v3674_v45 = vpack.i.bf16 %v4823_v32, %v4821_v23  ;;  %v4840_v5 = vpack.i.bf16 %v4821_v23, %v4805_v60 }
 0x39e   :  { %3635 = vrot.lane.b32.xlu1 %v3634_v7, %s3981_s25  ;;  %3670 = vrot.lane.b32.xlu0 %v3669_v28, %s3981_s25  ;;  %v1409_v0 = vmul.f32 %v1398_v48, %v4737_v50  ;;  %v1410_v52 = vmul.f32 %v1398_v48, %v4739_v2  ;;  %v1457_v12 = vmul.f32 %v1398_v48, %v4741_v33 }
 0x39f   :  { %v1403_v46 = vpop.permute.xlu0 %1402  ;;  %v1458_v14 = vmul.f32 %v1398_v48, %v4743_v51  ;;  %v4857_v50 = vpack.i.bf16 %v4817_v3, %v4799_v54  ;;  %v4861_v2 = vpack.i.bf16 %v4823_v32, %v4807_v61 }
 0x3a0   :  { %v1411_v35 = vmul.f32 %v1403_v46, %v4749_v36  ;;  %v1412_v38 = vmul.f32 %v1403_v46, %v4751_v37  ;;  %v1459_v55 = vmul.f32 %v1403_v46, %v4755_v8  ;;  %v1460_v1 = vmul.f32 %v1403_v46, %v4757_v15 }
 0x3a1   :  { %v1430_v53 = vpop.permute.xlu1 %1429 }
 0x3a2   :  { %3640 = vrot.lane.b32.xlu1 %v4811_v4, %s3982_s0  ;;  %3675 = vrot.lane.b32.xlu0 %v3674_v45, %s3981_s25  ;;  %v1441_v8 = vadd.f32 %v1430_v53, %v1409_v0  ;;  %v1442_v40 = vadd.f32 %v1430_v53, %v1410_v52  ;;  %v1465_v15 = vadd.f32 %v1457_v12, %v1430_v53 }
 0x3a3   :  { %v1435_v49 = vpop.permute.xlu0 %1434  ;;  %v1466_v31 = vadd.f32 %v1458_v14, %v1430_v53 }
 0x3a4   :  { %v1443_v36 = vadd.f32 %v1435_v49, %v1411_v35  ;;  %v1444_v18 = vadd.f32 %v1435_v49, %v1412_v38  ;;  %v1467_v37 = vadd.f32 %v1459_v55, %v1435_v49  ;;  %v1468_v20 = vadd.f32 %v1460_v1, %v1435_v49  ;;  %v3959_v35 = vld [vmem:[%s5606_s5 + $0x4] ss:$12 sps:$4 sm:$0xff]  }
 0x3a5   :  { %v4871_v16 = vmax.f32 %v1441_v8, 0.0  ;;  %v4873_v41 = vmax.f32 %v1442_v40, 0.0  ;;  %v4875_v42 = vmax.f32 %v1465_v15, 0.0  ;;  %v4877_v19 = vmax.f32 %v1466_v31, 0.0  ;;  %2413 = vmatprep.mubr.bf16.mxu0 %v3959_v35  ;;  %2555 = vmatprep.mubr.bf16.mxu1 %v3959_v35 }
 0x3a6   :  { %3645 = vrot.lane.b32.xlu1 %v3634_v7, %s3982_s0  ;;  %3680 = vrot.lane.b32.xlu0 %v3669_v28, %s3982_s0  ;;  %v4863_v33 = vmax.f32 %v1443_v36, 0.0  ;;  %v4865_v51 = vmax.f32 %v1444_v18, 0.0  ;;  %v4867_v47 = vmax.f32 %v1467_v37, 0.0  ;;  %v4869_v63 = vmax.f32 %v1468_v20, 0.0 }
 0x3a7   :  { %5661 = vst [vmem:[#allocation6_spill] sm:$0xff] %v4875_v42 }
 0x3a8   :  { %v4883_v11 = vpack.i.bf16 %v4865_v51, %v4873_v41  ;;  %v4887_v29 = vpack.i.bf16 %v4869_v63, %v4877_v19  ;;  %v4891_v34 = vpack.i.bf16 %v4863_v33, %v4871_v16  ;;  %v4895_v57 = vpack.i.bf16 %v4867_v47, %v4875_v42 }
 0x3aa   :  { %3650 = vrot.lane.b32.xlu1 %v4811_v4, %s3983_s21  ;;  %3685 = vrot.lane.b32.xlu0 %v3674_v45, %s3982_s0 }
 0x3ae   :  { %3655 = vrot.lane.b32.xlu1 %v3634_v7, %s3983_s21  ;;  %3690 = vrot.lane.b32.xlu0 %v3669_v28, %s3983_s21 }
 0x3b2   :  { %3660 = vrot.lane.b32.xlu1 %v4811_v4, %s3984_s22  ;;  %3695 = vrot.lane.b32.xlu0 %v3674_v45, %s3983_s21  ;;  %v3739_v4 = vpack.i.bf16 %v4873_v41, %v4871_v16 }
 0x3b6   :  { %3665 = vrot.lane.b32.xlu1 %v3634_v7, %s3984_s22  ;;  %3700 = vrot.lane.b32.xlu0 %v3669_v28, %s3984_s22  ;;  %v3744_v7 = vpack.i.bf16 %v4877_v19, %v4875_v42  ;;  %v3784_v28 = vpack.i.bf16 %v4865_v51, %v4863_v33 }
 0x3ba   :  { %3710 = vrot.lane.b32.xlu1 %v4857_v50, %s3985_s23  ;;  %3705 = vrot.lane.b32.xlu0 %v3674_v45, %s3984_s22  ;;  %v3789_v45 = vpack.i.bf16 %v4869_v63, %v4867_v47 }
 0x3be   :  { %3720 = vrot.lane.b32.xlu1 %v4836_v13, %s3985_s23  ;;  %3715 = vrot.lane.b32.xlu0 %v4861_v2, %s3985_s23 }
 0x3c2   :  { %3730 = vrot.lane.b32.xlu1 %v4857_v50, %s3986_s24  ;;  %3725 = vrot.lane.b32.xlu0 %v4840_v5, %s3985_s23 }
 0x3c6   :  { %3740 = vrot.lane.b32.xlu1 %v3739_v4, %s3981_s25  ;;  %3735 = vrot.lane.b32.xlu0 %v4861_v2, %s3986_s24 }
 0x3ca   :  { %3745 = vrot.lane.b32.xlu1 %v3744_v7, %s3981_s25  ;;  %3785 = vrot.lane.b32.xlu0 %v3784_v28, %s3981_s25 }
 0x3ce   :  { %3750 = vrot.lane.b32.xlu1 %v3739_v4, %s3982_s0  ;;  %3790 = vrot.lane.b32.xlu0 %v3789_v45, %s3981_s25 }
 0x3d2   :  { %3755 = vrot.lane.b32.xlu1 %v3744_v7, %s3982_s0  ;;  %3795 = vrot.lane.b32.xlu0 %v3784_v28, %s3982_s0 }
 0x3d6   :  { %3760 = vrot.lane.b32.xlu1 %v3739_v4, %s3983_s21  ;;  %3800 = vrot.lane.b32.xlu0 %v3789_v45, %s3982_s0 }
 0x3da   :  { %3765 = vrot.lane.b32.xlu1 %v3744_v7, %s3983_s21  ;;  %3805 = vrot.lane.b32.xlu0 %v3784_v28, %s3983_s21 }
 0x3de   :  { %3770 = vrot.lane.b32.xlu1 %v3739_v4, %s3984_s22  ;;  %3810 = vrot.lane.b32.xlu0 %v3789_v45, %s3983_s21 }
 0x3e2   :  { %3775 = vrot.lane.b32.xlu1 %v3744_v7, %s3984_s22  ;;  %3815 = vrot.lane.b32.xlu0 %v3784_v28, %s3984_s22 }
 0x3e6   :  { %3780 = vrot.lane.b32.xlu1 %v4836_v13, %s3986_s24  ;;  %3820 = vrot.lane.b32.xlu0 %v3789_v45, %s3984_s22 }
 0x3ea   :  { %3830 = vrot.lane.b32.xlu1 %v4857_v50, %s3987_s26  ;;  %3825 = vrot.lane.b32.xlu0 %v4840_v5, %s3986_s24 }
 0x3ee   :  { %3840 = vrot.lane.b32.xlu1 %v4836_v13, %s3987_s26  ;;  %3835 = vrot.lane.b32.xlu0 %v4861_v2, %s3987_s26 }
 0x3f2   :  { %3850 = vrot.lane.b32.xlu1 %v4883_v11, %s3985_s23  ;;  %3845 = vrot.lane.b32.xlu0 %v4840_v5, %s3987_s26 }
 0x3f6   :  { %3860 = vrot.lane.b32.xlu1 %v4891_v34, %s3985_s23  ;;  %3855 = vrot.lane.b32.xlu0 %v4887_v29, %s3985_s23 }
 0x3fa   :  { %3870 = vrot.lane.b32.xlu1 %v4883_v11, %s3986_s24  ;;  %3865 = vrot.lane.b32.xlu0 %v4895_v57, %s3985_s23 }
 0x3fe   :  { %3880 = vrot.lane.b32.xlu1 %v4891_v34, %s3986_s24  ;;  %3875 = vrot.lane.b32.xlu0 %v4887_v29, %s3986_s24 }
 0x402   :  { %3890 = vrot.lane.b32.xlu1 %v4883_v11, %s3987_s26  ;;  %3885 = vrot.lane.b32.xlu0 %v4895_v57, %s3986_s24 }
 0x406   :  { %3900 = vrot.lane.b32.xlu1 %v4891_v34, %s3987_s26  ;;  %3895 = vrot.lane.b32.xlu0 %v4887_v29, %s3987_s26 }
 0x40a   :  { %3905 = vrot.lane.b32.xlu1 %v4857_v50, %s3988_s29  ;;  %3910 = vrot.lane.b32.xlu0 %v4895_v57, %s3987_s26 }
 0x40c   :  { %v3631_v38 = vpop.permute.xlu1 %3630 }
 0x40d   :  { %v3633_v55 = vunpack.i.h.bf16 %v3631_v38  ;;  %v3632_v1 = vunpack.i.l.bf16 %v3631_v38  ;;  %v2323_v38 = vld [vmem:[%s5607_s6 + $0x10] sm:$0xff] }
 0x40e   :  { %3920 = vrot.lane.b32.xlu1 %v4836_v13, %s3988_s29  ;;  %3915 = vrot.lane.b32.xlu0 %v4861_v2, %s3988_s29 }
 0x40f   :  { %v1501_v53 = vsel %vm87_vm3, %v3632_v1, %v3633_v55  ;;  %v1513_v36 = vsel %vm87_vm3, 0.0, %v3632_v1  ;;  %v2322_v1 = vld [vmem:[%s5607_s6 + $0x8] sm:$0xff] }
 0x410   :  { %v3636_v0 = vpop.permute.xlu1 %3635  ;;  %v3671_v52 = vpop.permute.xlu0 %3670 }
 0x411   :  { %v3673_v12 = vunpack.i.h.bf16 %v3671_v52  ;;  %v3672_v14 = vunpack.i.l.bf16 %v3671_v52  ;;  %v3638_v37 = vunpack.i.h.bf16 %v3636_v0  ;;  %v3637_v20 = vunpack.i.l.bf16 %v3636_v0  ;;  %v2324_v52 = vld [vmem:[%s5607_s6 + $0x18] sm:$0xff] }
 0x412   :  { %3930 = vrot.lane.b32.xlu1 %v4883_v11, %s3988_s29  ;;  %3925 = vrot.lane.b32.xlu0 %v4840_v5, %s3988_s29  ;;  %v2321_v5 = vld [vmem:[%s5607_s6] sm:$0xff] }
 0x413   :  { %v1502_v13 = vsel %vm87_vm3, %v3672_v14, %v3673_v12  ;;  %v1514_v18 = vsel %vm87_vm3, 0.0, %v3672_v14  ;;  %v1901_v11 = vsel %vm87_vm3, %v3637_v20, %v3638_v37  ;;  %v1913_v4 = vsel %vm87_vm3, 0.0, %v3637_v20 }
 0x414   :  { %v5008_v8 = vpop.permute.xlu1 %3640  ;;  %v3067_v40 = vpack.c.bf16 %v1502_v13, %v1501_v53  ;;  %v3070_v15 = vpack.c.bf16 %v1514_v18, %v1513_v36  ;;  %v3676_v31 = vpop.permute.xlu0 %3675 }
 0x415   :  { %v3678_v50 = vunpack.i.h.bf16 %v3676_v31  ;;  %v3677_v2 = vunpack.i.l.bf16 %v3676_v31 }
 0x416   :  { %3940 = vrot.lane.b32.xlu1 %v4891_v34, %s3988_s29  ;;  %3935 = vrot.lane.b32.xlu0 %v4887_v29, %s3988_s29 }
 0x417   :  { %3068 = vmatprep.subr.msk.bf16.mxu0 %vm4324_vm7, %v3067_v40  ;;  %v1902_v7 = vsel %vm87_vm3, %v3677_v2, %v3678_v50  ;;  %v1914_v28 = vsel %vm87_vm3, 0.0, %v3677_v2 }
 0x418   :  { %3071 = vmatpush1.bf16.msk.msra.mxu0 %vm4336_vm8, %v3070_v15  ;;  %v3646_v34 = vpop.permute.xlu1 %3645  ;;  %v3151_v29 = vpack.c.bf16 %v1902_v7, %v1901_v11  ;;  %v3154_v45 = vpack.c.bf16 %v1914_v28, %v1913_v4  ;;  %v3681_v35 = vpop.permute.xlu0 %3680  ;;  %v3642_v11 = vunpack.i.l.bf16 %v5008_v8 }
 0x419   :  { %v3683_v50 = vunpack.i.h.bf16 %v3681_v35  ;;  %v3682_v2 = vunpack.i.l.bf16 %v3681_v35  ;;  %v3647_v4 = vunpack.i.l.bf16 %v3646_v34  ;;  %v3648_v28 = vunpack.i.h.bf16 %v3646_v34 }
 0x41a   :  { %2327 = vperm.xlu1 %3628, %v2321_v5   ;;  %3945 = vrot.lane.b32.xlu0 %v4895_v57, %s3988_s29  ;;  %v3643_v5 = vunpack.i.h.bf16 %v5008_v8  ;;  %v1561_v8 = vsel %vm142_vm9, 0.0, %v3642_v11 }
 0x41b   :  { %3152 = vmatprep.subr.msk.bf16.mxu1 %vm4324_vm7, %v3151_v29  ;;  %v1550_v35 = vsel %vm142_vm9, %v3682_v2, %v3683_v50  ;;  %v5078_v46 = vsel %vm142_vm9, 0.0, %v3647_v4 }
 0x41c   :  { %3155 = vmatpush1.bf16.msk.msra.mxu1 %vm4336_vm8, %v3154_v45  ;;  %v5034_v55 = vpop.permute.xlu1 %3650  ;;  %v3686_v0 = vpop.permute.xlu0 %3685  ;;  %v1549_v9 = vsel %vm142_vm9, %v3642_v11, %v3643_v5 }
 0x41d   :  { %v3653_v29 = vunpack.i.h.bf16 %v5034_v55  ;;  %v3652_v45 = vunpack.i.l.bf16 %v5034_v55  ;;  %v3687_v56 = vunpack.i.l.bf16 %v3686_v0  ;;  %v1574_v22 = vpack.c.bf16 %v1550_v35, %v1549_v9 }
 0x41e   :  { %2337 = vperm.xlu1 %3628, %v2323_v38   ;;  %2332 = vperm.xlu0 %3627, %v2322_v1   ;;  %v5073_v1 = vsel %vm142_vm9, 0.0, %v3682_v2 }
 0x41f   :  { %v3079_v55 = vpack.c.bf16 %v5073_v1, %v1561_v8  ;;  %v5083_v39 = vsel %vm5662_vm12, %v3652_v45, %v3653_v29  ;;  %v5087_v50 = vsel %vm142_vm9, 0.0, %v3687_v56 }
 0x420   :  { %v5039_v57 = vpop.permute.xlu1 %3655  ;;  %v5044_v12 = vpop.permute.xlu0 %3690 }
 0x421   :  { %v3693_v27 = vunpack.i.h.bf16 %v5044_v12  ;;  %v3692_v5 = vunpack.i.l.bf16 %v5044_v12  ;;  %v3658_v8 = vunpack.i.h.bf16 %v5039_v57  ;;  %v3163_v12 = vpack.c.bf16 %v5087_v50, %v5078_v46 }
 0x422   :  { %2342 = vperm.xlu0 %3627, %v2324_v52   ;;  %v3688_v52 = vunpack.i.h.bf16 %v3686_v0  ;;  %v1949_v0 = vsel %vm142_vm9, %v3647_v4, %v3648_v28 }
 0x424   :  { %v5046_v14 = vpop.permute.xlu1 %3660  ;;  %v5048_v53 = vpop.permute.xlu0 %3695  ;;  %v1950_v59 = vsel %vm142_vm9, %v3687_v56, %v3688_v52 }
 0x425   :  { %v1974_v42 = vpack.c.bf16 %v1950_v59, %v1949_v0 }
 0x428   :  { %v5050_v36 = vpop.permute.xlu1 %3665  ;;  %v5052_v13 = vpop.permute.xlu0 %3700 }
 0x42c   :  { %v5054_v18 = vpop.permute.xlu1 %3710  ;;  %v5056_v37 = vpop.permute.xlu0 %3705 }
 0x430   :  { %v5058_v20 = vpop.permute.xlu1 %3720  ;;  %v5060_v40 = vpop.permute.xlu0 %3715 }
 0x431   :  { %v3723_v30 = vunpack.i.h.bf16 %v5058_v20 }
 0x434   :  { %v5062_v15 = vpop.permute.xlu1 %3730  ;;  %v5064_v31 = vpop.permute.xlu0 %3725 }
 0x438   :  { %v3741_v7 = vpop.permute.xlu1 %3740  ;;  %v5070_v38 = vpop.permute.xlu0 %3735 }
 0x439   :  { %v3743_v49 = vunpack.i.h.bf16 %v3741_v7  ;;  %v3742_v48 = vunpack.i.l.bf16 %v3741_v7 }
 0x43b   :  { %v1503_v11 = vsel %vm87_vm3, %v3742_v48, %v3743_v49  ;;  %v1515_v29 = vsel %vm87_vm3, 0.0, %v3742_v48  ;;  %v5101_v49 = vsel %vm5663_vm13, 0.0, %v3652_v45  ;;  %vm5664_vm13 = vmmov %vm5662_vm12 }
 0x43c   :  { %v3746_v34 = vpop.permute.xlu1 %3745  ;;  %v3786_v26 = vpop.permute.xlu0 %3785 }
 0x43d   :  { %v3788_v2 = vunpack.i.h.bf16 %v3786_v26  ;;  %v3787_v7 = vunpack.i.l.bf16 %v3786_v26  ;;  %v3748_v4 = vunpack.i.h.bf16 %v3746_v34  ;;  %v3747_v28 = vunpack.i.l.bf16 %v3746_v34 }
 0x43e   :  { %v3657_v26 = vunpack.i.l.bf16 %v5039_v57 }
 0x43f   :  { %v1504_v1 = vsel %vm87_vm3, %v3787_v7, %v3788_v2  ;;  %v1516_v9 = vsel %vm87_vm3, 0.0, %v3787_v7  ;;  %v1598_v7 = vsel %vm5662_vm12, %v3692_v5, %v3693_v27  ;;  %v1903_v57 = vsel %vm87_vm3, %v3747_v28, %v3748_v4 }
 0x440   :  { %v3751_v35 = vpop.permute.xlu1 %3750  ;;  %v3073_v56 = vpack.c.bf16 %v1504_v1, %v1503_v11  ;;  %v3076_v52 = vpack.c.bf16 %v1516_v9, %v1515_v29  ;;  %v3791_v43 = vpop.permute.xlu0 %3790  ;;  %v1915_v11 = vsel %vm87_vm3, 0.0, %v3747_v28  ;;  %v5113_v27 = vsel %vm5664_vm13, %v3657_v26, %v3658_v8 }
 0x441   :  { %v3793_v48 = vunpack.i.h.bf16 %v3791_v43  ;;  %v3792_v2 = vunpack.i.l.bf16 %v3791_v43  ;;  %v3753_v25 = vunpack.i.h.bf16 %v3751_v35  ;;  %v3752_v34 = vunpack.i.l.bf16 %v3751_v35 }
 0x442   :  { %3074 = vmatprep.subr.msk.bf16.mxu0 %vm4324_vm7, %v3073_v56  ;;  %v5116_v45 = vsel %vm5662_vm12, 0.0, %v3657_v26  ;;  %v1610_v1 = vsel %vm5665_vm1, 0.0, %v3692_v5  ;;  %v3085_v9 = vpack.c.bf16 %v1598_v7, %v5083_v39  ;;  %v3698_v35 = vunpack.i.h.bf16 %v5048_v53 }
 0x443   :  { %v1904_v29 = vsel %vm87_vm3, %v3792_v2, %v3793_v48  ;;  %v1916_v46 = vsel %vm87_vm3, 0.0, %v3792_v2  ;;  %3077 = vmatpush1.bf16.msk.msra.mxu0 %vm4336_vm8, %v3076_v52  ;;  %v3697_v56 = vunpack.i.l.bf16 %v5048_v53  ;;  %v1563_v8 = vsel %vm142_vm9, 0.0, %v3752_v34  ;;  %vm5666_vm3 = vmmov %vm5665_vm1 }
 0x444   :  { %v3756_v43 = vpop.permute.xlu1 %3755  ;;  %v3157_v50 = vpack.c.bf16 %v1904_v29, %v1903_v57  ;;  %v3160_v59 = vpack.c.bf16 %v1916_v46, %v1915_v11  ;;  %v3796_v0 = vpop.permute.xlu0 %3795  ;;  %2385 = vmatprep.subr.bf16.mxu0 %v1574_v22  ;;  %v1551_v26 = vsel %vm142_vm9, %v3752_v34, %v3753_v25  ;;  %v3663_v5 = vunpack.i.h.bf16 %v5046_v14  ;;  %vm5671_vm12 = vmmov %vm5666_vm3 }
 0x445   :  { %v3798_v4 = vunpack.i.h.bf16 %v3796_v0  ;;  %v3797_v28 = vunpack.i.l.bf16 %v3796_v0  ;;  %v3758_v22 = vunpack.i.h.bf16 %v3756_v43  ;;  %v3757_v48 = vunpack.i.l.bf16 %v3756_v43 }
 0x446   :  { %3158 = vmatprep.subr.msk.bf16.mxu1 %vm4324_vm7, %v3157_v50  ;;  %v3662_v2 = vunpack.i.l.bf16 %v5046_v14  ;;  %v3703_v34 = vunpack.i.h.bf16 %v5052_v13  ;;  %v3702_v11 = vunpack.i.l.bf16 %v5052_v13  ;;  %v3088_v44 = vpack.c.bf16 %v1610_v1, %v5101_v49 }
 0x447   :  { %v1564_v52 = vsel %vm142_vm9, 0.0, %v3797_v28  ;;  %3080 = vmatpush1.bf16.msk.msra.mxu0 %vm4387_vm10, %v3079_v55  ;;  %3161 = vmatpush1.bf16.msk.msra.mxu1 %vm4336_vm8, %v3160_v59  ;;  %v1552_v53 = vsel %vm142_vm9, %v3797_v28, %v3798_v4  ;;  %v1998_v46 = vsel %vm5666_vm3, %v3697_v56, %v3698_v35  ;;  %v1963_v59 = vsel %vm142_vm9, 0.0, %v3757_v48  ;;  %vm5667_vm8 = vmmov %vm5665_vm1 }
 0x448   :  { %v3761_v39 = vpop.permute.xlu1 %3760  ;;  %v3082_v7 = vpack.c.bf16 %v1564_v52, %v1563_v8  ;;  %v3801_v57 = vpop.permute.xlu0 %3800  ;;  %2527 = vmatprep.subr.bf16.mxu1 %v1974_v42  ;;  %v1576_v25 = vpack.c.bf16 %v1552_v53, %v1551_v26  ;;  %v1951_v13 = vsel %vm142_vm9, %v3757_v48, %v3758_v22  ;;  %v2010_v1 = vsel %vm5667_vm8, 0.0, %v3697_v56  ;;  %vm5672_vm8 = vmmov %vm5666_vm3 }
 0x449   :  { %v3803_v29 = vunpack.i.h.bf16 %v3801_v57  ;;  %v3802_v55 = vunpack.i.l.bf16 %v3801_v57  ;;  %v3763_v43 = vunpack.i.h.bf16 %v3761_v39  ;;  %v3762_v50 = vunpack.i.l.bf16 %v3761_v39 }
 0x44a   :  { %2387 = vmatprep.subr.bf16.mxu0 %v1576_v25  ;;  %vm5668_vm1 = vcmask 7168   ;;  %v3169_v26 = vpack.c.bf16 %v1998_v46, %v5113_v27  ;;  %v3708_v48 = vunpack.i.h.bf16 %v5056_v37  ;;  %v3707_v56 = vunpack.i.l.bf16 %v5056_v37 }
 0x44b   :  { %v1964_v0 = vsel %vm142_vm9, 0.0, %v3802_v55  ;;  %3083 = vmatpush1.bf16.msk.msra.mxu0 %vm4387_vm10, %v3082_v7  ;;  %3164 = vmatpush1.bf16.msk.msra.mxu1 %vm4387_vm10, %v3163_v12  ;;  %v1952_v49 = vsel %vm142_vm9, %v3802_v55, %v3803_v29  ;;  %v1645_v4 = vsel %vm5668_vm1, %v3662_v2, %v3663_v5  ;;  %vm5669_vm13 = vmmov %vm5668_vm1  ;;  %v1611_v53 = vsel %vm5671_vm12, 0.0, %v3762_v50 }
 0x44c   :  { %v3766_v42 = vpop.permute.xlu1 %3765  ;;  %v3166_v28 = vpack.c.bf16 %v1964_v0, %v1963_v59  ;;  %v3806_v35 = vpop.permute.xlu0 %3805  ;;  %3086 = vmatprep.subr.msk.bf16.mxu0 %vm4434_vm15, %v3085_v9  ;;  %v1976_v8 = vpack.c.bf16 %v1952_v49, %v1951_v13  ;;  %v1646_v12 = vsel %vm5669_vm13, %v3702_v11, %v3703_v34  ;;  %vm5670_vm9 = vmmov %vm5666_vm3  ;;  %v3172_v37 = vpack.c.bf16 %v2010_v1, %v5116_v45 }
 0x44d   :  { %v3808_v52 = vunpack.i.h.bf16 %v3806_v35  ;;  %v3807_v22 = vunpack.i.l.bf16 %v3806_v35  ;;  %v1599_v39 = vsel %vm5670_vm9, %v3762_v50, %v3763_v43  ;;  %v3768_v7 = vunpack.i.h.bf16 %v3766_v42  ;;  %vm5673_vm13 = vmmov %vm5668_vm1 }
 0x44e   :  { %2529 = vmatprep.subr.bf16.mxu1 %v1976_v8  ;;  %v3767_v57 = vunpack.i.l.bf16 %v3766_v42  ;;  %v3668_v25 = vunpack.i.h.bf16 %v5050_v36  ;;  %v1658_v46 = vsel %vm5668_vm1, 0.0, %v3702_v11  ;;  %v3667_v43 = vunpack.i.l.bf16 %v5050_v36  ;;  %vm5675_vm9 = vmmov %vm5666_vm3 }
 0x44f   :  { %v1600_v5 = vsel %vm5666_vm3, %v3807_v22, %v3808_v52  ;;  %v1612_v9 = vsel %vm5672_vm8, 0.0, %v3807_v22  ;;  %3089 = vmatpush1.bf16.msk.msra.mxu0 %vm4438_vm0, %v3088_v44  ;;  %3167 = vmatpush1.bf16.msk.msra.mxu1 %vm4387_vm10, %v3166_v28  ;;  %v3097_v59 = vpack.c.bf16 %v1646_v12, %v1645_v4  ;;  %v2046_v58 = vsel %vm5673_vm13, %v3707_v56, %v3708_v48  ;;  %vm5674_vm10 = vmmov %vm5666_vm3 }
 0x450   :  { %v3771_v27 = vpop.permute.xlu1 %3770  ;;  %v3091_v34 = vpack.c.bf16 %v1600_v5, %v1599_v39  ;;  %v3094_v29 = vpack.c.bf16 %v1612_v9, %v1611_v53  ;;  %v3811_v55 = vpop.permute.xlu0 %3810  ;;  %3170 = vmatprep.subr.msk.bf16.mxu1 %vm4434_vm15, %v3169_v26  ;;  %v1999_v45 = vsel %vm5674_vm10, %v3767_v57, %v3768_v7  ;;  %v2011_v13 = vsel %vm5675_vm9, 0.0, %v3767_v57  ;;  %vm5676_vm12 = vmmov %vm5666_vm3 }
 0x451   :  { %v3813_v50 = vunpack.i.h.bf16 %v3811_v55  ;;  %v3812_v44 = vunpack.i.l.bf16 %v3811_v55  ;;  %v3773_v0 = vunpack.i.h.bf16 %v3771_v27  ;;  %v3772_v42 = vunpack.i.l.bf16 %v3771_v27  ;;  %vm5677_vm8 = vmmov %vm5668_vm1 }
 0x452   :  { %3092 = vmatprep.subr.msk.bf16.mxu0 %vm4434_vm15, %v3091_v34  ;;  %v1657_v1 = vsel %vm5677_vm8, 0.0, %v3662_v2  ;;  %v2045_v26 = vsel %vm5668_vm1, %v3667_v43, %v3668_v25  ;;  %vm5678_vm13 = vmmov %vm5668_vm1  ;;  %v3713_v55 = vunpack.i.h.bf16 %v5054_v18 }
 0x453   :  { %v2000_v49 = vsel %vm5676_vm12, %v3812_v44, %v3813_v50  ;;  %v2012_v11 = vsel %vm5666_vm3, 0.0, %v3812_v44  ;;  %3095 = vmatpush1.bf16.msk.msra.mxu0 %vm4438_vm0, %v3094_v29  ;;  %3173 = vmatpush1.bf16.msk.msra.mxu1 %vm4438_vm0, %v3172_v37  ;;  %v3100_v8 = vpack.c.bf16 %v1658_v46, %v1657_v1  ;;  %v2058_v22 = vsel %vm5678_vm13, 0.0, %v3707_v56  ;;  %vm5679_vm10 = vmmov %vm5668_vm1 }
 0x454   :  { %v3776_v36 = vpop.permute.xlu1 %3775  ;;  %v3175_v4 = vpack.c.bf16 %v2000_v49, %v1999_v45  ;;  %v3178_v28 = vpack.c.bf16 %v2012_v11, %v2011_v13  ;;  %v3816_v35 = vpop.permute.xlu0 %3815  ;;  %3098 = vmatprep.subr.msk.bf16.mxu0 %vm4324_vm7, %v3097_v59  ;;  %v3181_v48 = vpack.c.bf16 %v2046_v58, %v2045_v26  ;;  %v1647_v39 = vsel %vm5679_vm10, %v3772_v42, %v3773_v0  ;;  %vm5680_vm9 = vmmov %vm5668_vm1 }
 0x455   :  { %v3818_v12 = vunpack.i.h.bf16 %v3816_v35  ;;  %v3817_v52 = vunpack.i.l.bf16 %v3816_v35  ;;  %v1659_v14 = vsel %vm5680_vm9, 0.0, %v3772_v42  ;;  %vm5681_vm12 = vmmov %vm5668_vm1  ;;  %v3778_v5 = vunpack.i.h.bf16 %v3776_v36 }
 0x456   :  { %3176 = vmatprep.subr.msk.bf16.mxu1 %vm4434_vm15, %v3175_v4  ;;  %vm5682_vm3 = vmmov %vm5668_vm1  ;;  %v3777_v9 = vunpack.i.l.bf16 %v3776_v36  ;;  %v3712_v46 = vunpack.i.l.bf16 %v5054_v18  ;;  %v3718_v58 = vunpack.i.h.bf16 %v5060_v40  ;;  %v3722_v0 = vunpack.i.l.bf16 %v5058_v20 }
 0x457   :  { %v1648_v2 = vsel %vm5681_vm12, %v3817_v52, %v3818_v12  ;;  %v1660_v53 = vsel %vm5682_vm3, 0.0, %v3817_v52  ;;  %3101 = vmatpush1.bf16.msk.msra.mxu0 %vm4477_vm6, %v3100_v8  ;;  %3179 = vmatpush1.bf16.msk.msra.mxu1 %vm4438_vm0, %v3178_v28  ;;  %vm5683_vm8 = vmmov %vm5668_vm1  ;;  %v5688_v49 = vpack.c.bf16 %v4817_v3, %v4799_v54  ;;  %v3717_v11 = vunpack.i.l.bf16 %v5060_v40 }
 0x458   :  { %v5198_v56 = vpop.permute.xlu1 %3780  ;;  %v2057_v7 = vsel %vm5683_vm8, 0.0, %v3667_v43  ;;  %v3103_v57 = vpack.c.bf16 %v1648_v2, %v1647_v39  ;;  %v3106_v27 = vpack.c.bf16 %v1660_v53, %v1659_v14  ;;  %v3821_v37 = vpop.permute.xlu0 %3820  ;;  %3182 = vmatprep.subr.msk.bf16.mxu1 %vm4324_vm7, %v3181_v48  ;;  %vm5684_vm0 = vmmov %vm5668_vm1  ;;  %v3733_v36 = vunpack.i.h.bf16 %v5062_v15 }
 0x459   :  { %v3184_v25 = vpack.c.bf16 %v2058_v22, %v2057_v7  ;;  %v3823_v34 = vunpack.i.h.bf16 %v3821_v37  ;;  %v3822_v29 = vunpack.i.l.bf16 %v3821_v37  ;;  %v2047_v43 = vsel %vm5684_vm0, %v3777_v9, %v3778_v5  ;;  %vm5685_vm1 = vmmov %vm5684_vm0 }
 0x45a   :  { %3104 = vmatprep.subr.msk.bf16.mxu0 %vm4324_vm7, %v3103_v57  ;;  %v2059_v50 = vsel %vm5685_vm1, 0.0, %v3777_v9  ;;  %vm5686_vm13 = vmmov %vm5684_vm0  ;;  %v3732_v1 = vunpack.i.l.bf16 %v5062_v15  ;;  %vm5689_vm9 = vcmask 1039360   ;;  %v5691_v28 = vpack.c.bf16 %v4815_v17, %v4797_v21 }
 0x45b   :  { %v2048_v44 = vsel %vm5686_vm13, %v3822_v29, %v3823_v34  ;;  %vm5687_vm10 = vmmov %vm5684_vm0  ;;  %3107 = vmatpush1.bf16.msk.msra.mxu0 %vm4477_vm6, %v3106_v27  ;;  %3185 = vmatpush1.bf16.msk.msra.mxu1 %vm4477_vm6, %v3184_v25  ;;  %v1714_v4 = vsel %vm5689_vm9, %v3713_v55, 0.0  ;;  %v5695_v35 = vpack.c.bf16 %v4865_v51, %v4873_v41  ;;  %v5696_v21 = vpack.c.bf16 %v4823_v32, %v4807_v61  ;;  %v5709_v34 = vld [vmem:[#allocation6_spill] sm:$0xff] }
 0x45c   :  { %v2060_v59 = vsel %vm5687_vm10, 0.0, %v3822_v29  ;;  %v5216_v18 = vpop.permute.xlu1 %3830  ;;  %v3187_v42 = vpack.c.bf16 %v2048_v44, %v2047_v43  ;;  %v5220_v13 = vpop.permute.xlu0 %3825  ;;  %2397 = vmatprep.subr.bf16.mxu0 %v5688_v49  ;;  %vm5690_vm12 = vmmov %vm5689_vm9  ;;  %v3728_v8 = vunpack.i.h.bf16 %v5064_v31  ;;  %v3727_v26 = vunpack.i.l.bf16 %v5064_v31 }
 0x45d   :  { %v3190_v45 = vpack.c.bf16 %v2060_v59, %v2059_v50  ;;  %v1713_v20 = vsel %vm5690_vm12, %v3712_v46, 0.0  ;;  %vm5692_vm3 = vmmov %vm5689_vm9  ;;  %v3738_v12 = vunpack.i.h.bf16 %v5070_v38  ;;  %vm5698_vm1 = vcmask 924672  }
 0x45e   :  { %3188 = vmatprep.subr.msk.bf16.mxu1 %vm4324_vm7, %v3187_v42  ;;  %v2114_v3 = vsel %vm5692_vm3, %v3718_v58, 0.0  ;;  %vm5693_vm8 = vmmov %vm5692_vm3  ;;  %v3109_v52 = vpack.c.bf16 %v1714_v4, %v1713_v20  ;;  %v5255_v22 = vsel %vm5698_vm1, %v3733_v36, 0.0  ;;  %v3737_v51 = vunpack.i.l.bf16 %v5070_v38 }
 0x45f   :  { %2398 = vmatpush1.bf16.msra.mxu0 %v5691_v28  ;;  %3191 = vmatpush1.bf16.msk.msra.mxu1 %vm4477_vm6, %v3190_v45  ;;  %v1701_v40 = vsel %vm5693_vm8, %v3722_v0, %v3712_v46  ;;  %vm5694_vm0 = vmmov %vm5692_vm3  ;;  %v3783_v61 = vunpack.i.h.bf16 %v5198_v56  ;;  %v3782_v32 = vunpack.i.l.bf16 %v5198_v56  ;;  %v5700_v41 = vpack.c.bf16 %v4863_v33, %v4871_v16 }
 0x460   :  { %v5237_v54 = vpop.permute.xlu1 %3840  ;;  %v1702_v10 = vsel %vm5694_vm0, %v3723_v30, %v3713_v55  ;;  %v5242_v15 = vpop.permute.xlu0 %3835  ;;  %2399 = vmatprep.subr.bf16.mxu0 %v5695_v35  ;;  %2539 = vmatprep.subr.bf16.mxu1 %v5696_v21  ;;  %vm5697_vm7 = vmmov %vm5694_vm0  ;;  %v5701_v31 = vpack.c.bf16 %v4821_v23, %v4805_v60  ;;  %v5702_v38 = vpack.c.bf16 %v4869_v63, %v4877_v19  ;;  %v3833_v7 = vunpack.i.h.bf16 %v5216_v18 }
 0x461   :  { %v2113_v17 = vsel %vm5697_vm7, %v3717_v11, 0.0  ;;  %vm5699_vm13 = vmmov %vm5698_vm1  ;;  %v3112_v2 = vpack.c.bf16 %v1702_v10, %v1701_v40  ;;  %v1750_v27 = vsel %vm5698_vm1, %v3783_v61, %v3733_v36  ;;  %v3832_v37 = vunpack.i.l.bf16 %v5216_v18  ;;  %v3960_v61 = vld [vmem:[%s5606_s5 + $0x1c] ss:$12 sps:$4 sm:$0xff]  }
 0x462   :  { %v5258_v48 = vsel %vm5699_vm13, %v3732_v1, 0.0  ;;  %v3193_v14 = vpack.c.bf16 %v2114_v3, %v2113_v17  ;;  %vm5703_vm10 = vmmov %vm5694_vm0  ;;  %v5710_v29 = vpack.c.bf16 %v4867_v47, %v5709_v34  ;;  %v3827_v30 = vunpack.i.l.bf16 %v5220_v13 }
 0x463   :  { %2400 = vmatpush1.bf16.msra.mxu0 %v5700_v41  ;;  %2540 = vmatpush1.bf16.msra.mxu1 %v5701_v31  ;;  %v2101_v33 = vsel %vm5703_vm10, %v3727_v26, %v3717_v11  ;;  %vm5704_vm9 = vmmov %vm5694_vm0  ;;  %v3121_v60 = vpack.c.bf16 %v5255_v22, %v5258_v48  ;;  %vm5711_vm13 = vcmask 916480   ;;  %v3842_v17 = vunpack.i.l.bf16 %v5237_v54 }
 0x464   :  { %v3851_v39 = vpop.permute.xlu1 %3850  ;;  %v5269_v53 = vpop.permute.xlu0 %3845  ;;  %3110 = vmatprep.subr.msk.bf16.mxu0 %vm4434_vm15, %v3109_v52  ;;  %2541 = vmatprep.subr.bf16.mxu1 %v5702_v38  ;;  %v2102_v16 = vsel %vm5704_vm9, %v3728_v8, %v3718_v58  ;;  %vm5705_vm12 = vmmov %vm5698_vm1  ;;  %v3828_v58 = vunpack.i.h.bf16 %v5220_v13  ;;  %v5308_v45 = vsel %vm5711_vm13, %v3833_v7, 0.0  ;;  %v3843_v22 = vunpack.i.h.bf16 %v5237_v54 }
 0x465   :  { %v3853_v5 = vunpack.i.h.bf16 %v3851_v39  ;;  %v3852_v9 = vunpack.i.l.bf16 %v3851_v39  ;;  %v5281_v23 = vsel %vm5705_vm12, %v3738_v12, 0.0  ;;  %vm5706_vm3 = vmmov %vm5698_vm1  ;;  %v3196_v46 = vpack.c.bf16 %v2102_v16, %v2101_v33 }
 0x466   :  { %v5284_v56 = vsel %vm5706_vm3, %v3737_v51, 0.0  ;;  %vm5707_vm8 = vmmov %vm5694_vm0  ;;  %v3837_v54 = vunpack.i.l.bf16 %v5242_v15 }
 0x467   :  { %v1716_v57 = vsel %vm5707_vm8, %v3853_v5, 0.0  ;;  %v1715_v63 = vsel %vm5694_vm0, %v3852_v9, 0.0  ;;  %vm5708_vm7 = vmmov %vm5698_vm1  ;;  %3113 = vmatpush1.bf16.msk.msra.mxu0 %vm4536_vm14, %v3112_v2  ;;  %2542 = vmatpush1.bf16.msra.mxu1 %v5710_v29  ;;  %v3205_v59 = vpack.c.bf16 %v5281_v23, %v5284_v56  ;;  %v3848_v29 = vunpack.i.h.bf16 %v5269_v53 }
 0x468   :  { %v1749_v19 = vsel %vm5708_vm7, %v3782_v32, %v3732_v1  ;;  %v3115_v25 = vpack.c.bf16 %v1716_v57, %v1715_v63  ;;  %v3861_v55 = vpop.permute.xlu1 %3860  ;;  %v3856_v43 = vpop.permute.xlu0 %3855  ;;  %3194 = vmatprep.subr.msk.bf16.mxu1 %vm4434_vm15, %v3193_v14  ;;  %vm5712_vm10 = vmmov %vm5694_vm0 }
 0x469   :  { %v3863_v50 = vunpack.i.h.bf16 %v3861_v55  ;;  %v3862_v44 = vunpack.i.l.bf16 %v3861_v55  ;;  %v3858_v0 = vunpack.i.h.bf16 %v3856_v43  ;;  %v3857_v42 = vunpack.i.l.bf16 %v3856_v43  ;;  %vm5713_vm9 = vmmov %vm5694_vm0 }
 0x46a   :  { %3116 = vmatprep.subr.msk.bf16.mxu0 %vm4434_vm15, %v3115_v25  ;;  %v3124_v47 = vpack.c.bf16 %v1750_v27, %v1749_v19  ;;  %vm5714_vm12 = vmmov %vm5711_vm13  ;;  %v3847_v55 = vunpack.i.l.bf16 %v5269_v53 }
 0x46b   :  { %v1703_v49 = vsel %vm5712_vm10, %v3862_v44, %v3852_v9  ;;  %v1704_v11 = vsel %vm5713_vm9, %v3863_v50, %v3853_v5  ;;  %v1809_v36 = vsel %vm5714_vm12, %v3832_v37, 0.0  ;;  %vm5715_vm3 = vmmov %vm5694_vm0  ;;  %3197 = vmatpush1.bf16.msk.msra.mxu1 %vm4536_vm14, %v3196_v46  ;;  %v1797_v24 = vsel %vm5714_vm12, %v3842_v17, %v3832_v37 }
 0x46c   :  { %v2116_v1 = vsel %vm5715_vm3, %v3858_v0, 0.0  ;;  %vm5716_vm8 = vmmov %vm5694_vm0  ;;  %v3118_v4 = vpack.c.bf16 %v1704_v11, %v1703_v49  ;;  %v3871_v20 = vpop.permute.xlu1 %3870  ;;  %v3866_v40 = vpop.permute.xlu0 %3865  ;;  %v3133_v52 = vpack.c.bf16 %v5308_v45, %v1809_v36 }
 0x46d   :  { %v2115_v13 = vsel %vm5716_vm8, %v3857_v42, 0.0  ;;  %vm5717_vm0 = vmmov %vm5698_vm1  ;;  %v3873_v10 = vunpack.i.h.bf16 %v3871_v20  ;;  %v3872_v35 = vunpack.i.l.bf16 %v3871_v20  ;;  %v3868_v8 = vunpack.i.h.bf16 %v3866_v40 }
 0x46e   :  { %v2149_v28 = vsel %vm5717_vm0, %v3827_v30, %v3737_v51  ;;  %v3199_v3 = vpack.c.bf16 %v2116_v1, %v2115_v13  ;;  %vm5718_vm7 = vmmov %vm5717_vm0  ;;  %v3867_v26 = vunpack.i.l.bf16 %v3866_v40  ;;  %3119 = vmatpush1.bf16.msk.msra.mxu0 %vm4536_vm14, %v3118_v4 }
 0x46f   :  { %v2150_v21 = vsel %vm5718_vm7, %v3828_v58, %v3738_v12  ;;  %vm5719_vm1 = vmmov %vm5717_vm0  ;;  %3122 = vmatprep.subr.msk.bf16.mxu0 %vm4575_vm5, %v3121_v60  ;;  %v3838_v12 = vunpack.i.h.bf16 %v5242_v15 }
 0x470   :  { %v1764_v48 = vsel %vm5719_vm1, %v3873_v10, 0.0  ;;  %vm5720_vm13 = vmmov %vm5717_vm0  ;;  %3200 = vmatprep.subr.msk.bf16.mxu1 %vm4434_vm15, %v3199_v3  ;;  %v3881_v39 = vpop.permute.xlu1 %3880  ;;  %v3876_v2 = vpop.permute.xlu0 %3875  ;;  %v3208_v38 = vpack.c.bf16 %v2150_v21, %v2149_v28 }
 0x471   :  { %v1763_v51 = vsel %vm5720_vm13, %v3872_v35, 0.0  ;;  %vm5722_vm10 = vmmov %vm5715_vm3  ;;  %v3883_v5 = vunpack.i.h.bf16 %v3881_v39  ;;  %v3882_v9 = vunpack.i.l.bf16 %v3881_v39  ;;  %v3878_v33 = vunpack.i.h.bf16 %v3876_v2 }
 0x472   :  { %v2104_v32 = vsel %vm5722_vm10, %v3868_v8, %v3858_v0  ;;  %vm5723_vm9 = vmmov %vm5715_vm3  ;;  %v3127_v31 = vpack.c.bf16 %v1764_v48, %v1763_v51  ;;  %v3877_v16 = vunpack.i.l.bf16 %v3876_v2  ;;  %3125 = vmatpush1.bf16.msk.msra.mxu0 %vm4477_vm6, %v3124_v47 }
 0x473   :  { %v2103_v41 = vsel %vm5723_vm9, %v3867_v26, %v3857_v42  ;;  %vm5724_vm15 = vmmov %vm5714_vm12 }
 0x474   :  { %v3202_v14 = vpack.c.bf16 %v2104_v32, %v2103_v41  ;;  %v1798_v60 = vsel %vm5724_vm15, %v3843_v22, %v3833_v7  ;;  %vm5725_vm3 = vmmov %vm5717_vm0  ;;  %3128 = vmatprep.subr.msk.bf16.mxu0 %vm4575_vm5, %v3127_v31  ;;  %v2163_v63 = vsel %vm5719_vm1, %v3877_v16, 0.0  ;;  %v3891_v18 = vpop.permute.xlu1 %3890  ;;  %v3886_v37 = vpop.permute.xlu0 %3885 }
 0x475   :  { %v1751_v23 = vsel %vm5725_vm3, %v3882_v9, %v3872_v35  ;;  %vm5726_vm8 = vmmov %vm5717_vm0  ;;  %v3893_v25 = vunpack.i.h.bf16 %v3891_v18  ;;  %v3892_v34 = vunpack.i.l.bf16 %v3891_v18  ;;  %v3888_v46 = vunpack.i.h.bf16 %v3886_v37 }
 0x476   :  { %v1752_v15 = vsel %vm5726_vm8, %v3883_v5, %v3873_v10  ;;  %3203 = vmatpush1.bf16.msk.msra.mxu1 %vm4536_vm14, %v3202_v14  ;;  %vm5727_vm0 = vmmov %vm5714_vm12  ;;  %v3887_v30 = vunpack.i.l.bf16 %v3886_v37 }
 0x477   :  { %v2210_v56 = vsel %vm5727_vm0, %v3838_v12, 0.0  ;;  %vm5728_vm7 = vmmov %vm5719_vm1  ;;  %v3130_v19 = vpack.c.bf16 %v1752_v15, %v1751_v23  ;;  %3206 = vmatprep.subr.msk.bf16.mxu1 %vm4575_vm5, %v3205_v59  ;;  %v1821_v59 = vpack.c.bf16 %v1798_v60, %v1797_v24 }
 0x478   :  { %v2164_v57 = vsel %vm5728_vm7, %v3878_v33, 0.0  ;;  %vm5729_vm13 = vmmov %vm5727_vm0  ;;  %v3901_v42 = vpop.permute.xlu1 %3900  ;;  %v3896_v49 = vpop.permute.xlu0 %3895 }
 0x479   :  { %v2209_v7 = vsel %vm5729_vm13, %v3837_v54, 0.0  ;;  %v3211_v27 = vpack.c.bf16 %v2164_v57, %v2163_v63  ;;  %3131 = vmatpush1.bf16.msk.msra.mxu0 %vm4477_vm6, %v3130_v19  ;;  %vm5730_vm10 = vmmov %vm5727_vm0  ;;  %v3903_v11 = vunpack.i.h.bf16 %v3901_v42  ;;  %v3902_v36 = vunpack.i.l.bf16 %v3901_v42 }
 0x47a   :  { %v1812_v43 = vsel %vm5730_vm10, %v3893_v25, 0.0  ;;  %vm5731_vm9 = vmmov %vm5727_vm0  ;;  %3209 = vmatpush1.bf16.msk.msra.mxu1 %vm4477_vm6, %v3208_v38  ;;  %3134 = vmatprep.subr.msk.bf16.mxu0 %vm4616_vm11, %v3133_v52  ;;  %v3217_v47 = vpack.c.bf16 %v2210_v56, %v2209_v7  ;;  %v3898_v4 = vunpack.i.h.bf16 %v3896_v49  ;;  %v3897_v20 = vunpack.i.l.bf16 %v3896_v49 }
 0x47b   :  { %v1811_v50 = vsel %vm5731_vm9, %v3892_v34, 0.0  ;;  %vm5733_vm12 = vmmov %vm5719_vm1  ;;  %3212 = vmatprep.subr.msk.bf16.mxu1 %vm4575_vm5, %v3211_v27  ;;  %v1799_v28 = vsel %vm5727_vm0, %v3902_v36, %v3892_v34  ;;  %v3962_v27 = vld [vmem:[%s5606_s5 + $0x18] ss:$12 sps:$4 sm:$0xff]   ;;  %v5743_v42 = vmov 0  }
 0x47c   :  { %v2151_v58 = vsel %vm5733_vm12, %v3887_v30, %v3877_v16  ;;  %vm5734_vm15 = vmmov %vm5719_vm1  ;;  %v3136_v0 = vpack.c.bf16 %v1812_v43, %v1811_v50  ;;  %v3906_v21 = vpop.permute.xlu1 %3905  ;;  %v3911_v26 = vpop.permute.xlu0 %3910 }
 0x47d   :  { %v2152_v53 = vsel %vm5734_vm15, %v3888_v46, %v3878_v33  ;;  %vm5735_vm3 = vmmov %vm5727_vm0  ;;  %2410 = vmatpush1.bf16.msra.mxu0 %v1821_v59  ;;  %v3908_v52 = vunpack.i.h.bf16 %v3906_v21  ;;  %v3907_v22 = vunpack.i.l.bf16 %v3906_v21  ;;  %v3913_v48 = vunpack.i.h.bf16 %v3911_v26 }
 0x47e   :  { %v3214_v45 = vpack.c.bf16 %v2152_v53, %v2151_v58  ;;  %v2197_v1 = vsel %vm5735_vm3, %v3847_v55, %v3837_v54  ;;  %vm5736_vm8 = vmmov %vm5727_vm0  ;;  %3137 = vmatprep.subr.msk.bf16.mxu0 %vm4616_vm11, %v3136_v0  ;;  %v3912_v51 = vunpack.i.l.bf16 %v3911_v26 }
 0x47f   :  { %v2198_v13 = vsel %vm5736_vm8, %v3848_v29, %v3838_v12  ;;  %vm5737_vm7 = vmmov %vm5727_vm0  ;;  %v1858_v12 = vsel %vm472_vm4, %v3908_v52, 0.0  ;;  %v1857_v32 = vsel %vm472_vm4, %v3907_v22, 0.0 }
 0x480   :  { %v1800_v3 = vsel %vm5737_vm7, %v3903_v11, %v3893_v25  ;;  %3215 = vmatpush1.bf16.msk.msra.mxu1 %vm4477_vm6, %v3214_v45  ;;  %vm5738_vm5 = vmmov %vm5727_vm0  ;;  %v2221_v17 = vpack.c.bf16 %v2198_v13, %v2197_v1  ;;  %v3139_v39 = vpack.c.bf16 %v1858_v12, %v1857_v32  ;;  %v3921_v54 = vpop.permute.xlu1 %3920  ;;  %v3916_v2 = vpop.permute.xlu0 %3915 }
 0x481   :  { %v2212_v40 = vsel %vm5738_vm5, %v3898_v4, 0.0  ;;  %vm5739_vm1 = vmmov %vm5727_vm0  ;;  %v1823_v35 = vpack.c.bf16 %v1800_v3, %v1799_v28  ;;  %3218 = vmatprep.subr.msk.bf16.mxu1 %vm4616_vm11, %v3217_v47  ;;  %v3923_v5 = vunpack.i.h.bf16 %v3921_v54  ;;  %v3922_v9 = vunpack.i.l.bf16 %v3921_v54 }
 0x482   :  { %v2211_v10 = vsel %vm5739_vm1, %v3897_v20, 0.0  ;;  %vm5740_vm6 = vmmov %vm5727_vm0  ;;  %v3918_v38 = vunpack.i.h.bf16 %v3916_v2  ;;  %v3917_v24 = vunpack.i.l.bf16 %v3916_v2 }
 0x483   :  { %v3220_v8 = vpack.c.bf16 %v2212_v40, %v2211_v10  ;;  %2412 = vmatpush1.bf16.msra.mxu0 %v1823_v35  ;;  %v2199_v41 = vsel %vm5740_vm6, %v3912_v51, %v3897_v20  ;;  %vm5741_vm13 = vmmov %vm5727_vm0  ;;  %v1845_v16 = vsel %vm472_vm4, %v3922_v9, %v3907_v22  ;;  %v1846_v60 = vsel %vm472_vm4, %v3923_v5, %v3908_v52  ;;  %v3964_v35 = vld [vmem:[%s5606_s5 + $0x20] ss:$12 sps:$4 sm:$0xff]  }
 0x484   :  { %2552 = vmatpush1.bf16.msra.mxu1 %v2221_v17  ;;  %v2200_v31 = vsel %vm5741_vm13, %v3913_v48, %v3898_v4  ;;  %3140 = vmatprep.subr.msk.bf16.mxu0 %vm4651_vm2, %v3139_v39  ;;  %v2258_v23 = vsel %vm472_vm4, %v3918_v38, 0.0  ;;  %v2257_v15 = vsel %vm472_vm4, %v3917_v24, 0.0  ;;  %v3142_v56 = vpack.c.bf16 %v1846_v60, %v1845_v16  ;;  %v3931_v57 = vpop.permute.xlu1 %3930  ;;  %v3926_v19 = vpop.permute.xlu0 %3925  ;;  %v3963_v4 = vld [vmem:[%s5606_s5 + $0x8] ss:$12 sps:$4 sm:$0xff]  }
 0x485   :  { %3221 = vmatprep.subr.msk.bf16.mxu1 %vm4616_vm11, %v3220_v8  ;;  %v2223_v14 = vpack.c.bf16 %v2200_v31, %v2199_v41  ;;  %v3223_v63 = vpack.c.bf16 %v2258_v23, %v2257_v15  ;;  %v3933_v18 = vunpack.i.h.bf16 %v3931_v57  ;;  %v3932_v7 = vunpack.i.l.bf16 %v3931_v57 }
 0x486   :  { %2414 = vmatmul.mubr.bf16.vlgmr.msra.gmra.mrb[8].mxu0 %v3957_v62  ;;  %v3928_v37 = vunpack.i.h.bf16 %v3926_v19  ;;  %v3927_v25 = vunpack.i.l.bf16 %v3926_v19  ;;  %vm5744_vm11 = vcmask 261120  }
 0x487   :  { %2423 = vmatprep.mubr.bf16.mxu0 %v3960_v61  ;;  %3143 = vmatpush1.bf16.msk.msra.mxu0 %vm4536_vm14, %v3142_v56  ;;  %v1860_v34 = vsel %vm472_vm4, %v3933_v18, 0.0  ;;  %v1859_v29 = vsel %vm472_vm4, %v3932_v7, 0.0  ;;  %vm5745_vm10 = vmmov %vm5744_vm11 }
 0x488   :  { %2554 = vmatpush1.bf16.msra.mxu1 %v2223_v14  ;;  %v2245_v55 = vsel %vm472_vm4, %v3927_v25, %v3917_v24  ;;  %v2246_v46 = vsel %vm472_vm4, %v3928_v37, %v3918_v38  ;;  %v3145_v30 = vpack.c.bf16 %v1860_v34, %v1859_v29  ;;  %v3941_v43 = vpop.permute.xlu1 %3940  ;;  %v3936_v44 = vpop.permute.xlu0 %3935 }
 0x489   :  { %3224 = vmatprep.subr.msk.bf16.mxu1 %vm4651_vm2, %v3223_v63  ;;  %v3226_v50 = vpack.c.bf16 %v2246_v46, %v2245_v55  ;;  %v3943_v59 = vunpack.i.h.bf16 %v3941_v43  ;;  %v3942_v58 = vunpack.i.l.bf16 %v3941_v43  ;;  %v3938_v53 = vunpack.i.h.bf16 %v3936_v44 }
 0x48a   :  { %v3937_v0 = vunpack.i.l.bf16 %v3936_v44  ;;  %3146 = vmatprep.subr.msk.bf16.mxu0 %vm4651_vm2, %v3145_v30 }
 0x48b   :  { %2556 = vmatmul.mubr.bf16.vlgmr.msra.gmra.mrb[8].mxu1 %v3957_v62  ;;  %v1847_v47 = vsel %vm472_vm4, %v3942_v58, %v3932_v7  ;;  %v1848_v45 = vsel %vm472_vm4, %v3943_v59, %v3933_v18  ;;  %v2260_v49 = vsel %vm472_vm4, %v3938_v53, 0.0 }
 0x48c   :  { %2565 = vmatprep.mubr.bf16.mxu1 %v3960_v61  ;;  %3227 = vmatpush1.bf16.msk.msra.mxu1 %vm4536_vm14, %v3226_v50  ;;  %v2259_v11 = vsel %vm472_vm4, %v3937_v0, 0.0  ;;  %v3148_v36 = vpack.c.bf16 %v1848_v45, %v1847_v47  ;;  %v3946_v13 = vpop.permute.xlu0 %3945 }
 0x48d   :  { %v3229_v1 = vpack.c.bf16 %v2260_v49, %v2259_v11  ;;  %v3948_v20 = vunpack.i.h.bf16 %v3946_v13  ;;  %v3947_v28 = vunpack.i.l.bf16 %v3946_v13 }
 0x48e   :  { %2424 = vmatmul.mubr.bf16.gmra.mrb[12].mxu0 %v3962_v27 }
 0x48f   :  { %2466 = vmatprep.mubr.bf16.mxu0 %v5743_v42  ;;  %3149 = vmatpush1.bf16.msk.msra.mxu0 %vm4536_vm14, %v3148_v36  ;;  %v2247_v3 = vsel %vm472_vm4, %v3947_v28, %v3937_v0  ;;  %v2248_v40 = vsel %vm472_vm4, %v3948_v20, %v3938_v53 }
 0x490   :  { %3230 = vmatprep.subr.msk.bf16.mxu1 %vm4651_vm2, %v3229_v1  ;;  %v3232_v10 = vpack.c.bf16 %v2248_v40, %v2247_v3  ;;  %vm5746_vm2 = vmmov %vm5745_vm10 }
 0x491   :  { %vm5747_vm9 = vmmov %vm5746_vm2 }
 0x492   :  { %3233 = vmatpush1.bf16.msk.msra.mxu1 %vm4536_vm14, %v3232_v10 }
 0x493   :  { %2566 = vmatmul.mubr.bf16.gmra.mrb[12].mxu1 %v3962_v27 }
 0x494   :  { %2608 = vmatprep.mubr.bf16.mxu1 %v5743_v42 }
 0x496   :  { %2886 = vmatmul.mubr.msk.bf16.vlgmr.msra.gmra.mrb[8].mxu0 %vm5744_vm11, %v3963_v4 }
 0x497   :  { %2476 = vmatprep.mubr.bf16.mxu0 %v5743_v42 }
 0x499   :  { %v2328_v21 = vpop.permute.xlu1 %2327 }
 0x49b   :  { %2888 = vmatmul.mubr.msk.bf16.vlgmr.msra.gmra.mrb[8].mxu1 %vm5745_vm10, %v3963_v4 }
 0x49c   :  { %2618 = vmatprep.mubr.bf16.mxu1 %v5743_v42 }
 0x49d   :  { %v2333_v62 = vpop.permute.xlu0 %2332  ;;  %v2338_v15 = vpop.permute.xlu1 %2337 }
 0x49e   :  { %2887 = vmatmul.mubr.msk.bf16.gmra.mrb[12].mxu0 %vm5746_vm2, %v3964_v35 }
 0x4a1   :  { %v2343_v24 = vpop.permute.xlu0 %2342 }
 0x4a3   :  { %2889 = vmatmul.mubr.msk.bf16.gmra.mrb[12].mxu1 %vm5747_vm9, %v3964_v35 }
 0x569   :  { %v2468_v17 = vpop.f32.mrb[8].mxu0 }
 0x56a   :  { %v3250_v8 = vadd.f32 %v2468_v17, %v2328_v21  ;;  %v2470_v26 = vpop.f32.mrb[9].mxu0 }
 0x56b   :  { %v3251_v52 = vadd.f32 %v2470_v26, %v2328_v21  ;;  %v2472_v22 = vpop.f32.mrb[10].mxu0 }
 0x56c   :  { %v2474_v6 = vpop.f32.mrb[11].mxu0  ;;  %v3252_v14 = vadd.f32 %v2472_v22, %v2333_v62 }
 0x56d   :  { %v2629_v48 = vadd.f32 %v3251_v52, %v3250_v8  ;;  %v3253_v2 = vadd.f32 %v2474_v6, %v2333_v62 }
 0x56e   :  { %v2610_v51 = vpop.f32.mrb[8].mxu1 }
 0x56f   :  { %v3258_v61 = vadd.f32 %v2610_v51, %v2328_v21  ;;  %v2612_v12 = vpop.f32.mrb[9].mxu1  ;;  %2630 = vadd.xlane.f32.xlu1 %v2629_v48  ;;  %v2632_v57 = vadd.f32 %v3253_v2, %v3252_v14 }
 0x570   :  { %v3259_v32 = vadd.f32 %v2612_v12, %v2328_v21  ;;  %v2614_v41 = vpop.f32.mrb[10].mxu1 }
 0x571   :  { %v3260_v31 = vadd.f32 %v2614_v41, %v2333_v62  ;;  %v2616_v39 = vpop.f32.mrb[11].mxu1  ;;  %v2478_v54 = vpop.f32.mrb[12].mxu0 }
 0x572   :  { %v2645_v5 = vadd.f32 %v3259_v32, %v3258_v61  ;;  %v3261_v9 = vadd.f32 %v2616_v39, %v2333_v62  ;;  %v2480_v38 = vpop.f32.mrb[13].mxu0  ;;  %v5439_v63 = vadd.f32 %v2478_v54, %v2338_v15 }
 0x573   :  { %v2482_v33 = vpop.f32.mrb[14].mxu0  ;;  %v5441_v19 = vadd.f32 %v2480_v38, %v2338_v15 }
 0x574   :  { %v2648_v16 = vadd.f32 %v3261_v9, %v3260_v31  ;;  %2646 = vadd.xlane.f32.xlu0 %v2645_v5  ;;  %v5437_v60 = vadd.f32 %v2482_v33, %v2343_v24  ;;  %v2484_v23 = vpop.f32.mrb[15].mxu0 }
 0x575   :  { %v3257_v56 = vadd.f32 %v2484_v23, %v2343_v24  ;;  %v2635_v29 = vadd.f32 %v5441_v19, %v5439_v63 }
 0x576   :  { %v2620_v18 = vpop.f32.mrb[12].mxu1  ;;  %2649 = vadd.xlane.f32.xlu1 %v2648_v16 }
 0x577   :  { %v2638_v7 = vadd.f32 %v3257_v56, %v5437_v60  ;;  %v2622_v27 = vpop.f32.mrb[13].mxu1  ;;  %v3262_v55 = vadd.f32 %v2620_v18, %v2338_v15 }
 0x578   :  { %v2624_v37 = vpop.f32.mrb[14].mxu1  ;;  %2633 = vadd.xlane.f32.xlu0 %v2632_v57  ;;  %v3263_v46 = vadd.f32 %v2622_v27, %v2338_v15 }
 0x579   :  { %v3264_v25 = vadd.f32 %v2624_v37, %v2343_v24  ;;  %v2626_v34 = vpop.f32.mrb[15].mxu1 }
 0x57a   :  { %v3265_v30 = vadd.f32 %v2626_v34, %v2343_v24  ;;  %2639 = vadd.xlane.f32.xlu1 %v2638_v7  ;;  %v2651_v50 = vadd.f32 %v3263_v46, %v3262_v55  ;;  %v2778_v34 = vld [vmem:[%s5608_s8 + $0x8] sm:$0xff] }
 0x57c   :  { %v2654_v43 = vadd.f32 %v3265_v30, %v3264_v25  ;;  %2636 = vadd.xlane.f32.xlu0 %v2635_v29 }
 0x57e   :  { %2655 = vadd.xlane.f32.xlu1 %v2654_v43 }
 0x580   :  { %2652 = vadd.xlane.f32.xlu0 %v2651_v50 }
 0x5fc   :  { %v2631_v44 = vpop.xlane.xlu1 %2630 }
 0x601   :  { %v2647_v59 = vpop.xlane.xlu0 %2646 }
 0x602   :  { %v2657_v58 = vadd.f32 %v2647_v59, %v2631_v44 }
 0x603   :  { %v2650_v53 = vpop.xlane.xlu1 %2649 }
 0x604   :  { %v2661_v0 = vmul.f32 0.001953125, %v2657_v58 }
 0x605   :  { %v2634_v42 = vpop.xlane.xlu0 %2633 }
 0x606   :  { %v2658_v47 = vadd.f32 %v2650_v53, %v2634_v42  ;;  %v5446_v45 = vsub.f32 %v3250_v8, %v2661_v0  ;;  %v5448_v49 = vsub.f32 %v3251_v52, %v2661_v0  ;;  %v5450_v11 = vsub.f32 %v3258_v61, %v2661_v0 }
 0x607   :  { %v2640_v36 = vpop.xlane.xlu1 %2639  ;;  %v5452_v1 = vsub.f32 %v3259_v32, %v2661_v0 }
 0x608   :  { %v2662_v13 = vmul.f32 0.001953125, %v2658_v47  ;;  %v2681_v4 = vmul.f32 %v5446_v45, %v5446_v45  ;;  %v2682_v20 = vmul.f32 %v5448_v49, %v5448_v49  ;;  %v2705_v3 = vmul.f32 %v5450_v11, %v5450_v11 }
 0x609   :  { %v2637_v28 = vpop.xlane.xlu0 %2636  ;;  %v2706_v40 = vmul.f32 %v5452_v1, %v5452_v1 }
 0x60a   :  { %v2689_v10 = vadd.f32 %v2682_v20, %v2681_v4  ;;  %v5462_v35 = vsub.f32 %v3252_v14, %v2662_v13  ;;  %v5464_v21 = vsub.f32 %v3253_v2, %v2662_v13  ;;  %v5466_v17 = vsub.f32 %v3260_v31, %v2662_v13 }
 0x60b   :  { %v2656_v8 = vpop.xlane.xlu1 %2655  ;;  %v5468_v26 = vsub.f32 %v3261_v9, %v2662_v13  ;;  %v2713_v32 = vadd.f32 %v2706_v40, %v2705_v3  ;;  %v2733_v3 = vld [vmem:[%s5609_s7] sm:$0xff] }
 0x60c   :  { %v2660_v52 = vadd.f32 %v2656_v8, %v2640_v36  ;;  %2690 = vadd.xlane.f32.xlu0 %v2689_v10  ;;  %v2683_v22 = vmul.f32 %v5462_v35, %v5462_v35  ;;  %v2684_v6 = vmul.f32 %v5464_v21, %v5464_v21  ;;  %v2707_v48 = vmul.f32 %v5466_v17, %v5466_v17 }
 0x60d   :  { %v2653_v62 = vpop.xlane.xlu0 %2652  ;;  %v2708_v51 = vmul.f32 %v5468_v26, %v5468_v26 }
 0x60e   :  { %v2664_v61 = vmul.f32 0.001953125, %v2660_v52  ;;  %v2659_v12 = vadd.f32 %v2653_v62, %v2637_v28  ;;  %v2692_v41 = vadd.f32 %v2684_v6, %v2683_v22  ;;  %v2734_v22 = vld [vmem:[%s5609_s7 + $0x8] sm:$0xff] }
 0x60f   :  { %v2716_v14 = vadd.f32 %v2708_v51, %v2707_v48  ;;  %v2735_v48 = vld [vmem:[%s5609_s7 + $0x10] sm:$0xff]  ;;  %v2736_v51 = vld [vmem:[%s5609_s7 + $0x18] sm:$0xff] }
 0x610   :  { %v2663_v31 = vmul.f32 0.001953125, %v2659_v12  ;;  %2714 = vadd.xlane.f32.xlu0 %v2713_v32  ;;  %2693 = vadd.xlane.f32.xlu1 %v2692_v41  ;;  %v5479_v39 = vsub.f32 %v5437_v60, %v2664_v61  ;;  %v5481_v54 = vsub.f32 %v3257_v56, %v2664_v61  ;;  %v5483_v2 = vsub.f32 %v3264_v25, %v2664_v61  ;;  %v2777_v25 = vld [vmem:[%s5608_s8] sm:$0xff] }
 0x611   :  { %v5485_v5 = vsub.f32 %v3265_v30, %v2664_v61 }
 0x612   :  { %v5488_v9 = vsub.f32 %v5439_v63, %v2663_v31  ;;  %v5491_v38 = vsub.f32 %v5441_v19, %v2663_v31  ;;  %v2687_v24 = vmul.f32 %v5479_v39, %v5479_v39  ;;  %v2688_v33 = vmul.f32 %v5481_v54, %v5481_v54 }
 0x613   :  { %v5497_v16 = vsub.f32 %v3262_v55, %v2663_v31  ;;  %v5499_v60 = vsub.f32 %v3263_v46, %v2663_v31  ;;  %v2711_v56 = vmul.f32 %v5483_v2, %v5483_v2  ;;  %v2712_v57 = vmul.f32 %v5485_v5, %v5485_v5  ;;  %v2779_v31 = vld [vmem:[%s5608_s8 + $0x10] sm:$0xff] }
 0x614   :  { %2717 = vadd.xlane.f32.xlu1 %v2716_v14  ;;  %v2685_v23 = vmul.f32 %v5488_v9, %v5488_v9  ;;  %v2686_v15 = vmul.f32 %v5491_v38, %v5491_v38  ;;  %v2698_v19 = vadd.f32 %v2688_v33, %v2687_v24  ;;  %v2780_v14 = vld [vmem:[%s5608_s8 + $0x18] sm:$0xff] }
 0x615   :  { %v2709_v18 = vmul.f32 %v5497_v16, %v5497_v16  ;;  %v2710_v7 = vmul.f32 %v5499_v60, %v5499_v60  ;;  %v2722_v37 = vadd.f32 %v2712_v57, %v2711_v56 }
 0x616   :  { %v2695_v63 = vadd.f32 %v2686_v15, %v2685_v23 }
 0x617   :  { %v2719_v27 = vadd.f32 %v2710_v7, %v2709_v18 }
 0x618   :  { %2696 = vadd.xlane.f32.xlu0 %v2695_v63  ;;  %2699 = vadd.xlane.f32.xlu1 %v2698_v19 }
 0x61c   :  { %2720 = vadd.xlane.f32.xlu0 %v2719_v27  ;;  %2723 = vadd.xlane.f32.xlu1 %v2722_v37 }
 0x62d   :  { %2783 = vperm.xlu1 %3628, %v2777_v25  }
 0x632   :  { %2788 = vperm.xlu0 %3627, %v2778_v34  }
 0x699   :  { %v2691_v29 = vpop.xlane.xlu0 %2690 }
 0x69d   :  { %v2715_v55 = vpop.xlane.xlu0 %2714  ;;  %v2694_v46 = vpop.xlane.xlu1 %2693 }
 0x69e   :  { %v2725_v30 = vadd.f32 %v2715_v55, %v2691_v29 }
 0x6a0   :  { %v2729_v43 = vmul.f32 0.001953125, %v2725_v30 }
 0x6a1   :  { %v2718_v50 = vpop.xlane.xlu1 %2717 }
 0x6a2   :  { %v2737_v44 = vadd.f32 1e-05, %v2729_v43  ;;  %v2726_v59 = vadd.f32 %v2718_v50, %v2694_v46 }
 0x6a4   :  { %3973 = vrsqrt.f32 %v2737_v44  ;;  %v2730_v58 = vmul.f32 0.001953125, %v2726_v59 }
 0x6a5   :  { %v2697_v53 = vpop.xlane.xlu0 %2696  ;;  %v2700_v0 = vpop.xlane.xlu1 %2699 }
 0x6a6   :  { %v2738_v42 = vadd.f32 1e-05, %v2730_v58 }
 0x6a8   :  { %3975 = vrsqrt.f32 %v2738_v42 }
 0x6a9   :  { %v2721_v47 = vpop.xlane.xlu0 %2720  ;;  %v2724_v36 = vpop.xlane.xlu1 %2723 }
 0x6aa   :  { %v2727_v13 = vadd.f32 %v2721_v47, %v2697_v53  ;;  %v2728_v4 = vadd.f32 %v2724_v36, %v2700_v0 }
 0x6ac   :  { %v2731_v20 = vmul.f32 0.001953125, %v2727_v13  ;;  %v2732_v28 = vmul.f32 0.001953125, %v2728_v4 }
 0x6ad   :  { %v2784_v33 = vpop.permute.xlu1 %2783 }
 0x6ae   :  { %v3974_v40 = vpop.eup %3973  ;;  %v2739_v10 = vadd.f32 1e-05, %v2731_v20  ;;  %v2740_v8 = vadd.f32 1e-05, %v2732_v28 }
 0x6af   :  { %v2745_v52 = vmul.f32 %v3974_v40, %v2733_v3 }
 0x6b0   :  { %3977 = vrsqrt.f32 %v2739_v10 }
 0x6b1   :  { %3979 = vrsqrt.f32 %v2740_v8  ;;  %2751 = vperm.xlu0 %3627, %v2745_v52   ;;  %v2789_v24 = vpop.permute.xlu0 %2788 }
 0x6b2   :  { %v3976_v6 = vpop.eup %3975 }
 0x6b3   :  { %v2746_v62 = vmul.f32 %v3976_v6, %v2734_v22 }
 0x6b5   :  { %2756 = vperm.xlu1 %3628, %v2746_v62  }
 0x6ba   :  { %v3978_v61 = vpop.eup %3977 }
 0x6bb   :  { %v3980_v12 = vpop.eup %3979  ;;  %v2747_v32 = vmul.f32 %v3978_v61, %v2735_v48 }
 0x6bc   :  { %v2748_v41 = vmul.f32 %v3980_v12, %v2736_v51 }
 0x6bd   :  { %2761 = vperm.xlu1 %3628, %v2747_v32  }
 0x6be   :  { %2766 = vperm.xlu0 %3627, %v2748_v41  }
 0x6c1   :  { %2793 = vperm.xlu1 %3628, %v2779_v31  }
 0x6c2   :  { %2798 = vperm.xlu0 %3627, %v2780_v14  }
 0x730   :  { %v2752_v23 = vpop.permute.xlu0 %2751 }
 0x731   :  { %v2769_v15 = vmul.f32 %v2752_v23, %v5446_v45  ;;  %v2770_v56 = vmul.f32 %v2752_v23, %v5448_v49  ;;  %v2817_v57 = vmul.f32 %v2752_v23, %v5450_v11  ;;  %v2818_v63 = vmul.f32 %v2752_v23, %v5452_v1 }
 0x733   :  { %v2801_v19 = vadd.f32 %v2784_v33, %v2769_v15  ;;  %v2802_v18 = vadd.f32 %v2784_v33, %v2770_v56  ;;  %v2825_v7 = vadd.f32 %v2817_v57, %v2784_v33  ;;  %v2826_v27 = vadd.f32 %v2818_v63, %v2784_v33 }
 0x734   :  { %v2757_v37 = vpop.permute.xlu1 %2756 }
 0x735   :  { %v2809_v25 = vmax.f32 %v2801_v19, 0.0  ;;  %v2810_v34 = vmax.f32 %v2802_v18, 0.0  ;;  %v2833_v29 = vmax.f32 %v2825_v7, 0.0  ;;  %v2834_v55 = vmax.f32 %v2826_v27, 0.0 }
 0x736   :  { %v2771_v46 = vmul.f32 %v2757_v37, %v5462_v35  ;;  %v2772_v30 = vmul.f32 %v2757_v37, %v5464_v21  ;;  %v2819_v45 = vmul.f32 %v2757_v37, %v5466_v17  ;;  %v2820_v49 = vmul.f32 %v2757_v37, %v5468_v26 }
 0x737   :  { %2841 = vst [vmem:[%s5610_s9] sm:$0xff] %v2809_v25  ;;  %2842 = vst [vmem:[%s5610_s9 + $0x8] sm:$0xff] %v2810_v34 }
 0x738   :  { %2890 = vst [vmem:[%s5610_s9 + $0x40] sm:$0xff] %v2833_v29  ;;  %2891 = vst [vmem:[%s5610_s9 + $0x48] sm:$0xff] %v2834_v55  ;;  %v2803_v11 = vadd.f32 %v2789_v24, %v2771_v46  ;;  %v2804_v1 = vadd.f32 %v2789_v24, %v2772_v30  ;;  %v2827_v35 = vadd.f32 %v2819_v45, %v2789_v24 }
 0x739   :  { %v2828_v21 = vadd.f32 %v2820_v49, %v2789_v24 }
 0x73a   :  { %v2811_v17 = vmax.f32 %v2803_v11, 0.0  ;;  %v2812_v26 = vmax.f32 %v2804_v1, 0.0  ;;  %v2835_v43 = vmax.f32 %v2827_v35, 0.0 }
 0x73b   :  { %v2836_v50 = vmax.f32 %v2828_v21, 0.0 }
 0x73c   :  { %2843 = vst [vmem:[%s5610_s9 + $0x10] sm:$0xff] %v2811_v17  ;;  %2844 = vst [vmem:[%s5610_s9 + $0x18] sm:$0xff] %v2812_v26  ;;  %v2762_v44 = vpop.permute.xlu1 %2761 }
 0x73d   :  { %2892 = vst [vmem:[%s5610_s9 + $0x50] sm:$0xff] %v2835_v43  ;;  %2893 = vst [vmem:[%s5610_s9 + $0x58] sm:$0xff] %v2836_v50  ;;  %v2767_v59 = vpop.permute.xlu0 %2766  ;;  %v2773_v58 = vmul.f32 %v2762_v44, %v5488_v9  ;;  %v2774_v53 = vmul.f32 %v2762_v44, %v5491_v38  ;;  %v2821_v0 = vmul.f32 %v2762_v44, %v5497_v16 }
 0x73e   :  { %v2822_v42 = vmul.f32 %v2762_v44, %v5499_v60  ;;  %v2775_v47 = vmul.f32 %v2767_v59, %v5479_v39  ;;  %v2776_v36 = vmul.f32 %v2767_v59, %v5481_v54  ;;  %v2823_v13 = vmul.f32 %v2767_v59, %v5483_v2 }
 0x73f   :  { %v2824_v4 = vmul.f32 %v2767_v59, %v5485_v5 }
 0x740   :  { %v2794_v20 = vpop.permute.xlu1 %2793 }
 0x741   :  { %v2799_v28 = vpop.permute.xlu0 %2798  ;;  %v2805_v3 = vadd.f32 %v2794_v20, %v2773_v58  ;;  %v2806_v40 = vadd.f32 %v2794_v20, %v2774_v53  ;;  %v2829_v10 = vadd.f32 %v2821_v0, %v2794_v20  ;;  %v2830_v9 = vadd.f32 %v2822_v42, %v2794_v20 }
 0x742   :  { %v2807_v8 = vadd.f32 %v2799_v28, %v2775_v47  ;;  %v2808_v38 = vadd.f32 %v2799_v28, %v2776_v36  ;;  %v2831_v52 = vadd.f32 %v2823_v13, %v2799_v28  ;;  %v2832_v16 = vadd.f32 %v2824_v4, %v2799_v28 }
 0x743   :  { %v2813_v22 = vmax.f32 %v2805_v3, 0.0  ;;  %v2814_v60 = vmax.f32 %v2806_v40, 0.0  ;;  %v2837_v6 = vmax.f32 %v2829_v10, 0.0  ;;  %v2838_v39 = vmax.f32 %v2830_v9, 0.0 }
 0x744   :  { %v2815_v62 = vmax.f32 %v2807_v8, 0.0  ;;  %v2816_v54 = vmax.f32 %v2808_v38, 0.0  ;;  %v2839_v48 = vmax.f32 %v2831_v52, 0.0  ;;  %v2840_v2 = vmax.f32 %v2832_v16, 0.0 }
 0x745   :  { %2845 = vst [vmem:[%s5610_s9 + $0x20] sm:$0xff] %v2813_v22  ;;  %2846 = vst [vmem:[%s5610_s9 + $0x28] sm:$0xff] %v2814_v60 }
 0x746   :  { %2894 = vst [vmem:[%s5610_s9 + $0x60] sm:$0xff] %v2837_v6  ;;  %2895 = vst [vmem:[%s5610_s9 + $0x68] sm:$0xff] %v2838_v39 }
 0x747   :  { %2847 = vst [vmem:[%s5610_s9 + $0x30] sm:$0xff] %v2815_v62  ;;  %2848 = vst [vmem:[%s5610_s9 + $0x38] sm:$0xff] %v2816_v54 }
 0x748   :  { %2896 = vst [vmem:[%s5610_s9 + $0x70] sm:$0xff] %v2839_v48  ;;  %2897 = vst [vmem:[%s5610_s9 + $0x78] sm:$0xff] %v2840_v2 }

</bundles_post_ra>
